<compile_context>
chip_gen: v5e
topology: v5e:2x2
jax: 0.10.0
libtpu: 0.0.40
codegen_flags: <defaults>
</compile_context>

<pallas_src>
import functools

import jax
import jax.numpy as jnp
from jax.experimental import pallas as pl
from jax.experimental.pallas import tpu as pltpu


def _round_up(x, m):
    return (x + m - 1) // m * m


# ------------------------------ Pallas kernel --------------------------------

def _conv3x3_stats_kernel(xa_ref, xb_ref, w_ref, b_ref, m_ref,
                          y_ref, s_ref, q_ref, *, tap_offsets, tm):
    """3x3 conv on a flattened zero-padded slab + bias + masked BN statistics.

    xa_ref : (tm, Cin)    bf16  -- slab rows [t*tm, (t+1)*tm)
    xb_ref : (tm, Cin)    bf16  -- slab rows [(t+1)*tm, (t+2)*tm)   (halo)
    w_ref  : (9, Cin, Cout) bf16
    b_ref  : (1, Cout)    f32
    m_ref  : (tm, 1)      f32   -- 1.0 on valid (interior) output rows
    y_ref  : (tm, Cout)   bf16  -- conv + bias output (padded frame)
    s_ref  : (1, 1, Cout) f32   -- per-core resident accumulator: sum(z)
    q_ref  : (1, 1, Cout) f32   -- per-core resident accumulator: sum(z^2)
    """
    i = pl.program_id(1)
    cout = w_ref.shape[-1]

    # tm >= halo, so [0, tm + halo) lives inside the two concatenated blocks.
    xcat = jnp.concatenate([xa_ref[...], xb_ref[...]], axis=0)      # (2*tm, Cin)

    z = jnp.zeros((tm, cout), jnp.float32)
    for t, off in enumerate(tap_offsets):
        z += jnp.dot(xcat[off:off + tm], w_ref[t],
                     preferred_element_type=jnp.float32)

    y_ref[...] = (z + b_ref[...]).astype(y_ref.dtype)

    @pl.when(i == 0)
    def _():
        s_ref[...] = jnp.zeros_like(s_ref)
        q_ref[...] = jnp.zeros_like(q_ref)

    zm = z * m_ref[...]                                  # zero pad / garbage rows
    s_ref[...] += jnp.sum(zm, axis=0, keepdims=True)[None]
    q_ref[...] += jnp.sum(zm * z, axis=0, keepdims=True)[None]


# --------------------------------- wrapper ------------------------------------

def deformation_mix_forward(params, x, *, max_tm=1024):
    """params: dict(w:(Cout,Cin,3,3), b:(Cout,), gamma:(Cout,), beta:(Cout,))
       x     : (B, Cin, H, W) float32 (NCHW, like the torch module)
       returns (B, Cout, H, W) float32."""
    w, b, gamma, beta = params["w"], params["b"], params["gamma"], params["beta"]
    cout, cin = int(w.shape[0]), int(w.shape[1])

    xh = jnp.transpose(x, (0, 2, 3, 1))                  # NHWC
    B, H, W, _ = xh.shape
    Hp, P = H + 2, W + 2                                 # padded height / width
    n_rows = B * Hp * P                                  # rows in the padded frame
    halo = 2 * (P + 1)                                   # max tap offset

    # ---- tiling: even number of tiles (2-way core split), tm mult of 16, >= halo
    nt = max(-(-n_rows // max_tm), 2)
    nt += nt % 2
    tm = max(_round_up(-(-n_rows // nt), 16), _round_up(halo, 16))
    tiles_per_core = nt // 2
    mp = nt * tm

    # ---- bf16 flattened zero-padded slab, extended so blocks 0..nt exist -------
    x_pad = jnp.pad(xh.astype(jnp.bfloat16), ((0, 0), (1, 1), (1, 1), (0, 0)))
    x_flat = x_pad.reshape(n_rows, cin)
    total_rows = (nt + 1) * tm
    x_ext = jnp.pad(x_flat, ((P + 1, total_rows - (P + 1) - n_rows), (0, 0)))

    # validity mask over the padded frame (interior pixels only)
    mask = jnp.zeros((B, Hp, P), jnp.float32).at[:, 1:H + 1, 1:W + 1].set(1.0)
    mask = jnp.pad(mask.reshape(n_rows, 1), ((0, mp - n_rows), (0, 0)))

    # torch (Cout,Cin,kh,kw) -> per-tap (9, Cin, Cout), bf16 for the MXU
    w9 = jnp.transpose(w, (2, 3, 1, 0)).reshape(9, cin, cout).astype(jnp.bfloat16)
    bias = b.astype(jnp.float32).reshape(1, cout)

    # tap (ki,kj) reads slab row  r + ki*P + kj  of the (P+1)-row-shifted slab
    tap_offsets = tuple(ki * P + kj for ki in range(3) for kj in range(3))

    tile_map = lambda c, i: (c * tiles_per_core + i, 0)

    y_pad, ch_sum, ch_sq = pl.pallas_call(
        functools.partial(_conv3x3_stats_kernel, tap_offsets=tap_offsets, tm=tm),
        out_shape=(jax.ShapeDtypeStruct((mp, cout), jnp.bfloat16),
                   jax.ShapeDtypeStruct((2, 1, cout), jnp.float32),
                   jax.ShapeDtypeStruct((2, 1, cout), jnp.float32)),
        grid=(2, tiles_per_core),
        in_specs=[
            pl.BlockSpec((tm, cin), tile_map),                           # slab tile t
            pl.BlockSpec((tm, cin),
                         lambda c, i: (c * tiles_per_core + i + 1, 0)),  # tile t+1 (halo)
            pl.BlockSpec((9, cin, cout), lambda c, i: (0, 0, 0)),        # weights
            pl.BlockSpec((1, cout), lambda c, i: (0, 0)),                # bias
            pl.BlockSpec((tm, 1), tile_map),                             # validity mask
        ],
        out_specs=(pl.BlockSpec((tm, cout), tile_map),
                   pl.BlockSpec((1, 1, cout), lambda c, i: (c, 0, 0)),   # per-core sums
                   pl.BlockSpec((1, 1, cout), lambda c, i: (c, 0, 0))),
        compiler_params=pltpu.CompilerParams(
            dimension_semantics=("parallel", "arbitrary")),
    )(x_ext, x_ext, w9, bias, mask)

    # ---- tiny Cout-sized BN epilogue (training-mode, biased variance) ----------
    n_valid = jnp.float32(B * H * W)
    sum_z = jnp.sum(ch_sum, axis=(0, 1))                 # reduce the 2 core partials
    sum_q = jnp.sum(ch_sq, axis=(0, 1))
    mean_z = sum_z / n_valid                             # stats of pre-bias output
    var = jnp.maximum(sum_q / n_valid - mean_z * mean_z, 0.0)
    mean = mean_z + b.astype(jnp.float32)
    scale = gamma.astype(jnp.float32) / jnp.sqrt(var + 1e-5)
    shift = beta.astype(jnp.float32) - mean * scale

    # crop the pad ring, apply affine + LeakyReLU fused with the XLA epilogue
    y = y_pad[:n_rows].astype(jnp.float32).reshape(B, Hp, P, cout)
    y = y[:, 1:H + 1, 1:W + 1, :] * scale + shift
    y = jnp.where(y >= 0, y, 0.2 * y)
    return jnp.transpose(y, (0, 3, 1, 2))


# ------------------------------ pure-JAX reference ----------------------------

def _reference(params, x):
    w, b, gamma, beta = params["w"], params["b"], params["gamma"], params["beta"]
    y = jax.lax.conv_general_dilated(
        x, w, window_strides=(1, 1), padding=((1, 1), (1, 1)),
        dimension_numbers=("NCHW", "OIHW", "NCHW"))
    y = y + b[None, :, None, None]
    mean = jnp.mean(y, axis=(0, 2, 3), keepdims=True)
    var = jnp.mean((y - mean) ** 2, axis=(0, 2, 3), keepdims=True)
    y = (y - mean) / jnp.sqrt(var + 1e-5)
    y = y * gamma[None, :, None, None] + beta[None, :, None, None]
    return jnp.where(y >= 0, y, 0.2 * y)


# ----------------------------------- main --------------------------------------

if __name__ == "__main__":
    B, Cin, H, W = 2, 4, 16, 16
    Cout = 16

    key = jax.random.PRNGKey(0)
    kx, kw, kb, kg, kbe = jax.random.split(key, 5)
    x = jax.random.normal(kx, (B, Cin, H, W), jnp.float32)
    params = dict(
        w=0.1 * jax.random.normal(kw, (Cout, Cin, 3, 3), jnp.float32),
        b=0.1 * jax.random.normal(kb, (Cout,), jnp.float32),
        gamma=1.0 + 0.1 * jax.random.normal(kg, (Cout,), jnp.float32),
        beta=0.1 * jax.random.normal(kbe, (Cout,), jnp.float32),
    )

    fwd = jax.jit(deformation_mix_forward)
    out = fwd(params, x)
    jax.block_until_ready(out)

    ref = _reference(params, x)
    err = float(jnp.max(jnp.abs(out - ref)))

    assert out.shape == (B, Cout, H, W)
    assert bool(jnp.all(jnp.isfinite(out)))
    assert err < 5e-2, f"max abs err vs reference: {err}"
    print("KERNEL_OK")
</pallas_src>

<mosaic_0001>
module attributes {stable_mosaic.version = 11 : i64} {
  func.func @_conv3x3_stats_kernel(%arg0: i32, %arg1: i32, %arg2: memref<336x4xbf16, #tpu.memory_space<vmem>>, %arg3: memref<336x4xbf16, #tpu.memory_space<vmem>>, %arg4: memref<9x4x16xbf16, #tpu.memory_space<vmem>>, %arg5: memref<1x16xf32, #tpu.memory_space<vmem>>, %arg6: memref<336x1xf32, #tpu.memory_space<vmem>>, %arg7: memref<336x16xbf16, #tpu.memory_space<vmem>>, %arg8: memref<1x1x16xf32, #tpu.memory_space<vmem>>, %arg9: memref<1x1x16xf32, #tpu.memory_space<vmem>>) attributes {dimension_semantics = [#tpu.dimension_semantics<parallel>, #tpu.dimension_semantics<arbitrary>], iteration_bounds = array<i64: 2, 1>, scalar_prefetch = 0 : i64, scratch_operands = 0 : i64, tpu.core_type = #tpu.core_type<tc>, window_params = [{transform_indices = @transform_0, window_bounds = array<i64: 336, 4>}, {transform_indices = @transform_1, window_bounds = array<i64: 336, 4>}, {pipeline_mode = #tpu.pipeline_mode<synchronous>, transform_indices = @transform_2, window_bounds = array<i64: 9, 4, 16>}, {pipeline_mode = #tpu.pipeline_mode<synchronous>, transform_indices = @transform_3, window_bounds = array<i64: 1, 16>}, {transform_indices = @transform_4, window_bounds = array<i64: 336, 1>}, {transform_indices = @transform_5, window_bounds = array<i64: 336, 16>}, {transform_indices = @transform_6, window_bounds = array<i64: 1, 1, 16>}, {transform_indices = @transform_7, window_bounds = array<i64: 1, 1, 16>}]} {
    %c0 = arith.constant 0 : index
    %c0_0 = arith.constant 0 : index
    %0 = vector.load %arg2[%c0, %c0_0] : memref<336x4xbf16, #tpu.memory_space<vmem>>, vector<336x4xbf16>
    %c0_1 = arith.constant 0 : index
    %c0_2 = arith.constant 0 : index
    %1 = vector.load %arg3[%c0_1, %c0_2] : memref<336x4xbf16, #tpu.memory_space<vmem>>, vector<336x4xbf16>
    %2 = tpu.concatenate %0, %1 in 0 : vector<336x4xbf16>, vector<336x4xbf16> -> vector<672x4xbf16>
    %cst = arith.constant 0.000000e+00 : f32
    %3 = vector.broadcast %cst : f32 to vector<336x16xf32>
    %4 = vector.extract_strided_slice %2 {offsets = [0, 0], sizes = [336, 4], strides = [1, 1]} : vector<672x4xbf16> to vector<336x4xbf16>
    %c0_3 = arith.constant 0 : index
    %c0_4 = arith.constant 0 : index
    %c0_5 = arith.constant 0 : index
    %5 = vector.load %arg4[%c0_3, %c0_4, %c0_5] : memref<9x4x16xbf16, #tpu.memory_space<vmem>>, vector<1x4x16xbf16>
    %6 = vector.shape_cast %5 : vector<1x4x16xbf16> to vector<4x16xbf16>
    %cst_6 = arith.constant dense<0.000000e+00> : vector<336x16xf32>
    %7 = tpu.matmul %4, %6, %cst_6 {dimension_numbers = #tpu.dot_dimension_numbers<[1], [0], [0], [1], [0, 0, 1, 1], [], []>} : vector<336x4xbf16>, vector<4x16xbf16>, vector<336x16xf32> -> vector<336x16xf32>
    %8 = arith.addf %3, %7 : vector<336x16xf32>
    %9 = vector.extract_strided_slice %2 {offsets = [1, 0], sizes = [336, 4], strides = [1, 1]} : vector<672x4xbf16> to vector<336x4xbf16>
    %c1 = arith.constant 1 : index
    %c0_7 = arith.constant 0 : index
    %c0_8 = arith.constant 0 : index
    %10 = vector.load %arg4[%c1, %c0_7, %c0_8] : memref<9x4x16xbf16, #tpu.memory_space<vmem>>, vector<1x4x16xbf16>
    %11 = vector.shape_cast %10 : vector<1x4x16xbf16> to vector<4x16xbf16>
    %cst_9 = arith.constant dense<0.000000e+00> : vector<336x16xf32>
    %12 = tpu.matmul %9, %11, %cst_9 {dimension_numbers = #tpu.dot_dimension_numbers<[1], [0], [0], [1], [0, 0, 1, 1], [], []>} : vector<336x4xbf16>, vector<4x16xbf16>, vector<336x16xf32> -> vector<336x16xf32>
    %13 = arith.addf %8, %12 : vector<336x16xf32>
    %14 = vector.extract_strided_slice %2 {offsets = [2, 0], sizes = [336, 4], strides = [1, 1]} : vector<672x4xbf16> to vector<336x4xbf16>
    %c2 = arith.constant 2 : index
    %c0_10 = arith.constant 0 : index
    %c0_11 = arith.constant 0 : index
    %15 = vector.load %arg4[%c2, %c0_10, %c0_11] : memref<9x4x16xbf16, #tpu.memory_space<vmem>>, vector<1x4x16xbf16>
    %16 = vector.shape_cast %15 : vector<1x4x16xbf16> to vector<4x16xbf16>
    %cst_12 = arith.constant dense<0.000000e+00> : vector<336x16xf32>
    %17 = tpu.matmul %14, %16, %cst_12 {dimension_numbers = #tpu.dot_dimension_numbers<[1], [0], [0], [1], [0, 0, 1, 1], [], []>} : vector<336x4xbf16>, vector<4x16xbf16>, vector<336x16xf32> -> vector<336x16xf32>
    %18 = arith.addf %13, %17 : vector<336x16xf32>
    %19 = vector.extract_strided_slice %2 {offsets = [18, 0], sizes = [336, 4], strides = [1, 1]} : vector<672x4xbf16> to vector<336x4xbf16>
    %c3 = arith.constant 3 : index
    %c0_13 = arith.constant 0 : index
    %c0_14 = arith.constant 0 : index
    %20 = vector.load %arg4[%c3, %c0_13, %c0_14] : memref<9x4x16xbf16, #tpu.memory_space<vmem>>, vector<1x4x16xbf16>
    %21 = vector.shape_cast %20 : vector<1x4x16xbf16> to vector<4x16xbf16>
    %cst_15 = arith.constant dense<0.000000e+00> : vector<336x16xf32>
    %22 = tpu.matmul %19, %21, %cst_15 {dimension_numbers = #tpu.dot_dimension_numbers<[1], [0], [0], [1], [0, 0, 1, 1], [], []>} : vector<336x4xbf16>, vector<4x16xbf16>, vector<336x16xf32> -> vector<336x16xf32>
    %23 = arith.addf %18, %22 : vector<336x16xf32>
    %24 = vector.extract_strided_slice %2 {offsets = [19, 0], sizes = [336, 4], strides = [1, 1]} : vector<672x4xbf16> to vector<336x4xbf16>
    %c4 = arith.constant 4 : index
    %c0_16 = arith.constant 0 : index
    %c0_17 = arith.constant 0 : index
    %25 = vector.load %arg4[%c4, %c0_16, %c0_17] : memref<9x4x16xbf16, #tpu.memory_space<vmem>>, vector<1x4x16xbf16>
    %26 = vector.shape_cast %25 : vector<1x4x16xbf16> to vector<4x16xbf16>
    %cst_18 = arith.constant dense<0.000000e+00> : vector<336x16xf32>
    %27 = tpu.matmul %24, %26, %cst_18 {dimension_numbers = #tpu.dot_dimension_numbers<[1], [0], [0], [1], [0, 0, 1, 1], [], []>} : vector<336x4xbf16>, vector<4x16xbf16>, vector<336x16xf32> -> vector<336x16xf32>
    %28 = arith.addf %23, %27 : vector<336x16xf32>
    %29 = vector.extract_strided_slice %2 {offsets = [20, 0], sizes = [336, 4], strides = [1, 1]} : vector<672x4xbf16> to vector<336x4xbf16>
    %c5 = arith.constant 5 : index
    %c0_19 = arith.constant 0 : index
    %c0_20 = arith.constant 0 : index
    %30 = vector.load %arg4[%c5, %c0_19, %c0_20] : memref<9x4x16xbf16, #tpu.memory_space<vmem>>, vector<1x4x16xbf16>
    %31 = vector.shape_cast %30 : vector<1x4x16xbf16> to vector<4x16xbf16>
    %cst_21 = arith.constant dense<0.000000e+00> : vector<336x16xf32>
    %32 = tpu.matmul %29, %31, %cst_21 {dimension_numbers = #tpu.dot_dimension_numbers<[1], [0], [0], [1], [0, 0, 1, 1], [], []>} : vector<336x4xbf16>, vector<4x16xbf16>, vector<336x16xf32> -> vector<336x16xf32>
    %33 = arith.addf %28, %32 : vector<336x16xf32>
    %34 = vector.extract_strided_slice %2 {offsets = [36, 0], sizes = [336, 4], strides = [1, 1]} : vector<672x4xbf16> to vector<336x4xbf16>
    %c6 = arith.constant 6 : index
    %c0_22 = arith.constant 0 : index
    %c0_23 = arith.constant 0 : index
    %35 = vector.load %arg4[%c6, %c0_22, %c0_23] : memref<9x4x16xbf16, #tpu.memory_space<vmem>>, vector<1x4x16xbf16>
    %36 = vector.shape_cast %35 : vector<1x4x16xbf16> to vector<4x16xbf16>
    %cst_24 = arith.constant dense<0.000000e+00> : vector<336x16xf32>
    %37 = tpu.matmul %34, %36, %cst_24 {dimension_numbers = #tpu.dot_dimension_numbers<[1], [0], [0], [1], [0, 0, 1, 1], [], []>} : vector<336x4xbf16>, vector<4x16xbf16>, vector<336x16xf32> -> vector<336x16xf32>
    %38 = arith.addf %33, %37 : vector<336x16xf32>
    %39 = vector.extract_strided_slice %2 {offsets = [37, 0], sizes = [336, 4], strides = [1, 1]} : vector<672x4xbf16> to vector<336x4xbf16>
    %c7 = arith.constant 7 : index
    %c0_25 = arith.constant 0 : index
    %c0_26 = arith.constant 0 : index
    %40 = vector.load %arg4[%c7, %c0_25, %c0_26] : memref<9x4x16xbf16, #tpu.memory_space<vmem>>, vector<1x4x16xbf16>
    %41 = vector.shape_cast %40 : vector<1x4x16xbf16> to vector<4x16xbf16>
    %cst_27 = arith.constant dense<0.000000e+00> : vector<336x16xf32>
    %42 = tpu.matmul %39, %41, %cst_27 {dimension_numbers = #tpu.dot_dimension_numbers<[1], [0], [0], [1], [0, 0, 1, 1], [], []>} : vector<336x4xbf16>, vector<4x16xbf16>, vector<336x16xf32> -> vector<336x16xf32>
    %43 = arith.addf %38, %42 : vector<336x16xf32>
    %44 = vector.extract_strided_slice %2 {offsets = [38, 0], sizes = [336, 4], strides = [1, 1]} : vector<672x4xbf16> to vector<336x4xbf16>
    %c8 = arith.constant 8 : index
    %c0_28 = arith.constant 0 : index
    %c0_29 = arith.constant 0 : index
    %45 = vector.load %arg4[%c8, %c0_28, %c0_29] : memref<9x4x16xbf16, #tpu.memory_space<vmem>>, vector<1x4x16xbf16>
    %46 = vector.shape_cast %45 : vector<1x4x16xbf16> to vector<4x16xbf16>
    %cst_30 = arith.constant dense<0.000000e+00> : vector<336x16xf32>
    %47 = tpu.matmul %44, %46, %cst_30 {dimension_numbers = #tpu.dot_dimension_numbers<[1], [0], [0], [1], [0, 0, 1, 1], [], []>} : vector<336x4xbf16>, vector<4x16xbf16>, vector<336x16xf32> -> vector<336x16xf32>
    %48 = arith.addf %43, %47 : vector<336x16xf32>
    %c0_31 = arith.constant 0 : index
    %c0_32 = arith.constant 0 : index
    %49 = vector.load %arg5[%c0_31, %c0_32] : memref<1x16xf32, #tpu.memory_space<vmem>>, vector<1x16xf32>
    %50 = vector.broadcast %49 : vector<1x16xf32> to vector<336x16xf32>
    %51 = arith.addf %48, %50 : vector<336x16xf32>
    %52 = arith.truncf %51 : vector<336x16xf32> to vector<336x16xbf16>
    %c0_33 = arith.constant 0 : index
    %c0_34 = arith.constant 0 : index
    %53 = vector.load %arg7[%c0_33, %c0_34] : memref<336x16xbf16, #tpu.memory_space<vmem>>, vector<336x16xbf16>
    tpu.vector_store %arg7[%c0_33, %c0_34], %52 {strides = array<i32>} : memref<336x16xbf16, #tpu.memory_space<vmem>>, vector<336x16xbf16>,
    %c0_i32 = arith.constant 0 : i32
    %54 = arith.cmpi eq, %arg1, %c0_i32 : i32
    %55 = arith.extui %54 : i1 to i32
    %c0_i32_35 = arith.constant 0 : i32
    %56 = arith.cmpi ne, %55, %c0_i32_35 : i32
    scf.if %56 {
      %cst_52 = arith.constant 0.000000e+00 : f32
      %73 = vector.broadcast %cst_52 : f32 to vector<1x1x16xf32>
      %c0_53 = arith.constant 0 : index
      %c0_54 = arith.constant 0 : index
      %c0_55 = arith.constant 0 : index
      %74 = vector.load %arg8[%c0_53, %c0_54, %c0_55] : memref<1x1x16xf32, #tpu.memory_space<vmem>>, vector<1x1x16xf32>
      tpu.vector_store %arg8[%c0_53, %c0_54, %c0_55], %73 {strides = array<i32>} : memref<1x1x16xf32, #tpu.memory_space<vmem>>, vector<1x1x16xf32>,
      %cst_56 = arith.constant 0.000000e+00 : f32
      %75 = vector.broadcast %cst_56 : f32 to vector<1x1x16xf32>
      %c0_57 = arith.constant 0 : index
      %c0_58 = arith.constant 0 : index
      %c0_59 = arith.constant 0 : index
      %76 = vector.load %arg9[%c0_57, %c0_58, %c0_59] : memref<1x1x16xf32, #tpu.memory_space<vmem>>, vector<1x1x16xf32>
      tpu.vector_store %arg9[%c0_57, %c0_58, %c0_59], %75 {strides = array<i32>} : memref<1x1x16xf32, #tpu.memory_space<vmem>>, vector<1x1x16xf32>,
    } else {
    }
    %c0_36 = arith.constant 0 : index
    %c0_37 = arith.constant 0 : index
    %57 = vector.load %arg6[%c0_36, %c0_37] : memref<336x1xf32, #tpu.memory_space<vmem>>, vector<336x1xf32>
    %58 = vector.broadcast %57 : vector<336x1xf32> to vector<336x16xf32>
    %59 = arith.mulf %48, %58 : vector<336x16xf32>
    %c0_38 = arith.constant 0 : index
    %c0_39 = arith.constant 0 : index
    %c0_40 = arith.constant 0 : index
    %60 = vector.load %arg8[%c0_38, %c0_39, %c0_40] : memref<1x1x16xf32, #tpu.memory_space<vmem>>, vector<1x1x16xf32>
    %cst_41 = arith.constant dense<0.000000e+00> : vector<16xf32>
    %61 = vector.multi_reduction <add>, %59, %cst_41 [0] : vector<336x16xf32> to vector<16xf32>
    %62 = vector.shape_cast %61 : vector<16xf32> to vector<1x16xf32>
    %63 = vector.shape_cast %62 : vector<1x16xf32> to vector<1x1x16xf32>
    %64 = arith.addf %60, %63 : vector<1x1x16xf32>
    %c0_42 = arith.constant 0 : index
    %c0_43 = arith.constant 0 : index
    %c0_44 = arith.constant 0 : index
    %65 = vector.load %arg8[%c0_42, %c0_43, %c0_44] : memref<1x1x16xf32, #tpu.memory_space<vmem>>, vector<1x1x16xf32>
    tpu.vector_store %arg8[%c0_42, %c0_43, %c0_44], %64 {strides = array<i32>} : memref<1x1x16xf32, #tpu.memory_space<vmem>>, vector<1x1x16xf32>,
    %c0_45 = arith.constant 0 : index
    %c0_46 = arith.constant 0 : index
    %c0_47 = arith.constant 0 : index
    %66 = vector.load %arg9[%c0_45, %c0_46, %c0_47] : memref<1x1x16xf32, #tpu.memory_space<vmem>>, vector<1x1x16xf32>
    %67 = arith.mulf %59, %48 : vector<336x16xf32>
    %cst_48 = arith.constant dense<0.000000e+00> : vector<16xf32>
    %68 = vector.multi_reduction <add>, %67, %cst_48 [0] : vector<336x16xf32> to vector<16xf32>
    %69 = vector.shape_cast %68 : vector<16xf32> to vector<1x16xf32>
    %70 = vector.shape_cast %69 : vector<1x16xf32> to vector<1x1x16xf32>
    %71 = arith.addf %66, %70 : vector<1x1x16xf32>
    %c0_49 = arith.constant 0 : index
    %c0_50 = arith.constant 0 : index
    %c0_51 = arith.constant 0 : index
    %72 = vector.load %arg9[%c0_49, %c0_50, %c0_51] : memref<1x1x16xf32, #tpu.memory_space<vmem>>, vector<1x1x16xf32>
    tpu.vector_store %arg9[%c0_49, %c0_50, %c0_51], %71 {strides = array<i32>} : memref<1x1x16xf32, #tpu.memory_space<vmem>>, vector<1x1x16xf32>,
    return
  }
  func.func @transform_0(%arg0: i32, %arg1: i32) -> (i32, i32) {
    %c1_i32 = arith.constant 1 : i32
    %0 = arith.muli %arg0, %c1_i32 : i32
    %1 = arith.addi %0, %arg1 : i32
    %c0_i32 = arith.constant 0 : i32
    %c0_i32_0 = arith.constant 0 : i32
    return %1, %c0_i32 : i32, i32
  }
  func.func @transform_1(%arg0: i32, %arg1: i32) -> (i32, i32) {
    %c1_i32 = arith.constant 1 : i32
    %0 = arith.muli %arg0, %c1_i32 : i32
    %1 = arith.addi %0, %arg1 : i32
    %c1_i32_0 = arith.constant 1 : i32
    %2 = arith.addi %1, %c1_i32_0 : i32
    %c0_i32 = arith.constant 0 : i32
    %c0_i32_1 = arith.constant 0 : i32
    return %2, %c0_i32 : i32, i32
  }
  func.func @transform_2(%arg0: i32, %arg1: i32) -> (i32, i32, i32) {
    %c0_i32 = arith.constant 0 : i32
    %c0_i32_0 = arith.constant 0 : i32
    %c0_i32_1 = arith.constant 0 : i32
    %c0_i32_2 = arith.constant 0 : i32
    return %c0_i32, %c0_i32_0, %c0_i32_1 : i32, i32, i32
  }
  func.func @transform_3(%arg0: i32, %arg1: i32) -> (i32, i32) {
    %c0_i32 = arith.constant 0 : i32
    %c0_i32_0 = arith.constant 0 : i32
    %c0_i32_1 = arith.constant 0 : i32
    return %c0_i32, %c0_i32_0 : i32, i32
  }
  func.func @transform_4(%arg0: i32, %arg1: i32) -> (i32, i32) {
    %c1_i32 = arith.constant 1 : i32
    %0 = arith.muli %arg0, %c1_i32 : i32
    %1 = arith.addi %0, %arg1 : i32
    %c0_i32 = arith.constant 0 : i32
    %c0_i32_0 = arith.constant 0 : i32
    return %1, %c0_i32 : i32, i32
  }
  func.func @transform_5(%arg0: i32, %arg1: i32) -> (i32, i32) {
    %c1_i32 = arith.constant 1 : i32
    %0 = arith.muli %arg0, %c1_i32 : i32
    %1 = arith.addi %0, %arg1 : i32
    %c0_i32 = arith.constant 0 : i32
    %c0_i32_0 = arith.constant 0 : i32
    return %1, %c0_i32 : i32, i32
  }
  func.func @transform_6(%arg0: i32, %arg1: i32) -> (i32, i32, i32) {
    %c0_i32 = arith.constant 0 : i32
    %c0_i32_0 = arith.constant 0 : i32
    %c0_i32_1 = arith.constant 0 : i32
    return %arg0, %c0_i32, %c0_i32_0 : i32, i32, i32
  }
  func.func @transform_7(%arg0: i32, %arg1: i32) -> (i32, i32, i32) {
    %c0_i32 = arith.constant 0 : i32
    %c0_i32_0 = arith.constant 0 : i32
    %c0_i32_1 = arith.constant 0 : i32
    return %arg0, %c0_i32, %c0_i32_0 : i32, i32, i32
  }
}

</mosaic_0001>

<bundles_post_ra>
// kernel: deformation_mix_forward.1
= control target key start
LH: loop header
LB: loop body
LE: loop exit
PB: predicated region body
PF: predicated region fallthrough
CT: control target
= control target key end

     0   :  { %s4101_s24 = smov 0   ;;  %s4103_s25 = smov 0   ;;  %s5831_s0 = inlined_call_operand.vmem [shape: bf16[1008,4], index: 0, kind: input, shape index: {}, may-alias: {0,1}]   ;;  %s5832_s1 = inlined_call_operand.vmem [shape: bf16[1008,4], index: 1, kind: input, shape index: {}, may-alias: {0,1}]   ;;  %s5833_s2 = inlined_call_operand.vmem [shape: bf16[9,4,16], index: 2, kind: input, shape index: {}]   ;;  %s5834_s3 = inlined_call_operand.vmem [shape: f32[1,16], index: 3, kind: input, shape index: {}]   ;;  %s5835_s4 = inlined_call_operand.vmem [shape: f32[672,1], index: 4, kind: input, shape index: {}]   ;;  %s5836_s5 = inlined_call_operand.vmem [shape: bf16[672,16], index: 5, kind: output, shape index: {0}]   ;;  %s5837_s6 = inlined_call_operand.vmem [shape: f32[2,1,16], index: 6, kind: output, shape index: {1}]   ;;  %s5838_s7 = inlined_call_operand.vmem [shape: f32[2,1,16], index: 7, kind: output, shape index: {2}]  }
   0x1   :  { %s4105_s26 = smov 0  }
   0x2 LB: > { %s30_s27 = sadd.s32 1, %s4053_s25  ;;  %p3652_p0 = scmp.ge.s32.totalorder %s4057_s26, 1  ;;  %s4057_s26 = sphi %s4105_s26, %s18_s26   ;;  %s4053_s25 = sphi %s4103_s25, %s6065_s25   ;;  %s4049_s24 = sphi %s4101_s24, %s6064_s24  }
   0x3   : > { %p32_p1 = scmp.ge.s32.totalorder %s30_s27, 2  ;;  %p295_p2 = scmp.lt.s32.totalorder %s4057_s26, 3 }
   0x5   : > { %s6067_s27 = smov (%p32_p1, %s30_s27), 0  ;;  %p296_p3 = pnand %p3652_p0, %p295_p2 }
   0x7   : > { %299 = sbr.rel (%p296_p3) target bundleno = 948 (0x3b4), region = 40 }
   0xc   : > { %v3753_v0 = vld [vmem:[%s5833_s2 + $0x2] sm:$0x3]  ;;  %vm797_vm0 = vcmask 1041408   ;;  %s4125_s30 = smul.u32 42, %s4049_s24  ;;  %v3796_v2 = vld [vmem:[%s5833_s2 + $0x4] sm:$0x3] }
   0xd   : > { %v799_v1 = vsel %vm797_vm0, %v3753_v0, 0  ;;  %v557_v3 = vld [vmem:[%s5833_s2] sm:$0x3]  ;;  %v1184_v4 = vsel %vm797_vm0, %v3796_v2, 0  ;;  %v3840_v6 = vld [vmem:[%s5833_s2 + $0x8] sm:$0x3] }
   0xe   : > { %3976 = vmatpush.bf16.msra.mxu1 %v799_v1  ;;  %3977 = vmatpush.bf16.msra.mxu2 %v799_v1  ;;  %p350_p4 = scmp.lt.s32.totalorder %s4125_s30, 125  ;;  %v958_v5 = vsel %vm797_vm0, %v557_v3, 0  ;;  %v1669_v7 = vsel %vm797_vm0, %v3840_v6, 0  ;;  %vm560_vm1 = vsmask.f32 7424  ;;  %vm733_vm2 = vcmask 31744  }
   0xf   : > { %808 = vmatpush.bf16.msra.mxu0 %v799_v1  ;;  %3978 = vmatpush.bf16.msra.mxu3 %v799_v1  ;;  %s357_s19 = sadd.s32 1, %s4049_s24  ;;  %v3818_v0 = vld [vmem:[%s5833_s2 + $0x6] sm:$0x3]  ;;  %vm1076_vm3 = vcmask 1046528   ;;  %vm1510_vm4 = vsmask.f32 6400 }
  0x10   : > { %s351_s14 = scalar_select %p350_p4, %s4125_s30, 125  ;;  %vm2263_vm5 = vsmask.f32 5376  ;;  %vm1829_vm6 = vcmask 1045504   ;;  %vm2580_vm7 = vcmask 1044480   ;;  %vm2934_vm8 = vcmask 125952  }
  0x11   : > { %s358_s20 = smul.u32 42, %s357_s19  ;;  %p368_p6 = scmp.lt.s32.totalorder %s4125_s30, 83  ;;  %vm3279_vm9 = vcmask 130048   ;;  %vm2981_vm10 = vcmask 122880  }
  0x12   : > { %1193 = vmatpush.bf16.msrb.mxu2 %v1184_v4  ;;  %967 = vmatpush.bf16.msrb.mxu1 %v958_v5  ;;  %s3653_s15 = sshll.u32 %s351_s14, 2  ;;  %v1350_v4 = vsel %vm797_vm0, %v3818_v0, 0  ;;  %p382_p7 = scmp.lt.s32.totalorder %s4049_s24, 1 }
  0x13   : > { %1678 = vmatpush.bf16.msrb.mxu0 %v1669_v7  ;;  %s4145_s18 = scalar_lea.vmem %s5831_s0, %s3653_s15  ;;  %1359 = vmatpush.bf16.msrb.mxu3 %v1350_v4  ;;  %p359_p5 = scmp.lt.s32.totalorder %s358_s20, 125 }
  0x14   : > { %v4148_v8 = vld [vmem:[%s4145_s18 + $0x30] sm:$0xff]  ;;  %v4151_v9 = vld [vmem:[%s4145_s18 + $0x38] sm:$0xff]  ;;  %v4154_v10 = vld [vmem:[%s4145_s18 + $0x60] sm:$0xff]  ;;  %s6071_s30 = smov (!%p368_p6, %s4125_s30), 83  ;;  %s6073_s24 = smov (!%p382_p7, %s4049_s24), 1 }
  0x15   : > { %v4157_v11 = vld [vmem:[%s4145_s18 + $0x68] sm:$0xff]  ;;  %v4160_v12 = vld [vmem:[%s4145_s18] sm:$0xff]  ;;  %v4166_v14 = vshll.u32 %v4148_v8, 16  ;;  %v4169_v15 = vshrl.u32 %v4148_v8, 16  ;;  %v4172_v16 = vshll.u32 %v4151_v9, 16  ;;  %v4175_v17 = vshll.u32 %v4154_v10, 16  ;;  %s5779_s12 = scalar_lea.vmem %s5837_s6, %s6073_s24  ;;  %s5787_s15 = scalar_lea.vmem %s5838_s7, %s6073_s24 }
  0x16   : > { %v4163_v13 = vld [vmem:[%s4145_s18 + $0x8] sm:$0xff]  ;;  %v4178_v18 = vshrl.u32 %v4154_v10, 16  ;;  %v4181_v19 = vshll.u32 %v4157_v11, 16  ;;  %v562_v20 = vshrl.u32 %v4160_v12, 16  ;;  %v564_v21 = vshll.u32 %v4160_v12, 16  ;;  %v4204_v35 = vld [vmem:[%s4145_s18 + $0x40] sm:$0xff] }
  0x17   : > { %5900 = vst [vmem:[#allocation2_spill] sm:$0xff] %v4166_v14  ;;  %v5841_v22 = vrot.slane %v4166_v14, 1  ;;  %v619_v23 = vrot.slane %v4172_v16, 1  ;;  %v659_v24 = vrot.slane %v4175_v17, 1  ;;  %v5839_v25 = vshll.u32 %v4163_v13, 16  ;;  %v4208_v36 = vld [vmem:[%s4145_s18 + $0x70] sm:$0xff] }
  0x18   : > { %5901 = vst [vmem:[#allocation3_spill] sm:$0xff] %v4169_v15  ;;  %v667_v26 = vrot.slane %v4181_v19, 1  ;;  %v566_v27 = vrot.slane %v564_v21, 1  ;;  %v4211_v37 = vld [vmem:[%s4145_s18 + $0x90] sm:$0xff]  ;;  %v4214_v38 = vld [vmem:[%s4145_s18 + $0x98] sm:$0xff]  ;;  %v4220_v40 = vshrl.u32 %v4151_v9, 16 }
  0x19   : > { %5902 = vst [vmem:[#allocation4_spill] sm:$0xff] %v4172_v16  ;;  %v615_v28 = vor.u32 %v4169_v15, %v5841_v22  ;;  %v663_v29 = vor.u32 %v4178_v18, %v659_v24  ;;  %v571_v30 = vrot.slane %v5839_v25, 1  ;;  %v4217_v39 = vld [vmem:[%s4145_s18 + $0x10] sm:$0xff]  ;;  %v4223_v41 = vshll.u32 %v4204_v35, 16  ;;  %v4265_v62 = vld [vmem:[%s4145_s18 + $0x48] sm:$0xff]  ;;  %v4269_v63 = vld [vmem:[%s4145_s18 + $0x78] sm:$0xff] }
  0x1a   : > { %v567_v31 = vor.u32 %v566_v27, %v562_v20  ;;  %5903 = vst [vmem:[#allocation5_spill] sm:$0xff] %v4211_v37  ;;  %v4226_v42 = vshll.u32 %v4211_v37, 16  ;;  %v4229_v43 = vshrl.u32 %v4157_v11, 16  ;;  %v4232_v44 = vshll.u32 %v4208_v36, 16  ;;  %v4275_v1 = vld [vmem:[%s4145_s18 + $0xa0] sm:$0xff]  ;;  %v4281_v3 = vld [vmem:[%s4145_s18 + $0x18] sm:$0xff] }
  0x1b   : > { %v620_v32 = vsel %vm560_vm1, %v615_v28, %v619_v23  ;;  %v668_v33 = vsel %vm560_vm1, %v663_v29, %v667_v26  ;;  %5904 = vst [vmem:[#allocation6_spill] sm:$0xff] %v4214_v38  ;;  %v4235_v45 = vshrl.u32 %v4211_v37, 16  ;;  %v4238_v46 = vshll.u32 %v4214_v38, 16  ;;  %s6069_s20 = smov (!%p359_p5, %s358_s20), 125  ;;  %v4349_v0 = vld [vmem:[%s4145_s18 + $0x20] sm:$0xff]  ;;  %v4352_v4 = vld [vmem:[%s4145_s18 + $0x88] sm:$0xff] }
  0x1c   : > { %3760 = vmatmul.msk.bf16.vlgmr.msra.gmra.mxu1 %vm733_vm2, %v620_v32  ;;  %3766 = vmatmul.msk.bf16.vlgmr.msra.gmra.mxu2 %vm733_vm2, %v668_v33  ;;  %v572_v34 = vsel %vm560_vm1, %v567_v31, %v571_v30  ;;  %5905 = vst [vmem:[#allocation7_spill] sm:$0xff] %v4220_v40  ;;  %v5840_v47 = vshrl.u32 %v4163_v13, 16  ;;  %v4242_v48 = vshll.u32 %v4217_v39, 16  ;;  %v5842_v49 = vrot.slane %v4226_v42, 1  ;;  %s3654_s23 = sshll.u32 %s6069_s20, 2  ;;  %s3655_s17 = sshll.u32 %s6071_s30, 3 }
  0x1d   : > { %3754 = vmatmul.msk.bf16.vlgmr.msra.gmra.mxu0 %vm733_vm2, %v572_v34  ;;  %5906 = vst [vmem:[#allocation8_spill] sm:$0xff] %v4223_v41  ;;  %v715_v50 = vrot.slane %v4238_v46, 1  ;;  %v623_v52 = vor.u32 %v4220_v40, %v619_v23  ;;  %v627_v53 = vrot.slane %v4223_v41, 1  ;;  %v671_v54 = vor.u32 %v4229_v43, %v667_v26  ;;  %v4313_v34 = vld [vmem:[%s4145_s18 + $0x58] sm:$0xff]  ;;  %s4327_s8 = scalar_lea.vmem %s5832_s1, %s3654_s23  ;;  %s4943_s21 = scalar_lea.vmem %s5835_s4, %s3655_s17 }
  0x1e   : > { %5907 = vst [vmem:[#allocation9_spill] sm:$0xff] %v4226_v42  ;;  %v711_v51 = vor.u32 %v4235_v45, %v5842_v49  ;;  %v675_v55 = vrot.slane %v4232_v44, 1  ;;  %v575_v56 = vor.u32 %v5840_v47, %v571_v30  ;;  %v579_v57 = vrot.slane %v4242_v48, 1  ;;  %s3656_s28 = sshll.u32 %s6071_s30, 2 }
  0x1f   : > { %5908 = vst [vmem:[#allocation10_spill] sm:$0xff] %v4232_v44  ;;  %v628_v59 = vsel %vm560_vm1, %v623_v52, %v627_v53  ;;  %v4278_v2 = vshrl.u32 %v4214_v38, 16  ;;  %v4285_v5 = vshll.u32 %v4275_v1, 16  ;;  %v4288_v6 = vshrl.u32 %v4204_v35, 16  ;;  %s5186_s10 = scalar_lea.vmem %s5836_s5, %s3656_s28 }
  0x20   : > { %5909 = vst [vmem:[#allocation11_spill] sm:$0xff] %v4235_v45  ;;  %v716_v58 = vsel %vm560_vm1, %v711_v51, %v715_v50  ;;  %v676_v60 = vsel %vm560_vm1, %v671_v54, %v675_v55  ;;  %v580_v61 = vsel %vm560_vm1, %v575_v56, %v579_v57  ;;  %v4292_v20 = vshll.u32 %v4265_v62, 16  ;;  %v4332_v56 = vld [vmem:[%s4145_s18 + $0x50] sm:$0xff] }
  0x21   : > { %5910 = vst [vmem:[#allocation12_spill] sm:$0xff] %v4238_v46  ;;  %3772 = vmatmul.msk.bf16.vlgmr.msra.gmra.mxu3 %vm733_vm2, %v716_v58  ;;  %v719_v7 = vor.u32 %v4278_v2, %v715_v50  ;;  %v4295_v21 = vshrl.u32 %v4208_v36, 16  ;;  %v4298_v23 = vshll.u32 %v4269_v63, 16  ;;  %v723_v26 = vrot.slane %v4285_v5, 1 }
  0x22   : > { %5911 = vst [vmem:[#allocation13_spill] sm:$0xff] %v4275_v1  ;;  %v4302_v27 = vshrl.u32 %v4217_v39, 16  ;;  %v4305_v28 = vshll.u32 %v4281_v3, 16  ;;  %v631_v30 = vor.u32 %v4288_v6, %v627_v53  ;;  %v635_v31 = vrot.slane %v4292_v20, 1 }
  0x23   : > { %5912 = vst [vmem:[#allocation14_spill] sm:$0xff] %v4278_v2  ;;  %v724_v29 = vsel %vm560_vm1, %v719_v7, %v723_v26  ;;  %v679_v32 = vor.u32 %v4295_v21, %v675_v55  ;;  %v683_v33 = vrot.slane %v4298_v23, 1  ;;  %v4321_v54 = vshll.u32 %v4313_v34, 16 }
  0x24   : > { %5913 = vst [vmem:[#allocation15_spill] sm:$0xff] %v4285_v5  ;;  %v583_v50 = vor.u32 %v4302_v27, %v579_v57  ;;  %v587_v51 = vrot.slane %v4305_v28, 1  ;;  %v636_v52 = vsel %vm560_vm1, %v631_v30, %v635_v31  ;;  %v4336_v57 = vld [vmem:[%s4145_s18 + $0x80] sm:$0xff]  ;;  %v4359_v30 = vshrl.u32 %v4265_v62, 16 }
  0x25   : > { %5914 = vst [vmem:[#allocation16_spill] sm:$0xff] %v4288_v6  ;;  %v684_v53 = vsel %vm560_vm1, %v679_v32, %v683_v33  ;;  %v651_v58 = vrot.slane %v4321_v54, 1  ;;  %v4362_v32 = vshll.u32 %v4332_v56, 16  ;;  %v4379_v22 = vshrl.u32 %v4281_v3, 16 }
  0x26   : > { %5915 = vst [vmem:[#allocation17_spill] sm:$0xff] %v4292_v20  ;;  %v588_v55 = vsel %vm560_vm1, %v583_v50, %v587_v51  ;;  %v4382_v49 = vshll.u32 %v4349_v0, 16  ;;  %v639_v5 = vor.u32 %v4359_v30, %v635_v31  ;;  %v4400_v31 = vshrl.u32 %v4352_v4, 16 }
  0x27   : > { %5916 = vst [vmem:[#allocation18_spill] sm:$0xff] %v4295_v21 }
  0x28   : > { %5917 = vst [vmem:[#allocation19_spill] sm:$0xff] %v4298_v23  ;;  %v595_v2 = vrot.slane %v4382_v49, 1 }
  0x29   : > { %5918 = vst [vmem:[#allocation20_spill] sm:$0xff] %v4321_v54 }
  0x2a   : > { %5919 = vst [vmem:[#allocation21_spill] sm:$0xff] %v4336_v57 }
  0x2b   : > { %5923 = vst [vmem:[#allocation25_spill] sm:$0xff] %v4352_v4 }
  0x2c   : > { %3761 = vmatmul.msk.bf16.gmra.mxu1 %vm733_vm2, %v628_v59  ;;  %3767 = vmatmul.msk.bf16.gmra.mxu2 %vm733_vm2, %v676_v60  ;;  %v4340_v59 = vld [vmem:[%s4327_s8] sm:$0xff]  ;;  %v4343_v60 = vshrl.u32 %v4275_v1, 16  ;;  %5925 = vst [vmem:[#allocation27_spill] sm:$0xff] %v4359_v30 }
  0x2d   : > { %3755 = vmatmul.msk.bf16.gmra.mxu0 %vm733_vm2, %v580_v61  ;;  %5920 = vst [vmem:[#allocation22_spill] sm:$0xff] %v4340_v59  ;;  %v4346_v61 = vshrl.u32 %v4313_v34, 16  ;;  %v4355_v7 = vshll.u32 %v4340_v59, 16 }
  0x2e   : > { %5921 = vst [vmem:[#allocation23_spill] sm:$0xff] %v4343_v60  ;;  %v727_v50 = vor.u32 %v4343_v60, %v723_v26  ;;  %v4385_v26 = vshll.u32 %v4352_v4, 16  ;;  %v643_v60 = vrot.slane %v4362_v32, 1  ;;  %v5938_v4 = vshrl.u32 %v4163_v13, 16 }
  0x2f   : > { %5922 = vst [vmem:[#allocation24_spill] sm:$0xff] %v4346_v61  ;;  %v731_v25 = vrot.slane %v4355_v7, 1 }
  0x30   : > { %5924 = vst [vmem:[#allocation26_spill] sm:$0xff] %v4355_v7  ;;  %v699_v1 = vrot.slane %v4385_v26, 1  ;;  %v1511_v23 = vrot.slane %v5938_v4, 1  ;;  %v1082_v4 = vrot.slane %v4281_v3, 1 }
  0x31   : > { %3773 = vmatmul.msk.bf16.gmra.mxu3 %vm733_vm2, %v724_v29  ;;  %v655_v29 = vor.u32 %v4346_v61, %v651_v58  ;;  %5926 = vst [vmem:[#allocation28_spill] sm:$0xff] %v4362_v32  ;;  %v732_v59 = vsel %vm560_vm1, %v727_v50, %v731_v25  ;;  %v644_v25 = vsel %vm560_vm1, %v639_v5, %v643_v60  ;;  %v5935_v5 = vrot.slane %v4166_v14, 1 }
  0x32   : > { %5929 = vst [vmem:[#allocation31_spill] sm:$0xff] %v4382_v49  ;;  %v703_v45 = vor.u32 %v4400_v31, %v699_v1 }
  0x33   : > { %v660_v47 = vsel %vm560_vm1, %v655_v29, %v659_v24  ;;  %5930 = vst [vmem:[#allocation32_spill] sm:$0xff] %v4385_v26  ;;  %v591_v29 = vor.u32 %v4379_v22, %v587_v51  ;;  %v5934_v26 = vrot.slane %v4226_v42, 1  ;;  %v4423_v42 = vshrl.u32 %v4332_v56, 16 }
  0x34   : > { %5932 = vst [vmem:[#allocation34_spill] sm:$0xff] %v4400_v31  ;;  %v1078_v31 = vrot.slane %v4163_v13, 1 }
  0x35   : > { %v596_v51 = vsel %vm560_vm1, %v591_v29, %v595_v2  ;;  %v1080_v29 = vrot.slane %v4217_v39, 1  ;;  %5936 = vst [vmem:[#allocation36_spill] sm:$0xff] %v4423_v42 }
  0x3c   : > { %3762 = vmatmul.msk.bf16.gmra.mxu1 %vm733_vm2, %v636_v52  ;;  %3768 = vmatmul.msk.bf16.gmra.mxu2 %vm733_vm2, %v684_v53  ;;  %v4366_v52 = vshrl.u32 %v4269_v63, 16  ;;  %v4369_v53 = vshll.u32 %v4336_v57, 16 }
  0x3d   : > { %3756 = vmatmul.msk.bf16.gmra.mxu0 %vm733_vm2, %v588_v55  ;;  %v4372_v55 = vld [vmem:[%s4145_s18 + $0x28] sm:$0xff] }
  0x3e   : > { %5927 = vst [vmem:[#allocation29_spill] sm:$0xff] %v4366_v52  ;;  %v687_v7 = vor.u32 %v4366_v52, %v683_v33  ;;  %v691_v46 = vrot.slane %v4369_v53, 1  ;;  %v4393_v24 = vshll.u32 %v4372_v55, 16  ;;  %v4407_v38 = vshrl.u32 %v4372_v55, 16 }
  0x3f   : > { %5928 = vst [vmem:[#allocation30_spill] sm:$0xff] %v4369_v53  ;;  %v5939_v52 = vshll.u32 %v4163_v13, 16 }
  0x40   : > { %5931 = vst [vmem:[#allocation33_spill] sm:$0xff] %v4393_v24  ;;  %v692_v33 = vsel %vm560_vm1, %v687_v7, %v691_v46  ;;  %v603_v50 = vrot.slane %v4393_v24, 1 }
  0x41   : > { %3774 = vmatmul.msk.bf16.gmra.mxu3 %vm733_vm2, %v732_v59  ;;  %5933 = vst [vmem:[#allocation35_spill] sm:$0xff] %v4407_v38  ;;  %v708_v59 = vsel %vm560_vm1, %v703_v45, %v5934_v26  ;;  %v4426_v45 = vshrl.u32 %v4336_v57, 16  ;;  %v4429_v26 = vshrl.u32 %v4349_v0, 16  ;;  %v1512_v57 = vrot.slane %v5939_v52, 2 }
  0x42   : > { %v607_v37 = vor.u32 %v4407_v38, %v603_v50  ;;  %v1083_v52 = vsel %vm1076_vm3, %v1080_v29, %v1082_v4 }
  0x43   : > { %5937 = vst [vmem:[#allocation37_spill] sm:$0xff] %v4429_v26  ;;  %v1513_v21 = vor.u32 %v1512_v57, %v1511_v23  ;;  %v3862_v23 = vld [vmem:[%s5833_s2 + $0xa] sm:$0x3] }
  0x44   : > { %v612_v7 = vsel %vm560_vm1, %v607_v37, %v5935_v5  ;;  %v695_v37 = vor.u32 %v4426_v45, %v691_v46  ;;  %v3884_v46 = vld [vmem:[%s5833_s2 + $0xc] sm:$0x3] }
  0x46   : > { %v700_v53 = vsel %vm560_vm1, %v695_v37, %v699_v1  ;;  %v2103_v1 = vsel %vm797_vm0, %v3884_v46, 0  ;;  %v1086_v46 = vrot.slane %v4372_v55, 1 }
  0x47   : > { %2112 = vmatpush.bf16.msra.mxu2 %v2103_v1 }
  0x4c   : > { %3763 = vmatmul.msk.bf16.gmra.mxu1 %vm733_vm2, %v644_v25  ;;  %3769 = vmatmul.msk.bf16.gmra.mxu2 %vm733_vm2, %v692_v33  ;;  %v1081_v25 = vsel %vm1076_vm3, %v1078_v31, %v1080_v29  ;;  %v647_v33 = vor.u32 %v4423_v42, %v643_v60  ;;  %v3928_v60 = vld [vmem:[%s5833_s2 + $0x10] sm:$0x3]  ;;  %v1519_v29 = vrot.slane %v4305_v28, 2 }
  0x4d   : > { %3757 = vmatmul.msk.bf16.gmra.mxu0 %vm733_vm2, %v596_v51  ;;  %v599_v51 = vor.u32 %v4429_v26, %v595_v2  ;;  %v3906_v2 = vld [vmem:[%s5833_s2 + $0xe] sm:$0x3] }
  0x4e   : > { %v652_v5 = vsel %vm560_vm1, %v647_v33, %v651_v58  ;;  %v2420_v57 = vsel %vm797_vm0, %v3906_v2, 0  ;;  %v1937_v58 = vsel %vm797_vm0, %v3862_v23, 0  ;;  %v1515_v33 = vrot.slane %v4242_v48, 2 }
  0x4f   : > { %v604_v44 = vsel %vm560_vm1, %v599_v51, %v603_v50  ;;  %2429 = vmatpush.bf16.msra.mxu3 %v2420_v57  ;;  %1946 = vmatpush.bf16.msra.mxu1 %v1937_v58  ;;  %v1514_v50 = vrot.slane %v4302_v27, 1  ;;  %v1077_v51 = vrot.slane %v4160_v12, 1  ;;  %v1088_v23 = vrot.slane %v4148_v8, 1 }
  0x51   : > { %3819 = vmatmul.msk.bf16.vlgmr.msrb.gmra.mxu3 %vm733_vm2, %v1081_v25  ;;  %v1089_v57 = vsel %vm1076_vm3, %v1086_v46, %v1088_v23 }
  0x5c   : > { %3764 = vmatmul.msk.bf16.gmra.mxu1 %vm733_vm2, %v652_v5  ;;  %3770 = vmatmul.msk.bf16.gmra.mxu2 %vm733_vm2, %v700_v53  ;;  %v1084_v53 = vrot.slane %v4349_v0, 1  ;;  %v1516_v5 = vor.u32 %v1515_v33, %v1514_v50  ;;  %v1526_v50 = vrot.slane %v4407_v38, 1  ;;  %v1527_v33 = vrot.slane %v4393_v24, 2 }
  0x5d   : > { %3758 = vmatmul.msk.bf16.gmra.mxu0 %vm733_vm2, %v604_v44  ;;  %v2688_v44 = vsel %vm797_vm0, %v3928_v60, 0  ;;  %v1100_v38 = vrot.slane %v4154_v10, 1 }
  0x5e   : > { %2697 = vmatpush.bf16.msra.mxu0 %v2688_v44  ;;  %v1085_v37 = vsel %vm1076_vm3, %v1082_v4, %v1084_v53  ;;  %v1087_v1 = vsel %vm1076_vm3, %v1084_v53, %v1086_v46 }
  0x61   : > { %3820 = vmatmul.msk.bf16.gmra.mxu3 %vm733_vm2, %v1083_v52 }
  0x6c   : > { %3765 = vmatmul.msk.bf16.gmra.mxu1 %vm733_vm2, %v660_v47  ;;  %3771 = vmatmul.msk.bf16.gmra.mxu2 %vm733_vm2, %v708_v59  ;;  %v1079_v47 = vsel %vm1076_vm3, %v1077_v51, %v1078_v31  ;;  %v1517_v59 = vsel %vm1510_vm4, %v1513_v21, %v1516_v5  ;;  %v1523_v31 = vrot.slane %v4382_v49, 2  ;;  %v1090_v51 = vrot.slane %v4151_v9, 1 }
  0x6d   : > { %3759 = vmatmul.msk.bf16.gmra.mxu0 %vm733_vm2, %v612_v7  ;;  %v1518_v7 = vrot.slane %v4379_v22, 1 }
  0x6f   : > { %v1520_v2 = vor.u32 %v1519_v29, %v1518_v7 }
  0x71   : > { %3821 = vmatmul.msk.bf16.gmra.mxu3 %vm733_vm2, %v1085_v37  ;;  %v1521_v21 = vsel %vm1510_vm4, %v1516_v5, %v1520_v2  ;;  %v4514_v5 = vsel %vm1076_vm3, %v1088_v23, %v1090_v51 }
  0x7c   : > { %3775 = vmatmul.msk.bf16.vlgmr.msrb.gmra.mxu1 %vm733_vm2, %v4160_v12  ;;  %3797 = vmatmul.msk.bf16.vlgmr.msrb.gmra.mxu2 %vm733_vm2, %v1079_v47  ;;  %v1522_v12 = vrot.slane %v4429_v26, 1  ;;  %v1550_v26 = vrot.slane %v4346_v61, 1 }
  0x7d   : > { %3841 = vmatmul.msk.bf16.vlgmr.msrb.gmra.mxu0 %vm733_vm2, %v1517_v59 }
  0x7e   : > { %v1524_v58 = vor.u32 %v1523_v31, %v1522_v12  ;;  %v1530_v12 = vrot.slane %v4169_v15, 1  ;;  %v1531_v31 = vrot.slane %v4166_v14, 2 }
  0x81   : > { %3822 = vmatmul.msk.bf16.gmra.mxu3 %vm733_vm2, %v1087_v1 }
  0x8c   : > { %3776 = vmatmul.msk.bf16.gmra.mxu1 %vm733_vm2, %v4163_v13  ;;  %3798 = vmatmul.msk.bf16.gmra.mxu2 %vm733_vm2, %v1081_v25  ;;  %v1525_v13 = vsel %vm1510_vm4, %v1520_v2, %v1524_v58 }
  0x8d   : > { %3842 = vmatmul.msk.bf16.gmra.mxu0 %vm733_vm2, %v1521_v21 }
  0x91   : > { %3823 = vmatmul.msk.bf16.gmra.mxu3 %vm733_vm2, %v1089_v57 }
  0x99   : > { %v4495_v60 = vpop.f32.mrf.mxu1 }
  0x9a   : > { %v4497_v44 = vpop.f32.mrf.mxu0 }
  0x9c   : > { %3777 = vmatmul.msk.bf16.gmra.mxu1 %vm733_vm2, %v4217_v39  ;;  %3799 = vmatmul.msk.bf16.gmra.mxu2 %vm733_vm2, %v1083_v52  ;;  %v1528_v39 = vor.u32 %v1527_v33, %v1526_v50 }
  0x9d   : > { %3843 = vmatmul.msk.bf16.gmra.mxu0 %vm733_vm2, %v1525_v13 }
  0x9e   : > { %v1529_v7 = vsel %vm1510_vm4, %v1524_v58, %v1528_v39  ;;  %v1092_v58 = vrot.slane %v4204_v35, 1 }
  0x9f   : > { %v4504_v25 = vpop.f32.mrf.mxu2 }
  0xa0   : > { %5940 = vst [vmem:[#allocation38_spill] sm:$0xff] %v4504_v25 }
  0xa1   : > { %v4506_v4 = vpop.f32.mrf.mxu1  ;;  %3824 = vmatmul.msk.bf16.gmra.mxu3 %vm733_vm2, %v4514_v5 }
  0xa2   : > { %v4508_v53 = vpop.f32.mrf.mxu0 }
  0xa4   : > { %v4525_v29 = vpop.f32.mrf.mxu3 }
  0xa5   : > { %5942 = vst [vmem:[#allocation40_spill] sm:$0xff] %v4525_v29 }
  0xa7   : > { %v4516_v47 = vpop.f32.mrf.mxu2 }
  0xa8   : > { %5941 = vst [vmem:[#allocation39_spill] sm:$0xff] %v4516_v47 }
  0xa9   : > { %v4520_v52 = vpop.f32.mrf.mxu1 }
  0xaa   : > { %v4522_v59 = vpop.f32.mrf.mxu0 }
  0xac   : > { %3778 = vmatmul.msk.bf16.gmra.mxu1 %vm733_vm2, %v4281_v3  ;;  %3800 = vmatmul.msk.bf16.gmra.mxu2 %vm733_vm2, %v1085_v37  ;;  %v4539_v23 = vpop.f32.mrf.mxu3  ;;  %v4543_v3 = vsel %vm1076_vm3, %v1090_v51, %v1092_v58  ;;  %v1532_v37 = vor.u32 %v1531_v31, %v1530_v12 }
  0xad   : > { %3844 = vmatmul.msk.bf16.gmra.mxu0 %vm733_vm2, %v1529_v7  ;;  %5944 = vst [vmem:[#allocation42_spill] sm:$0xff] %v4539_v23  ;;  %v1534_v23 = vrot.slane %v4220_v40, 1 }
  0xae   : > { %v1533_v7 = vsel %vm1510_vm4, %v1528_v39, %v1532_v37 }
  0xaf   : > { %v4531_v46 = vpop.f32.mrf.mxu2 }
  0xb0   : > { %5943 = vst [vmem:[#allocation41_spill] sm:$0xff] %v4531_v46  ;;  %v1098_v46 = vrot.slane %v4313_v34, 1 }
  0xb1   : > { %v4533_v2 = vpop.f32.mrf.mxu1  ;;  %3825 = vmatmul.msk.bf16.gmra.mxu3 %vm733_vm2, %v4543_v3 }
  0xb2   : > { %v4535_v21 = vpop.f32.mrf.mxu0 }
  0xb4   : > { %v4554_v29 = vpop.f32.mrf.mxu3 }
  0xb5   : > { %5946 = vst [vmem:[#allocation44_spill] sm:$0xff] %v4554_v29  ;;  %v1094_v29 = vrot.slane %v4265_v62, 1 }
  0xb7   : > { %v4545_v13 = vpop.f32.mrf.mxu2 }
  0xb8   : > { %5945 = vst [vmem:[#allocation43_spill] sm:$0xff] %v4545_v13  ;;  %v1535_v13 = vrot.slane %v4172_v16, 2 }
  0xb9   : > { %v4549_v50 = vpop.f32.mrf.mxu1 }
  0xba   : > { %v4551_v33 = vpop.f32.mrf.mxu0 }
  0xbc   : > { %3779 = vmatmul.msk.bf16.gmra.mxu1 %vm733_vm2, %v4349_v0  ;;  %3801 = vmatmul.msk.bf16.gmra.mxu2 %vm733_vm2, %v1087_v1  ;;  %v4568_v39 = vpop.f32.mrf.mxu3  ;;  %v4572_v0 = vsel %vm1076_vm3, %v1092_v58, %v1094_v29  ;;  %v1536_v1 = vor.u32 %v1535_v13, %v1534_v23 }
  0xbd   : > { %3845 = vmatmul.msk.bf16.gmra.mxu0 %vm733_vm2, %v1533_v7  ;;  %5948 = vst [vmem:[#allocation46_spill] sm:$0xff] %v4568_v39  ;;  %v1538_v39 = vrot.slane %v4288_v6, 1 }
  0xbe   : > { %v1537_v40 = vsel %vm1510_vm4, %v1532_v37, %v1536_v1 }
  0xbf   : > { %v4560_v51 = vpop.f32.mrf.mxu2 }
  0xc0   : > { %5947 = vst [vmem:[#allocation45_spill] sm:$0xff] %v4560_v51 }
  0xc1   : > { %v4562_v12 = vpop.f32.mrf.mxu1  ;;  %3826 = vmatmul.msk.bf16.gmra.mxu3 %vm733_vm2, %v4572_v0 }
  0xc2   : > { %v4564_v31 = vpop.f32.mrf.mxu0 }
  0xc4   : > { %v4583_v16 = vpop.f32.mrf.mxu3 }
  0xc5   : > { %5950 = vst [vmem:[#allocation48_spill] sm:$0xff] %v4583_v16  ;;  %v1096_v16 = vrot.slane %v4332_v56, 1 }
  0xc7   : > { %v4574_v14 = vpop.f32.mrf.mxu2 }
  0xc8   : > { %5949 = vst [vmem:[#allocation47_spill] sm:$0xff] %v4574_v14  ;;  %v1539_v14 = vrot.slane %v4223_v41, 2 }
  0xc9   : > { %v4578_v7 = vpop.f32.mrf.mxu1 }
  0xca   : > { %v4580_v51 = vpop.f32.mrf.mxu0 }
  0xcc   : > { %3780 = vmatmul.msk.bf16.gmra.mxu1 %vm733_vm2, %v4372_v55  ;;  %3802 = vmatmul.msk.bf16.gmra.mxu2 %vm733_vm2, %v1089_v57  ;;  %v4597_v37 = vpop.f32.mrf.mxu3  ;;  %v4601_v55 = vsel %vm1076_vm3, %v1094_v29, %v1096_v16  ;;  %v1540_v57 = vor.u32 %v1539_v14, %v1538_v39 }
  0xcd   : > { %3846 = vmatmul.msk.bf16.gmra.mxu0 %vm733_vm2, %v1537_v40  ;;  %5952 = vst [vmem:[#allocation50_spill] sm:$0xff] %v4597_v37  ;;  %v1542_v37 = vrot.slane %v4359_v30, 1 }
  0xce   : > { %v1541_v6 = vsel %vm1510_vm4, %v1536_v1, %v1540_v57 }
  0xcf   : > { %v4589_v23 = vpop.f32.mrf.mxu2 }
  0xd0   : > { %5951 = vst [vmem:[#allocation49_spill] sm:$0xff] %v4589_v23 }
  0xd1   : > { %v4591_v58 = vpop.f32.mrf.mxu1  ;;  %3827 = vmatmul.msk.bf16.gmra.mxu3 %vm733_vm2, %v4601_v55 }
  0xd2   : > { %v4593_v13 = vpop.f32.mrf.mxu0 }
  0xd4   : > { %v1361_v41 = vpop.f32.mrf.mxu3 }
  0xd7   : > { %v4603_v15 = vpop.f32.mrf.mxu2 }
  0xd8   : > { %5953 = vst [vmem:[#allocation51_spill] sm:$0xff] %v4603_v15  ;;  %v1543_v15 = vrot.slane %v4292_v20, 2  ;;  %v1547_v20 = vrot.slane %v4362_v32, 2 }
  0xd9   : > { %v4607_v40 = vpop.f32.mrf.mxu1 }
  0xda   : > { %v4609_v23 = vpop.f32.mrf.mxu0  ;;  %v1544_v47 = vor.u32 %v1543_v15, %v1542_v37 }
  0xdc   : > { %3781 = vmatmul.msk.bf16.gmra.mxu1 %vm733_vm2, %v4148_v8  ;;  %3803 = vmatmul.msk.bf16.gmra.mxu2 %vm733_vm2, %v4514_v5  ;;  %v1363_v1 = vpop.f32.mrf.mxu3  ;;  %v4627_v8 = vsel %vm1076_vm3, %v1096_v16, %v1098_v46  ;;  %v1545_v30 = vsel %vm1510_vm4, %v1540_v57, %v1544_v47 }
  0xdd   : > { %3847 = vmatmul.msk.bf16.gmra.mxu0 %vm733_vm2, %v1541_v6 }
  0xdf   : > { %v4617_v14 = vpop.f32.mrf.mxu2 }
  0xe0   : > { %5954 = vst [vmem:[#allocation52_spill] sm:$0xff] %v4617_v14 }
  0xe1   : > { %v4619_v29 = vpop.f32.mrf.mxu1  ;;  %3828 = vmatmul.msk.bf16.gmra.mxu3 %vm733_vm2, %v4627_v8 }
  0xe2   : > { %5955 = vst [vmem:[#allocation53_spill] sm:$0xff] %v4619_v29  ;;  %v4621_v39 = vpop.f32.mrf.mxu0  ;;  %v1102_v29 = vrot.slane %v4157_v11, 1 }
  0xe4   : > { %v1366_v24 = vpop.f32.mrf.mxu3 }
  0xe7   : > { %v4629_v5 = vpop.f32.mrf.mxu2 }
  0xe8   : > { %5956 = vst [vmem:[#allocation54_spill] sm:$0xff] %v4629_v5  ;;  %v1546_v5 = vrot.slane %v4423_v42, 1 }
  0xe9   : > { %v4633_v6 = vpop.f32.mrf.mxu1 }
  0xea   : > { %5957 = vst [vmem:[#allocation55_spill] sm:$0xff] %v4633_v6  ;;  %v4635_v14 = vpop.f32.mrf.mxu0  ;;  %v1548_v25 = vor.u32 %v1547_v20, %v1546_v5 }
  0xec   : > { %3782 = vmatmul.msk.bf16.gmra.mxu1 %vm733_vm2, %v4151_v9  ;;  %3804 = vmatmul.msk.bf16.gmra.mxu2 %vm733_vm2, %v4543_v3  ;;  %v1368_v57 = vpop.f32.mrf.mxu3  ;;  %v4653_v9 = vsel %vm1076_vm3, %v1098_v46, %v1100_v38 }
  0xed   : > { %3848 = vmatmul.msk.bf16.gmra.mxu0 %vm733_vm2, %v1545_v30 }
  0xef   : > { %v4643_v15 = vpop.f32.mrf.mxu2 }
  0xf0   : > { %5958 = vst [vmem:[#allocation56_spill] sm:$0xff] %v4643_v15 }
  0xf1   : > { %v4645_v16 = vpop.f32.mrf.mxu1  ;;  %3829 = vmatmul.msk.bf16.gmra.mxu3 %vm733_vm2, %v4653_v9 }
  0xf2   : > { %5959 = vst [vmem:[#allocation57_spill] sm:$0xff] %v4645_v16  ;;  %v4647_v37 = vpop.f32.mrf.mxu0  ;;  %v1549_v16 = vsel %vm1510_vm4, %v1544_v47, %v1548_v25  ;;  %v1551_v47 = vrot.slane %v4321_v54, 2 }
  0xf4   : > { %v1371_v49 = vpop.f32.mrf.mxu3 }
  0xf7   : > { %v4655_v3 = vpop.f32.mrf.mxu2 }
  0xf8   : > { %5960 = vst [vmem:[#allocation58_spill] sm:$0xff] %v4655_v3 }
  0xf9   : > { %v969_v30 = vpop.f32.mrf.mxu1 }
  0xfa   : > { %v1680_v15 = vpop.f32.mrf.mxu0  ;;  %v970_v20 = vadd.f32 %v969_v30, %v4497_v44  ;;  %v1552_v44 = vor.u32 %v1551_v47, %v1550_v26  ;;  %v1555_v47 = vrot.slane %v4175_v17, 2 }
  0xfc   : > { %3783 = vmatmul.msk.bf16.gmra.mxu1 %vm733_vm2, %v4204_v35  ;;  %3805 = vmatmul.msk.bf16.gmra.mxu2 %vm733_vm2, %v4572_v0  ;;  %v1373_v6 = vpop.f32.mrf.mxu3  ;;  %v4670_v35 = vsel %vm1076_vm3, %v1100_v38, %v1102_v29  ;;  %v1553_v54 = vsel %vm1510_vm4, %v1548_v25, %v1552_v44  ;;  %v1554_v25 = vrot.slane %v4178_v18, 1 }
  0xfd   : > { %3849 = vmatmul.msk.bf16.gmra.mxu0 %vm733_vm2, %v1549_v16 }
  0xff   : > { %v1195_v46 = vpop.f32.mrf.mxu2 }
 0x100   : > { %v1300_v5 = vadd.f32 %v1195_v46, %v970_v20 }
 0x101   : > { %v971_v3 = vpop.f32.mrf.mxu1  ;;  %3830 = vmatmul.msk.bf16.gmra.mxu3 %vm733_vm2, %v4670_v35 }
 0x102   : > { %v1466_v32 = vadd.f32 %v1361_v41, %v1300_v5  ;;  %v1682_v42 = vpop.f32.mrf.mxu0  ;;  %v972_v16 = vadd.f32 %v971_v3, %v4508_v53 }
 0x104   : > { %v4672_v0 = vadd.f32 %v1680_v15, %v1466_v32  ;;  %v1376_v61 = vpop.f32.mrf.mxu3 }
 0x107   : > { %v1197_v30 = vpop.f32.mrf.mxu2 }
 0x108   : > { %v1301_v41 = vadd.f32 %v1197_v30, %v972_v16 }
 0x109   : > { %v974_v20 = vpop.f32.mrf.mxu1 }
 0x10a   : > { %v1467_v46 = vadd.f32 %v1363_v1, %v1301_v41  ;;  %v1685_v5 = vpop.f32.mrf.mxu0  ;;  %v975_v32 = vadd.f32 %v974_v20, %v4522_v59  ;;  %v1556_v59 = vor.u32 %v1555_v47, %v1554_v25  ;;  %v1559_v25 = vrot.slane %v4181_v19, 2 }
 0x10c   : > { %3784 = vmatmul.msk.bf16.gmra.mxu1 %vm733_vm2, %v4265_v62  ;;  %3806 = vmatmul.msk.bf16.gmra.mxu2 %vm733_vm2, %v4601_v55  ;;  %v4682_v38 = vadd.f32 %v1682_v42, %v1467_v46  ;;  %v1378_v16 = vpop.f32.mrf.mxu3  ;;  %v1104_v62 = vrot.slane %v4208_v36, 1 }
 0x10d   : > { %3850 = vmatmul.msk.bf16.gmra.mxu0 %vm733_vm2, %v1553_v54 }
 0x10e   : > { %v4690_v55 = vsel %vm1076_vm3, %v1102_v29, %v1104_v62 }
 0x10f   : > { %v1200_v26 = vpop.f32.mrf.mxu2 }
 0x110   : > { %v1302_v53 = vadd.f32 %v1200_v26, %v975_v32  ;;  %v1557_v32 = vsel %vm1510_vm4, %v1552_v44, %v1556_v59  ;;  %v1558_v44 = vrot.slane %v4229_v43, 1 }
 0x111   : > { %v976_v15 = vpop.f32.mrf.mxu1  ;;  %3831 = vmatmul.msk.bf16.gmra.mxu3 %vm733_vm2, %v4690_v55 }
 0x112   : > { %v1468_v1 = vadd.f32 %v1366_v24, %v1302_v53  ;;  %v1687_v3 = vpop.f32.mrf.mxu0  ;;  %v977_v54 = vadd.f32 %v976_v15, %v4535_v21 }
 0x114   : > { %v4692_v42 = vadd.f32 %v1685_v5, %v1468_v1  ;;  %v1381_v26 = vpop.f32.mrf.mxu3 }
 0x117   : > { %v1202_v30 = vpop.f32.mrf.mxu2 }
 0x118   : > { %v1303_v24 = vadd.f32 %v1202_v30, %v977_v54 }
 0x119   : > { %v979_v41 = vpop.f32.mrf.mxu1 }
 0x11a   : > { %v1469_v20 = vadd.f32 %v1368_v57, %v1303_v24  ;;  %v1690_v46 = vpop.f32.mrf.mxu0  ;;  %v980_v21 = vadd.f32 %v979_v41, %v4551_v33  ;;  %v1560_v33 = vor.u32 %v1559_v25, %v1558_v44  ;;  %v5962_v44 = vld [vmem:[#allocation10_spill] sm:$0xff] }
 0x11b   : > { %v1563_v25 = vrot.slane %v5962_v44, 2 }
 0x11c   : > { %3785 = vmatmul.msk.bf16.gmra.mxu1 %vm733_vm2, %v4332_v56  ;;  %3807 = vmatmul.msk.bf16.gmra.mxu2 %vm733_vm2, %v4627_v8  ;;  %v4702_v29 = vadd.f32 %v1687_v3, %v1469_v20  ;;  %v1383_v47 = vpop.f32.mrf.mxu3  ;;  %v1106_v56 = vrot.slane %v4269_v63, 1 }
 0x11d   : > { %3851 = vmatmul.msk.bf16.gmra.mxu0 %vm733_vm2, %v1557_v32  ;;  %v1561_v32 = vsel %vm1510_vm4, %v1556_v59, %v1560_v33 }
 0x11e   : > { %v4710_v8 = vsel %vm1076_vm3, %v1104_v62, %v1106_v56 }
 0x11f   : > { %v1205_v5 = vpop.f32.mrf.mxu2 }
 0x120   : > { %v1304_v53 = vadd.f32 %v1205_v5, %v980_v21 }
 0x121   : > { %v981_v15 = vpop.f32.mrf.mxu1  ;;  %3832 = vmatmul.msk.bf16.gmra.mxu3 %vm733_vm2, %v4710_v8 }
 0x122   : > { %v1470_v57 = vadd.f32 %v1371_v49, %v1304_v53  ;;  %v1692_v1 = vpop.f32.mrf.mxu0  ;;  %v982_v54 = vadd.f32 %v981_v15, %v4564_v31 }
 0x124   : > { %v4712_v3 = vadd.f32 %v1690_v46, %v1470_v57  ;;  %v1386_v21 = vpop.f32.mrf.mxu3  ;;  %v5961_v57 = vld [vmem:[#allocation18_spill] sm:$0xff] }
 0x125   : > { %v1562_v59 = vrot.slane %v5961_v57, 1 }
 0x127   : > { %v1207_v30 = vpop.f32.mrf.mxu2 }
 0x128   : > { %v1305_v49 = vadd.f32 %v1207_v30, %v982_v54 }
 0x129   : > { %v984_v24 = vpop.f32.mrf.mxu1 }
 0x12a   : > { %v1471_v41 = vadd.f32 %v1373_v6, %v1305_v49  ;;  %v1695_v20 = vpop.f32.mrf.mxu0  ;;  %v985_v31 = vadd.f32 %v984_v24, %v4580_v51  ;;  %v1564_v51 = vor.u32 %v1563_v25, %v1562_v59  ;;  %v5966_v25 = vld [vmem:[#allocation29_spill] sm:$0xff] }
 0x12c   : > { %3786 = vmatmul.msk.bf16.gmra.mxu1 %vm733_vm2, %v4313_v34  ;;  %3808 = vmatmul.msk.bf16.gmra.mxu2 %vm733_vm2, %v4653_v9  ;;  %v4722_v62 = vadd.f32 %v1692_v1, %v1471_v41  ;;  %v1388_v54 = vpop.f32.mrf.mxu3  ;;  %v5963_v34 = vld [vmem:[#allocation21_spill] sm:$0xff] }
 0x12d   : > { %3852 = vmatmul.msk.bf16.gmra.mxu0 %vm733_vm2, %v1561_v32  ;;  %v1108_v30 = vrot.slane %v5963_v34, 1 }
 0x12f   : > { %v1210_v46 = vpop.f32.mrf.mxu2  ;;  %v4730_v9 = vsel %vm1076_vm3, %v1106_v56, %v1108_v30 }
 0x130   : > { %v1306_v5 = vadd.f32 %v1210_v46, %v985_v31  ;;  %v1565_v46 = vsel %vm1510_vm4, %v1560_v33, %v1564_v51  ;;  %v1566_v33 = vrot.slane %v5966_v25, 1 }
 0x131   : > { %v986_v53 = vpop.f32.mrf.mxu1  ;;  %3833 = vmatmul.msk.bf16.gmra.mxu3 %vm733_vm2, %v4730_v9 }
 0x132   : > { %v1472_v6 = vadd.f32 %v1376_v61, %v1306_v5  ;;  %v1697_v15 = vpop.f32.mrf.mxu0  ;;  %v987_v49 = vadd.f32 %v986_v53, %v4593_v13 }
 0x134   : > { %v4732_v1 = vadd.f32 %v1695_v20, %v1472_v6  ;;  %v1391_v5 = vpop.f32.mrf.mxu3 }
 0x136   : > { %5964 = vst [vmem:[#allocation18_spill] sm:$0xff] %v4732_v1 }
 0x137   : > { %v1212_v24 = vpop.f32.mrf.mxu2 }
 0x138   : > { %v1307_v61 = vadd.f32 %v1212_v24, %v987_v49  ;;  %v5967_v49 = vld [vmem:[#allocation19_spill] sm:$0xff] }
 0x139   : > { %v989_v41 = vpop.f32.mrf.mxu1  ;;  %v1567_v24 = vrot.slane %v5967_v49, 2 }
 0x13a   : > { %v1473_v32 = vadd.f32 %v1378_v16, %v1307_v61  ;;  %v1700_v31 = vpop.f32.mrf.mxu0  ;;  %v990_v13 = vadd.f32 %v989_v41, %v4609_v23 }
 0x13b   : > { %v1568_v23 = vor.u32 %v1567_v24, %v1566_v33  ;;  %v5970_v24 = vld [vmem:[#allocation30_spill] sm:$0xff] }
 0x13c   : > { %3787 = vmatmul.msk.bf16.gmra.mxu1 %vm733_vm2, %v4154_v10  ;;  %3809 = vmatmul.msk.bf16.gmra.mxu2 %vm733_vm2, %v4670_v35  ;;  %v4742_v56 = vadd.f32 %v1697_v15, %v1473_v32  ;;  %v1393_v61 = vpop.f32.mrf.mxu3  ;;  %v5968_v10 = vld [vmem:[#allocation25_spill] sm:$0xff] }
 0x13d   : > { %3853 = vmatmul.msk.bf16.gmra.mxu0 %vm733_vm2, %v1565_v46  ;;  %v1110_v1 = vrot.slane %v5968_v10, 1 }
 0x13e   : > { %5965 = vst [vmem:[#allocation10_spill] sm:$0xff] %v4742_v56 }
 0x13f   : > { %v1215_v20 = vpop.f32.mrf.mxu2  ;;  %v4750_v35 = vsel %vm1076_vm3, %v1108_v30, %v1110_v1 }
 0x140   : > { %v1308_v53 = vadd.f32 %v1215_v20, %v990_v13 }
 0x141   : > { %v991_v6 = vpop.f32.mrf.mxu1  ;;  %3834 = vmatmul.msk.bf16.gmra.mxu3 %vm733_vm2, %v4750_v35 }
 0x142   : > { %v1474_v16 = vadd.f32 %v1381_v26, %v1308_v53  ;;  %v1702_v59 = vpop.f32.mrf.mxu0  ;;  %v992_v32 = vadd.f32 %v991_v6, %v4621_v39  ;;  %v1569_v53 = vsel %vm1510_vm4, %v1564_v51, %v1568_v23  ;;  %v1570_v51 = vrot.slane %v4426_v45, 1 }
 0x144   : > { %v4752_v15 = vadd.f32 %v1700_v31, %v1474_v16  ;;  %v1396_v56 = vpop.f32.mrf.mxu3 }
 0x147   : > { %v1217_v41 = vpop.f32.mrf.mxu2 }
 0x148   : > { %v1309_v26 = vadd.f32 %v1217_v41, %v992_v32  ;;  %v1571_v32 = vrot.slane %v5970_v24, 2 }
 0x149   : > { %v994_v46 = vpop.f32.mrf.mxu1 }
 0x14a   : > { %v1475_v13 = vadd.f32 %v1383_v47, %v1309_v26  ;;  %v1705_v20 = vpop.f32.mrf.mxu0  ;;  %v995_v39 = vadd.f32 %v994_v46, %v4635_v14  ;;  %v1572_v14 = vor.u32 %v1571_v32, %v1570_v51  ;;  %v5973_v32 = vld [vmem:[#allocation34_spill] sm:$0xff] }
 0x14c   : > { %3788 = vmatmul.msk.bf16.gmra.mxu1 %vm733_vm2, %v4157_v11  ;;  %3810 = vmatmul.msk.bf16.gmra.mxu2 %vm733_vm2, %v4690_v55  ;;  %v4762_v30 = vadd.f32 %v1702_v59, %v1475_v13  ;;  %v1398_v41 = vpop.f32.mrf.mxu3  ;;  %v5971_v11 = vld [vmem:[#allocation5_spill] sm:$0xff] }
 0x14d   : > { %3854 = vmatmul.msk.bf16.gmra.mxu0 %vm733_vm2, %v1569_v53  ;;  %v1112_v26 = vrot.slane %v5971_v11, 1  ;;  %v5974_v11 = vld [vmem:[#allocation32_spill] sm:$0xff] }
 0x14e   : > { %5969 = vst [vmem:[#allocation21_spill] sm:$0xff] %v4762_v30 }
 0x14f   : > { %v1220_v31 = vpop.f32.mrf.mxu2  ;;  %v4770_v55 = vsel %vm1076_vm3, %v1110_v1, %v1112_v26 }
 0x150   : > { %v1310_v6 = vadd.f32 %v1220_v31, %v995_v39 }
 0x151   : > { %v996_v16 = vpop.f32.mrf.mxu1  ;;  %3835 = vmatmul.msk.bf16.gmra.mxu3 %vm733_vm2, %v4770_v55 }
 0x152   : > { %v1476_v47 = vadd.f32 %v1386_v21, %v1310_v6  ;;  %v1707_v33 = vpop.f32.mrf.mxu0  ;;  %v997_v13 = vadd.f32 %v996_v16, %v4647_v37  ;;  %v1573_v6 = vsel %vm1510_vm4, %v1568_v23, %v1572_v14  ;;  %v1574_v23 = vrot.slane %v5973_v32, 1 }
 0x154   : > { %v4772_v59 = vadd.f32 %v1705_v20, %v1476_v47  ;;  %v1401_v30 = vpop.f32.mrf.mxu3 }
 0x157   : > { %v1222_v46 = vpop.f32.mrf.mxu2 }
 0x158   : > { %v1311_v21 = vadd.f32 %v1222_v46, %v997_v13  ;;  %v1575_v13 = vrot.slane %v5974_v11, 2 }
 0x159   : > { %v999_v53 = vpop.f32.mrf.mxu1 }
 0x15a   : > { %v1477_v39 = vadd.f32 %v1388_v54, %v1311_v21  ;;  %v1710_v31 = vpop.f32.mrf.mxu0  ;;  %v1000_v37 = vadd.f32 %v999_v53, %v4495_v60  ;;  %v1576_v60 = vor.u32 %v1575_v13, %v1574_v23  ;;  %v5977_v13 = vld [vmem:[#allocation11_spill] sm:$0xff] }
 0x15c   : > { %3789 = vmatmul.msk.bf16.gmra.mxu1 %vm733_vm2, %v4208_v36  ;;  %3811 = vmatmul.msk.bf16.gmra.mxu2 %vm733_vm2, %v4710_v8  ;;  %v4782_v1 = vadd.f32 %v1707_v33, %v1477_v39  ;;  %v1403_v46 = vpop.f32.mrf.mxu3  ;;  %v5975_v36 = vld [vmem:[#allocation6_spill] sm:$0xff] }
 0x15d   : > { %3855 = vmatmul.msk.bf16.gmra.mxu0 %vm733_vm2, %v1573_v6  ;;  %v1114_v21 = vrot.slane %v5975_v36, 1  ;;  %v5978_v36 = vld [vmem:[#allocation9_spill] sm:$0xff] }
 0x15e   : > { %5972 = vst [vmem:[#allocation29_spill] sm:$0xff] %v4782_v1 }
 0x15f   : > { %v1225_v20 = vpop.f32.mrf.mxu2  ;;  %v4790_v8 = vsel %vm1076_vm3, %v1112_v26, %v1114_v21 }
 0x160   : > { %v1312_v16 = vadd.f32 %v1225_v20, %v1000_v37 }
 0x161   : > { %v1001_v47 = vpop.f32.mrf.mxu1  ;;  %3836 = vmatmul.msk.bf16.gmra.mxu3 %vm733_vm2, %v4790_v8 }
 0x162   : > { %v1478_v54 = vadd.f32 %v1391_v5, %v1312_v16  ;;  %v1712_v51 = vpop.f32.mrf.mxu0  ;;  %v1002_v39 = vadd.f32 %v1001_v47, %v4506_v4  ;;  %v1577_v16 = vsel %vm1510_vm4, %v1572_v14, %v1576_v60  ;;  %v1578_v14 = vrot.slane %v5977_v13, 1 }
 0x164   : > { %v4792_v33 = vadd.f32 %v1710_v31, %v1478_v54  ;;  %v1406_v1 = vpop.f32.mrf.mxu3 }
 0x167   : > { %v1227_v53 = vpop.f32.mrf.mxu2 }
 0x168   : > { %v1313_v5 = vadd.f32 %v1227_v53, %v1002_v39  ;;  %v1579_v39 = vrot.slane %v5978_v36, 2 }
 0x169   : > { %v1004_v6 = vpop.f32.mrf.mxu1 }
 0x16a   : > { %v1479_v37 = vadd.f32 %v1393_v61, %v1313_v5  ;;  %v1715_v20 = vpop.f32.mrf.mxu0  ;;  %v1005_v4 = vadd.f32 %v1004_v6, %v4520_v52  ;;  %v1580_v6 = vor.u32 %v1579_v39, %v1578_v14 }
 0x16c   : > { %3790 = vmatmul.msk.bf16.gmra.mxu1 %vm733_vm2, %v4269_v63  ;;  %3812 = vmatmul.msk.bf16.gmra.mxu2 %vm733_vm2, %v4730_v9  ;;  %v4802_v26 = vadd.f32 %v1712_v51, %v1479_v37  ;;  %v4808_v53 = vpop.f32.mrf.mxu3  ;;  %v5979_v63 = vld [vmem:[#allocation13_spill] sm:$0xff] }
 0x16d   : > { %3856 = vmatmul.msk.bf16.gmra.mxu0 %vm733_vm2, %v1577_v16  ;;  %v1116_v5 = vrot.slane %v5979_v63, 1  ;;  %v5983_v63 = vld [vmem:[#allocation12_spill] sm:$0xff] }
 0x16e   : > { %5976 = vst [vmem:[#allocation19_spill] sm:$0xff] %v4802_v26 }
 0x16f   : > { %v1230_v31 = vpop.f32.mrf.mxu2  ;;  %v4812_v9 = vsel %vm1076_vm3, %v1114_v21, %v1116_v5 }
 0x170   : > { %v1314_v47 = vadd.f32 %v1230_v31, %v1005_v4 }
 0x171   : > { %v1006_v54 = vpop.f32.mrf.mxu1  ;;  %3837 = vmatmul.msk.bf16.gmra.mxu3 %vm733_vm2, %v4812_v9 }
 0x172   : > { %v1480_v61 = vadd.f32 %v1396_v56, %v1314_v47  ;;  %v1717_v23 = vpop.f32.mrf.mxu0  ;;  %v1007_v52 = vadd.f32 %v1006_v54, %v4533_v2  ;;  %v1581_v47 = vsel %vm1510_vm4, %v1576_v60, %v1580_v6  ;;  %v5982_v60 = vld [vmem:[#allocation14_spill] sm:$0xff] }
 0x173   : > { %v1582_v39 = vrot.slane %v5982_v60, 1 }
 0x174   : > { %v4814_v51 = vadd.f32 %v1715_v20, %v1480_v61  ;;  %v4820_v26 = vpop.f32.mrf.mxu3 }
 0x176   : > { %5980 = vst [vmem:[#allocation25_spill] sm:$0xff] %v4814_v51  ;;  %v4009_v51 = vld [vmem:[%s4145_s18 + $0x90] sm:$0xff] }
 0x177   : > { %v1232_v37 = vpop.f32.mrf.mxu2 }
 0x178   : > { %v1315_v56 = vadd.f32 %v1232_v37, %v1007_v52  ;;  %v1583_v52 = vrot.slane %v5983_v63, 2 }
 0x179   : > { %v1009_v16 = vpop.f32.mrf.mxu1 }
 0x17a   : > { %v1481_v4 = vadd.f32 %v1398_v41, %v1315_v56  ;;  %v1720_v31 = vpop.f32.mrf.mxu0  ;;  %v1010_v21 = vadd.f32 %v1009_v16, %v4549_v50  ;;  %v1584_v16 = vor.u32 %v1583_v52, %v1582_v39  ;;  %v5987_v52 = vld [vmem:[#allocation23_spill] sm:$0xff] }
 0x17c   : > { %3791 = vmatmul.msk.bf16.gmra.mxu1 %vm733_vm2, %v5963_v34  ;;  %3813 = vmatmul.msk.bf16.gmra.mxu2 %vm733_vm2, %v4750_v35  ;;  %v4826_v2 = vadd.f32 %v1717_v23, %v1481_v4  ;;  %v4832_v37 = vpop.f32.mrf.mxu3  ;;  %v5984_v34 = vld [vmem:[#allocation22_spill] sm:$0xff] }
 0x17d   : > { %3857 = vmatmul.msk.bf16.gmra.mxu0 %vm733_vm2, %v1581_v47  ;;  %v1118_v56 = vrot.slane %v5984_v34, 1 }
 0x17e   : > { %5981 = vst [vmem:[#allocation30_spill] sm:$0xff] %v4826_v2 }
 0x17f   : > { %v1235_v20 = vpop.f32.mrf.mxu2  ;;  %v4836_v35 = vsel %vm1076_vm3, %v1116_v5, %v1118_v56 }
 0x180   : > { %v1316_v54 = vadd.f32 %v1235_v20, %v1010_v21 }
 0x181   : > { %v1011_v41 = vpop.f32.mrf.mxu1  ;;  %3838 = vmatmul.msk.bf16.gmra.mxu3 %vm733_vm2, %v4836_v35 }
 0x182   : > { %v1482_v61 = vadd.f32 %v1401_v30, %v1316_v54  ;;  %v1722_v14 = vpop.f32.mrf.mxu0  ;;  %v1012_v50 = vadd.f32 %v1011_v41, %v4562_v12  ;;  %v1585_v54 = vsel %vm1510_vm4, %v1580_v6, %v1584_v16 }
 0x184   : > { %v4838_v23 = vadd.f32 %v1720_v31, %v1482_v61  ;;  %v4844_v2 = vpop.f32.mrf.mxu3  ;;  %v4855_v61 = vld [vmem:[%s4327_s8 + $0x8] sm:$0xff] }
 0x186   : > { %5985 = vst [vmem:[#allocation5_spill] sm:$0xff] %v4838_v23 }
 0x187   : > { %v1237_v4 = vpop.f32.mrf.mxu2 }
 0x188   : > { %v1317_v30 = vadd.f32 %v1237_v4, %v1012_v50  ;;  %v1586_v50 = vrot.slane %v5987_v52, 1  ;;  %v5988_v4 = vld [vmem:[#allocation15_spill] sm:$0xff] }
 0x189   : > { %v1014_v47 = vpop.f32.mrf.mxu1 }
 0x18a   : > { %v1483_v21 = vadd.f32 %v1403_v46, %v1317_v30  ;;  %v1725_v20 = vpop.f32.mrf.mxu0  ;;  %v1015_v5 = vadd.f32 %v1014_v47, %v4578_v7 }
 0x18c   : > { %3792 = vmatmul.msk.bf16.gmra.mxu1 %vm733_vm2, %v5968_v10  ;;  %3814 = vmatmul.msk.bf16.gmra.mxu2 %vm733_vm2, %v4770_v55  ;;  %v4850_v12 = vadd.f32 %v1722_v14, %v1483_v21  ;;  %v1587_v10 = vrot.slane %v5988_v4, 2  ;;  %v4859_v30 = vpop.f32.mrf.mxu3  ;;  %v1344_v55 = vrot.slane %v4855_v61, 1 }
 0x18d   : > { %3858 = vmatmul.msk.bf16.gmra.mxu0 %vm733_vm2, %v1585_v54 }
 0x18e   : > { %5986 = vst [vmem:[#allocation34_spill] sm:$0xff] %v4850_v12  ;;  %v1345_v7 = vsel %vm1076_vm3, %v1118_v56, %v1344_v55  ;;  %v1588_v21 = vor.u32 %v1587_v10, %v1586_v50  ;;  %v2265_v50 = vrot.slane %v4242_v48, 3  ;;  %v2268_v10 = vrot.slane %v4305_v28, 3  ;;  %v5990_v48 = vld [vmem:[#allocation53_spill] sm:$0xff] }
 0x18f   : > { %v1240_v31 = vpop.f32.mrf.mxu2 }
 0x190   : > { %v1318_v41 = vadd.f32 %v1240_v31, %v1015_v5  ;;  %v1589_v12 = vsel %vm1510_vm4, %v1584_v16, %v1588_v21  ;;  %v2264_v16 = vrot.slane %v4302_v27, 2 }
 0x191   : > { %v1016_v46 = vpop.f32.mrf.mxu1  ;;  %3839 = vmatmul.msk.bf16.gmra.mxu3 %vm733_vm2, %v1345_v7 }
 0x192   : > { %v1484_v6 = vadd.f32 %v1406_v1, %v1318_v41  ;;  %v1727_v39 = vpop.f32.mrf.mxu0  ;;  %v1017_v47 = vadd.f32 %v1016_v46, %v4591_v58 }
 0x194   : > { %v4862_v14 = vadd.f32 %v1725_v20, %v1484_v6  ;;  %v4869_v23 = vpop.f32.mrf.mxu3  ;;  %v5896_v20 = vshrl.u32 %v5984_v34, 16 }
 0x197   : > { %v1242_v54 = vpop.f32.mrf.mxu2 }
 0x198   : > { %v1319_v1 = vadd.f32 %v1242_v54, %v1017_v47  ;;  %v2266_v47 = vor.u32 %v2265_v50, %v2264_v16  ;;  %v4010_v16 = vld [vmem:[%s4145_s18 + $0x98] sm:$0xff] }
 0x199   : > { %v1019_v5 = vpop.f32.mrf.mxu1 }
 0x19a   : > { %v1485_v31 = vadd.f32 %v4808_v53, %v1319_v1  ;;  %v1730_v41 = vpop.f32.mrf.mxu0  ;;  %v1020_v56 = vadd.f32 %v1019_v5, %v4607_v40  ;;  %v5989_v40 = vld [vmem:[#allocation26_spill] sm:$0xff] }
 0x19b   : > { %v1593_v55 = vrot.slane %v5989_v40, 2 }
 0x19c   : > { %3793 = vmatmul.msk.bf16.gmra.mxu1 %vm733_vm2, %v4009_v51  ;;  %3815 = vmatmul.msk.bf16.gmra.mxu2 %vm733_vm2, %v4790_v8  ;;  %v4875_v58 = vadd.f32 %v1727_v39, %v1485_v31  ;;  %v2267_v51 = vrot.slane %v4379_v22, 2  ;;  %v4888_v7 = vpop.f32.mrf.mxu3 }
 0x19d   : > { %3859 = vmatmul.msk.bf16.gmra.mxu0 %vm733_vm2, %v1589_v12  ;;  %v1592_v12 = vrot.slane %v5896_v20, 1 }
 0x19e   : > { %v2269_v27 = vor.u32 %v2268_v10, %v2267_v51  ;;  %v5897_v51 = vshll.u32 %v4855_v61, 16 }
 0x19f   : > { %v1245_v53 = vpop.f32.mrf.mxu2  ;;  %v1594_v1 = vor.u32 %v1593_v55, %v1592_v12  ;;  %v5992_v12 = vld [vmem:[#allocation37_spill] sm:$0xff] }
 0x1a0   : > { %v1320_v46 = vadd.f32 %v1245_v53, %v1020_v56  ;;  %v2270_v22 = vsel %vm2263_vm5, %v2266_v47, %v2269_v27  ;;  %v2271_v55 = vrot.slane %v5992_v12, 2  ;;  %v5993_v47 = vld [vmem:[#allocation31_spill] sm:$0xff] }
 0x1a1   : > { %v1021_v6 = vpop.f32.mrf.mxu1  ;;  %3907 = vmatmul.msk.bf16.vlgmr.msra.gmra.mxu3 %vm733_vm2, %v2270_v22  ;;  %v2272_v22 = vrot.slane %v5993_v47, 3  ;;  %v4011_v47 = vld [vmem:[%s4145_s18 + $0xa0] sm:$0xff] }
 0x1a2   : > { %v1486_v8 = vadd.f32 %v4820_v26, %v1320_v46  ;;  %v1732_v39 = vpop.f32.mrf.mxu0  ;;  %v1022_v28 = vadd.f32 %v1021_v6, %v5990_v48  ;;  %v1595_v46 = vsel %vm1510_vm4, %v1588_v21, %v1594_v1  ;;  %v5991_v6 = vld [vmem:[#allocation55_spill] sm:$0xff] }
 0x1a4   : > { %v4890_v54 = vadd.f32 %v1730_v41, %v1486_v8  ;;  %v4897_v20 = vpop.f32.mrf.mxu3 }
 0x1a7   : > { %v1247_v26 = vpop.f32.mrf.mxu2 }
 0x1a8   : > { %v1321_v5 = vadd.f32 %v1247_v26, %v1022_v28  ;;  %v1602_v28 = vrot.slane %v5897_v51, 2 }
 0x1a9   : > { %v1024_v31 = vpop.f32.mrf.mxu1 }
 0x1aa   : > { %v1487_v56 = vadd.f32 %v4832_v37, %v1321_v5  ;;  %v1735_v53 = vpop.f32.mrf.mxu0  ;;  %v1025_v50 = vadd.f32 %v1024_v31, %v5991_v6  ;;  %v5898_v37 = vshrl.u32 %v4855_v61, 16  ;;  %v2273_v5 = vor.u32 %v2272_v22, %v2271_v55 }
 0x1ac   : > { %3794 = vmatmul.msk.bf16.gmra.mxu1 %vm733_vm2, %v4010_v16  ;;  %3816 = vmatmul.msk.bf16.gmra.mxu2 %vm733_vm2, %v4812_v9  ;;  %v4903_v41 = vadd.f32 %v1732_v39, %v1487_v56  ;;  %v1599_v48 = vrot.slane %v5898_v37, 1  ;;  %v4916_v26 = vpop.f32.mrf.mxu3  ;;  %v2274_v56 = vsel %vm2263_vm5, %v2269_v27, %v2273_v5 }
 0x1ad   : > { %3860 = vmatmul.msk.bf16.gmra.mxu0 %vm733_vm2, %v1595_v46  ;;  %v5994_v46 = vld [vmem:[#allocation57_spill] sm:$0xff] }
 0x1ae   : > { %v1603_v6 = vor.u32 %v1602_v28, %v1599_v48  ;;  %v5997_v48 = vld [vmem:[#allocation35_spill] sm:$0xff]  ;;  %v5998_v28 = vld [vmem:[#allocation33_spill] sm:$0xff] }
 0x1af   : > { %v1250_v21 = vpop.f32.mrf.mxu2 }
 0x1b0   : > { %v1322_v10 = vadd.f32 %v1250_v21, %v1025_v50  ;;  %v1604_v55 = vsel %vm1510_vm4, %v1594_v1, %v1603_v6  ;;  %v4059_v6 = vmov 0  }
 0x1b1   : > { %v1026_v8 = vpop.f32.mrf.mxu1  ;;  %3908 = vmatmul.msk.bf16.gmra.mxu3 %vm733_vm2, %v2274_v56  ;;  %4005 = vset.pattern.permute.xlu0 %v4059_v6 }
 0x1b2   : > { %v1488_v9 = vadd.f32 %v4844_v2, %v1322_v10  ;;  %v1737_v39 = vpop.f32.mrf.mxu0  ;;  %v1027_v16 = vadd.f32 %v1026_v8, %v5994_v46  ;;  %v5996_v8 = vld [vmem:[#allocation38_spill] sm:$0xff]  ;;  %4006 = vset.pattern.permute.xlu1 %v4059_v6  ;;  %4007 = vset.pattern.permute.xlu2 %v4059_v6 }
 0x1b4   : > { %v4919_v31 = vadd.f32 %v1735_v53, %v1488_v9  ;;  %v4929_v53 = vpop.f32.mrf.mxu3 }
 0x1b7   : > { %v1252_v2 = vpop.f32.mrf.mxu2 }
 0x1b8   : > { %v1323_v50 = vadd.f32 %v1252_v2, %v1027_v16  ;;  %v2984_v2 = vld [vmem:[%s4943_s21] sm:$0xff] }
 0x1b9   : > { %v1029_v21 = vpop.f32.mrf.mxu1  ;;  %3028 = vperm.xlu0 %4005, %v2984_v2  }
 0x1ba   : > { %v1489_v10 = vadd.f32 %v4859_v30, %v1323_v50  ;;  %v1740_v12 = vpop.f32.mrf.mxu0  ;;  %v1030_v22 = vadd.f32 %v1029_v21, %v5996_v8 }
 0x1bc   : > { %3795 = vmatmul.msk.bf16.gmra.mxu1 %vm733_vm2, %v4011_v47  ;;  %3817 = vmatmul.msk.bf16.gmra.mxu2 %vm733_vm2, %v4836_v35  ;;  %v4936_v27 = vadd.f32 %v1737_v39, %v1489_v10  ;;  %v2275_v35 = vrot.slane %v5997_v48, 2  ;;  %v2276_v39 = vrot.slane %v5998_v28, 3  ;;  %v4948_v16 = vpop.f32.mrf.mxu3  ;;  %v4012_v10 = vld [vmem:[%s4145_s18 + $0x8] sm:$0xff]  ;;  %v4013_v47 = vld [vmem:[%s4145_s18 + $0x10] sm:$0xff] }
 0x1bd   : > { %3861 = vmatmul.msk.bf16.gmra.mxu0 %vm733_vm2, %v1604_v55  ;;  %v1830_v55 = vrot.slane %v4012_v10, 2  ;;  %v1831_v8 = vrot.slane %v4013_v47, 2  ;;  %v2581_v28 = vrot.slane %v4013_v47, 3 }
 0x1be   : > { %5995 = vst [vmem:[#allocation32_spill] sm:$0xff] %v4936_v27  ;;  %v2277_v50 = vor.u32 %v2276_v39, %v2275_v35 }
 0x1bf   : > { %v1255_v9 = vpop.f32.mrf.mxu2  ;;  %v1832_v39 = vsel %vm1829_vm6, %v1830_v55, %v1831_v8  ;;  %v6002_v55 = vld [vmem:[#allocation41_spill] sm:$0xff] }
 0x1c0   : > { %v1324_v30 = vadd.f32 %v1255_v9, %v1030_v22  ;;  %v4014_v22 = vld [vmem:[%s4145_s18 + $0x18] sm:$0xff] }
 0x1c1   : > { %v1031_v1 = vpop.f32.mrf.mxu1  ;;  %v1833_v9 = vrot.slane %v4014_v22, 2  ;;  %v2582_v51 = vrot.slane %v4014_v22, 3 }
 0x1c2   : > { %v1490_v56 = vadd.f32 %v4869_v23, %v1324_v30  ;;  %v1742_v46 = vpop.f32.mrf.mxu0  ;;  %v2278_v23 = vsel %vm2263_vm5, %v2273_v5, %v2277_v50  ;;  %v6000_v30 = vld [vmem:[#allocation39_spill] sm:$0xff] }
 0x1c3   : > { %v1032_v48 = vadd.f32 %v1031_v1, %v6000_v30  ;;  %3909 = vmatmul.msk.bf16.gmra.mxu3 %vm733_vm2, %v2278_v23  ;;  %v2583_v5 = vsel %vm2580_vm7, %v2581_v28, %v2582_v51  ;;  %v2985_v1 = vld [vmem:[%s4943_s21 + $0x8] sm:$0xff] }
 0x1c4   : > { %v4951_v21 = vadd.f32 %v1740_v12, %v1490_v56  ;;  %v1834_v56 = vsel %vm1829_vm6, %v1831_v8, %v1833_v9  ;;  %v4963_v10 = vpop.f32.mrf.mxu3  ;;  %3033 = vperm.xlu0 %4005, %v2985_v1   ;;  %v6003_v23 = vld [vmem:[#allocation3_spill] sm:$0xff] }
 0x1c5   : > { %v2279_v30 = vrot.slane %v6003_v23, 2 }
 0x1c6   : > { %5999 = vst [vmem:[#allocation6_spill] sm:$0xff] %v4951_v21  ;;  %v2986_v21 = vld [vmem:[%s4943_s21 + $0x10] sm:$0xff] }
 0x1c7   : > { %v1257_v37 = vpop.f32.mrf.mxu2  ;;  %3038 = vperm.xlu1 %4006, %v2986_v21  }
 0x1c8   : > { %v1325_v12 = vadd.f32 %v1257_v37, %v1032_v48  ;;  %v6004_v48 = vld [vmem:[#allocation2_spill] sm:$0xff] }
 0x1c9   : > { %v1034_v35 = vpop.f32.mrf.mxu1  ;;  %v2280_v28 = vrot.slane %v6004_v48, 3 }
 0x1ca   : > { %v1491_v6 = vadd.f32 %v4888_v7, %v1325_v12  ;;  %v1745_v2 = vpop.f32.mrf.mxu0  ;;  %v1035_v47 = vadd.f32 %v1034_v35, %v6002_v55 }
 0x1cc   : > { %3863 = vmatmul.msk.bf16.vlgmr.msra.gmra.mxu1 %vm733_vm2, %v1832_v39  ;;  %3885 = vmatmul.msk.bf16.vlgmr.msra.gmra.mxu2 %vm733_vm2, %v1834_v56  ;;  %v4968_v37 = vadd.f32 %v1742_v46, %v1491_v6  ;;  %v4975_v39 = vpop.f32.mrf.mxu3  ;;  %v2281_v46 = vor.u32 %v2280_v28, %v2279_v30 }
 0x1cd   : > { %3929 = vmatmul.msk.bf16.vlgmr.msra.gmra.mxu0 %vm733_vm2, %v2583_v5  ;;  %v4015_v5 = vld [vmem:[%s4145_s18 + $0x20] sm:$0xff] }
 0x1ce   : > { %6001 = vst [vmem:[#allocation11_spill] sm:$0xff] %v4968_v37  ;;  %v1835_v35 = vrot.slane %v4015_v5, 2  ;;  %v2282_v55 = vsel %vm2263_vm5, %v2277_v50, %v2281_v46  ;;  %v2584_v23 = vrot.slane %v4015_v5, 3 }
 0x1cf   : > { %v1260_v7 = vpop.f32.mrf.mxu2 }
 0x1d0   : > { %v1326_v8 = vadd.f32 %v1260_v7, %v1035_v47  ;;  %v6006_v47 = vld [vmem:[#allocation43_spill] sm:$0xff]  ;;  %v1836_v48 = vsel %vm1829_vm6, %v1833_v9, %v1835_v35 }
 0x1d1   : > { %v1036_v22 = vpop.f32.mrf.mxu1 }
 0x1d2   : > { %v1492_v12 = vadd.f32 %v4897_v20, %v1326_v8  ;;  %v1747_v1 = vpop.f32.mrf.mxu0  ;;  %v1037_v7 = vadd.f32 %v1036_v22, %v6006_v47  ;;  %v6010_v47 = vld [vmem:[#allocation4_spill] sm:$0xff] }
 0x1d3   : > { %3910 = vmatmul.msk.bf16.gmra.mxu3 %vm733_vm2, %v2282_v55  ;;  %v6009_v55 = vld [vmem:[#allocation7_spill] sm:$0xff] }
 0x1d4   : > { %v4978_v6 = vadd.f32 %v1745_v2, %v1492_v12  ;;  %v2585_v2 = vsel %vm2580_vm7, %v2582_v51, %v2584_v23  ;;  %v4987_v28 = vpop.f32.mrf.mxu3  ;;  %v2987_v12 = vld [vmem:[%s4943_s21 + $0x18] sm:$0xff]  ;;  %v2283_v51 = vrot.slane %v6009_v55, 2 }
 0x1d5   : > { %3043 = vperm.xlu1 %4006, %v2987_v12  }
 0x1d6   : > { %6005 = vst [vmem:[#allocation9_spill] sm:$0xff] %v4978_v6 }
 0x1d7   : > { %v1262_v37 = vpop.f32.mrf.mxu2 }
 0x1d8   : > { %v1327_v20 = vadd.f32 %v1262_v37, %v1037_v7  ;;  %v6008_v37 = vld [vmem:[#allocation45_spill] sm:$0xff]  ;;  %v2284_v7 = vrot.slane %v6010_v47, 3 }
 0x1d9   : > { %v1039_v8 = vpop.f32.mrf.mxu1 }
 0x1da   : > { %v1493_v21 = vadd.f32 %v4916_v26, %v1327_v20  ;;  %v1750_v30 = vpop.f32.mrf.mxu0  ;;  %v1040_v9 = vadd.f32 %v1039_v8, %v6008_v37  ;;  %v6011_v8 = vld [vmem:[#allocation47_spill] sm:$0xff] }
 0x1dc   : > { %3864 = vmatmul.msk.bf16.gmra.mxu1 %vm733_vm2, %v1834_v56  ;;  %3886 = vmatmul.msk.bf16.gmra.mxu2 %vm733_vm2, %v1836_v48  ;;  %v4992_v50 = vadd.f32 %v1747_v1, %v1493_v21  ;;  %v4999_v6 = vpop.f32.mrf.mxu3  ;;  %v2285_v56 = vor.u32 %v2284_v7, %v2283_v51  ;;  %v4016_v1 = vld [vmem:[%s4145_s18 + $0x28] sm:$0xff] }
 0x1dd   : > { %3930 = vmatmul.msk.bf16.gmra.mxu0 %vm733_vm2, %v2585_v2  ;;  %v1837_v21 = vrot.slane %v4016_v1, 2 }
 0x1de   : > { %6007 = vst [vmem:[#allocation13_spill] sm:$0xff] %v4992_v50  ;;  %v2286_v2 = vsel %vm2263_vm5, %v2281_v46, %v2285_v56 }
 0x1df   : > { %v1265_v22 = vpop.f32.mrf.mxu2 }
 0x1e0   : > { %v1328_v26 = vadd.f32 %v1265_v22, %v1040_v9  ;;  %v2586_v9 = vrot.slane %v4016_v1, 3  ;;  %v6014_v1 = vld [vmem:[#allocation16_spill] sm:$0xff] }
 0x1e1   : > { %v1041_v5 = vpop.f32.mrf.mxu1 }
 0x1e2   : > { %v1494_v20 = vadd.f32 %v4929_v53, %v1328_v26  ;;  %v1752_v12 = vpop.f32.mrf.mxu0  ;;  %v1042_v37 = vadd.f32 %v1041_v5, %v6011_v8  ;;  %v1838_v53 = vsel %vm1829_vm6, %v1835_v35, %v1837_v21  ;;  %v6013_v5 = vld [vmem:[#allocation49_spill] sm:$0xff]  ;;  %v6015_v8 = vld [vmem:[#allocation8_spill] sm:$0xff] }
 0x1e3   : > { %3911 = vmatmul.msk.bf16.gmra.mxu3 %vm733_vm2, %v2286_v2  ;;  %v2287_v2 = vrot.slane %v6014_v1, 2 }
 0x1e4   : > { %v5001_v27 = vadd.f32 %v1750_v30, %v1494_v20  ;;  %v2587_v30 = vsel %vm2580_vm7, %v2584_v23, %v2586_v9  ;;  %v5010_v51 = vpop.f32.mrf.mxu3  ;;  %v2288_v23 = vrot.slane %v6015_v8, 3 }
 0x1e7   : > { %v1267_v22 = vpop.f32.mrf.mxu2 }
 0x1e8   : > { %v1329_v55 = vadd.f32 %v1267_v22, %v1042_v37 }
 0x1e9   : > { %v1044_v47 = vpop.f32.mrf.mxu1 }
 0x1ea   : > { %v1495_v26 = vadd.f32 %v4948_v16, %v1329_v55  ;;  %v1755_v50 = vpop.f32.mrf.mxu0  ;;  %v1045_v7 = vadd.f32 %v1044_v47, %v6013_v5  ;;  %v2990_v55 = vld [vmem:[%s4943_s21 + $0x30] sm:$0xff] }
 0x1eb   : > { %3058 = vperm.xlu0 %4005, %v2990_v55   ;;  %v4017_v47 = vld [vmem:[%s4145_s18 + $0x30] sm:$0xff]  ;;  %v2988_v55 = vld [vmem:[%s4943_s21 + $0x20] sm:$0xff] }
 0x1ec   : > { %3865 = vmatmul.msk.bf16.gmra.mxu1 %vm733_vm2, %v1836_v48  ;;  %3887 = vmatmul.msk.bf16.gmra.mxu2 %vm733_vm2, %v1838_v53  ;;  %v5014_v46 = vadd.f32 %v1752_v12, %v1495_v26  ;;  %v5021_v48 = vpop.f32.mrf.mxu3  ;;  %v2289_v12 = vor.u32 %v2288_v23, %v2287_v2  ;;  %v2588_v1 = vrot.slane %v4017_v47, 3 }
 0x1ed   : > { %3931 = vmatmul.msk.bf16.gmra.mxu0 %vm733_vm2, %v2587_v30  ;;  %v1839_v30 = vrot.slane %v4017_v47, 2  ;;  %3048 = vperm.xlu2 %4007, %v2988_v55   ;;  %v2989_v55 = vld [vmem:[%s4943_s21 + $0x28] sm:$0xff] }
 0x1ee   : > { %6012 = vst [vmem:[#allocation14_spill] sm:$0xff] %v5014_v46  ;;  %v2290_v5 = vsel %vm2263_vm5, %v2285_v56, %v2289_v12 }
 0x1ef   : > { %v1270_v35 = vpop.f32.mrf.mxu2  ;;  %v1840_v46 = vsel %vm1829_vm6, %v1837_v21, %v1839_v30 }
 0x1f0   : > { %v1330_v20 = vadd.f32 %v1270_v35, %v1045_v7  ;;  %v6017_v7 = vld [vmem:[#allocation51_spill] sm:$0xff] }
 0x1f1   : > { %v1046_v16 = vpop.f32.mrf.mxu1 }
 0x1f2   : > { %v1496_v37 = vadd.f32 %v4963_v10, %v1330_v20  ;;  %v1757_v22 = vpop.f32.mrf.mxu0  ;;  %v1047_v35 = vadd.f32 %v1046_v16, %v6017_v7 }
 0x1f3   : > { %3912 = vmatmul.msk.bf16.gmra.mxu3 %vm733_vm2, %v2290_v5  ;;  %v6020_v5 = vld [vmem:[#allocation27_spill] sm:$0xff] }
 0x1f4   : > { %v5024_v26 = vadd.f32 %v1755_v50, %v1496_v37  ;;  %v2589_v50 = vsel %vm2580_vm7, %v2586_v9, %v2588_v1  ;;  %v5033_v37 = vpop.f32.mrf.mxu3  ;;  %v2291_v7 = vrot.slane %v6020_v5, 2 }
 0x1f5   : > { %3053 = vperm.xlu2 %4007, %v2989_v55  }
 0x1f6   : > { %6016 = vst [vmem:[#allocation12_spill] sm:$0xff] %v5024_v26  ;;  %v2991_v26 = vld [vmem:[%s4943_s21 + $0x38] sm:$0xff] }
 0x1f7   : > { %v1272_v8 = vpop.f32.mrf.mxu2  ;;  %3063 = vperm.xlu1 %4006, %v2991_v26  }
 0x1f8   : > { %v1331_v10 = vadd.f32 %v1272_v8, %v1047_v35  ;;  %v6021_v35 = vld [vmem:[#allocation17_spill] sm:$0xff] }
 0x1f9   : > { %v1049_v20 = vpop.f32.mrf.mxu1  ;;  %v2292_v8 = vrot.slane %v6021_v35, 3 }
 0x1fa   : > { %v1497_v2 = vadd.f32 %v4975_v39, %v1331_v10  ;;  %v1760_v23 = vpop.f32.mrf.mxu0  ;;  %v6019_v39 = vld [vmem:[#allocation52_spill] sm:$0xff] }
 0x1fb   : > { %v1050_v21 = vadd.f32 %v1049_v20, %v6019_v39 }
 0x1fc   : > { %3866 = vmatmul.msk.bf16.gmra.mxu1 %vm733_vm2, %v1838_v53  ;;  %3888 = vmatmul.msk.bf16.gmra.mxu2 %vm733_vm2, %v1840_v46  ;;  %v5039_v56 = vadd.f32 %v1757_v22, %v1497_v2  ;;  %v5046_v53 = vpop.f32.mrf.mxu3  ;;  %v2293_v22 = vor.u32 %v2292_v8, %v2291_v7 }
 0x1fd   : > { %3932 = vmatmul.msk.bf16.gmra.mxu0 %vm733_vm2, %v2589_v50  ;;  %v4018_v50 = vld [vmem:[%s4145_s18 + $0x38] sm:$0xff] }
 0x1fe   : > { %6018 = vst [vmem:[#allocation22_spill] sm:$0xff] %v5039_v56  ;;  %v1841_v20 = vrot.slane %v4018_v50, 2  ;;  %v2294_v39 = vsel %vm2263_vm5, %v2289_v12, %v2293_v22  ;;  %v2590_v5 = vrot.slane %v4018_v50, 3 }
 0x1ff   : > { %v1275_v16 = vpop.f32.mrf.mxu2 }
 0x200   : > { %v1332_v9 = vadd.f32 %v1275_v16, %v1050_v21  ;;  %v6023_v21 = vld [vmem:[#allocation54_spill] sm:$0xff]  ;;  %v1842_v35 = vsel %vm1829_vm6, %v1839_v30, %v1841_v20  ;;  %v6025_v30 = vld [vmem:[#allocation56_spill] sm:$0xff] }
 0x201   : > { %v1051_v47 = vpop.f32.mrf.mxu1 }
 0x202   : > { %v1498_v26 = vadd.f32 %v4987_v28, %v1332_v9  ;;  %v1762_v10 = vpop.f32.mrf.mxu0  ;;  %v1052_v16 = vadd.f32 %v1051_v47, %v6023_v21  ;;  %v6027_v21 = vld [vmem:[#allocation28_spill] sm:$0xff] }
 0x203   : > { %3913 = vmatmul.msk.bf16.gmra.mxu3 %vm733_vm2, %v2294_v39 }
 0x204   : > { %v5049_v2 = vadd.f32 %v1760_v23, %v1498_v26  ;;  %v2591_v23 = vsel %vm2580_vm7, %v2588_v1, %v2590_v5  ;;  %v5058_v8 = vpop.f32.mrf.mxu3  ;;  %v2993_v26 = vld [vmem:[%s4943_s21 + $0x48] sm:$0xff]  ;;  %v6026_v1 = vld [vmem:[#allocation36_spill] sm:$0xff] }
 0x205   : > { %3073 = vperm.xlu0 %4005, %v2993_v26   ;;  %v2295_v39 = vrot.slane %v6026_v1, 2 }
 0x206   : > { %6022 = vst [vmem:[#allocation23_spill] sm:$0xff] %v5049_v2  ;;  %v2994_v2 = vld [vmem:[%s4943_s21 + $0x50] sm:$0xff] }
 0x207   : > { %v1277_v56 = vpop.f32.mrf.mxu2  ;;  %3078 = vperm.xlu1 %4006, %v2994_v2  }
 0x208   : > { %v1333_v28 = vadd.f32 %v1277_v56, %v1052_v16  ;;  %v2296_v16 = vrot.slane %v6027_v21, 3 }
 0x209   : > { %v1054_v9 = vpop.f32.mrf.mxu1 }
 0x20a   : > { %v1499_v55 = vadd.f32 %v4999_v6, %v1333_v28  ;;  %v1765_v7 = vpop.f32.mrf.mxu0  ;;  %v1055_v56 = vadd.f32 %v1054_v9, %v6025_v30 }
 0x20c   : > { %3867 = vmatmul.msk.bf16.gmra.mxu1 %vm733_vm2, %v1840_v46  ;;  %3889 = vmatmul.msk.bf16.gmra.mxu2 %vm733_vm2, %v1842_v35  ;;  %v5063_v12 = vadd.f32 %v1762_v10, %v1499_v55  ;;  %v5070_v46 = vpop.f32.mrf.mxu3  ;;  %v2297_v10 = vor.u32 %v2296_v16, %v2295_v39 }
 0x20d   : > { %3933 = vmatmul.msk.bf16.gmra.mxu0 %vm733_vm2, %v2591_v23  ;;  %v4019_v23 = vld [vmem:[%s4145_s18 + $0x40] sm:$0xff] }
 0x20e   : > { %6024 = vst [vmem:[#allocation15_spill] sm:$0xff] %v5063_v12  ;;  %v1843_v9 = vrot.slane %v4019_v23, 2  ;;  %v2298_v30 = vsel %vm2263_vm5, %v2293_v22, %v2297_v10  ;;  %v2592_v1 = vrot.slane %v4019_v23, 3 }
 0x20f   : > { %v1280_v6 = vpop.f32.mrf.mxu2 }
 0x210   : > { %v1334_v47 = vadd.f32 %v1280_v6, %v1055_v56  ;;  %v6029_v56 = vld [vmem:[#allocation58_spill] sm:$0xff]  ;;  %v1844_v21 = vsel %vm1829_vm6, %v1841_v20, %v1843_v9  ;;  %v6031_v20 = vld [vmem:[#allocation40_spill] sm:$0xff] }
 0x211   : > { %v1056_v50 = vpop.f32.mrf.mxu1 }
 0x212   : > { %v1500_v28 = vadd.f32 %v5010_v51, %v1334_v47  ;;  %v1767_v26 = vpop.f32.mrf.mxu0  ;;  %v1057_v6 = vadd.f32 %v1056_v50, %v6029_v56  ;;  %v6033_v56 = vld [vmem:[#allocation20_spill] sm:$0xff] }
 0x213   : > { %3914 = vmatmul.msk.bf16.gmra.mxu3 %vm733_vm2, %v2298_v30 }
 0x214   : > { %v5073_v55 = vadd.f32 %v1765_v7, %v1500_v28  ;;  %v2593_v7 = vsel %vm2580_vm7, %v2590_v5, %v2592_v1  ;;  %v5082_v16 = vpop.f32.mrf.mxu3  ;;  %v2992_v28 = vld [vmem:[%s4943_s21 + $0x40] sm:$0xff]  ;;  %v6032_v5 = vld [vmem:[#allocation24_spill] sm:$0xff] }
 0x215   : > { %3068 = vperm.xlu2 %4007, %v2992_v28   ;;  %v2299_v30 = vrot.slane %v6032_v5, 2 }
 0x216   : > { %6028 = vst [vmem:[#allocation26_spill] sm:$0xff] %v5073_v55  ;;  %v2996_v55 = vld [vmem:[%s4943_s21 + $0x60] sm:$0xff] }
 0x217   : > { %v1282_v12 = vpop.f32.mrf.mxu2  ;;  %3088 = vperm.xlu0 %4005, %v2996_v55  }
 0x218   : > { %v1335_v51 = vadd.f32 %v1282_v12, %v1057_v6  ;;  %v2300_v6 = vrot.slane %v6033_v56, 3 }
 0x219   : > { %v1059_v47 = vpop.f32.mrf.mxu1 }
 0x21a   : > { %v1501_v2 = vadd.f32 %v5021_v48, %v1335_v51  ;;  %v1770_v39 = vpop.f32.mrf.mxu0  ;;  %v1060_v12 = vadd.f32 %v1059_v47, %v6031_v20 }
 0x21c   : > { %3868 = vmatmul.msk.bf16.gmra.mxu1 %vm733_vm2, %v1842_v35  ;;  %3890 = vmatmul.msk.bf16.gmra.mxu2 %vm733_vm2, %v1844_v21  ;;  %v5087_v22 = vadd.f32 %v1767_v26, %v1501_v2  ;;  %v5094_v35 = vpop.f32.mrf.mxu3  ;;  %v2301_v26 = vor.u32 %v2300_v6, %v2299_v30 }
 0x21d   : > { %3934 = vmatmul.msk.bf16.gmra.mxu0 %vm733_vm2, %v2593_v7  ;;  %v4020_v7 = vld [vmem:[%s4145_s18 + $0x48] sm:$0xff] }
 0x21e   : > { %6030 = vst [vmem:[#allocation53_spill] sm:$0xff] %v5087_v22  ;;  %v1845_v47 = vrot.slane %v4020_v7, 2  ;;  %v2302_v20 = vsel %vm2263_vm5, %v2297_v10, %v2301_v26  ;;  %v2594_v5 = vrot.slane %v4020_v7, 3 }
 0x21f   : > { %v1285_v48 = vpop.f32.mrf.mxu2 }
 0x220   : > { %v1336_v50 = vadd.f32 %v1285_v48, %v1060_v12  ;;  %v6034_v12 = vld [vmem:[#allocation42_spill] sm:$0xff]  ;;  %v1846_v56 = vsel %vm1829_vm6, %v1843_v9, %v1845_v47  ;;  %v6035_v9 = vld [vmem:[#allocation44_spill] sm:$0xff] }
 0x221   : > { %v1061_v23 = vpop.f32.mrf.mxu1 }
 0x222   : > { %v1502_v51 = vadd.f32 %v5033_v37, %v1336_v50  ;;  %v1772_v28 = vpop.f32.mrf.mxu0  ;;  %v1062_v48 = vadd.f32 %v1061_v23, %v6034_v12 }
 0x223   : > { %3915 = vmatmul.msk.bf16.gmra.mxu3 %vm733_vm2, %v2302_v20  ;;  %v2304_v20 = vrot.slane %v4175_v17, 3 }
 0x224   : > { %v5097_v2 = vadd.f32 %v1770_v39, %v1502_v51  ;;  %v2595_v39 = vsel %vm2580_vm7, %v2592_v1, %v2594_v5  ;;  %v5106_v6 = vpop.f32.mrf.mxu3  ;;  %v2997_v51 = vld [vmem:[%s4943_s21 + $0x68] sm:$0xff]  ;;  %v2303_v1 = vrot.slane %v4178_v18, 2 }
 0x225   : > { %3093 = vperm.xlu1 %4006, %v2997_v51  }
 0x227   : > { %v1287_v22 = vpop.f32.mrf.mxu2 }
 0x228   : > { %v1337_v37 = vadd.f32 %v1287_v22, %v1062_v48 }
 0x229   : > { %v1064_v50 = vpop.f32.mrf.mxu1 }
 0x22a   : > { %v1503_v55 = vadd.f32 %v5046_v53, %v1337_v37  ;;  %v1775_v30 = vpop.f32.mrf.mxu0  ;;  %v1065_v22 = vadd.f32 %v1064_v50, %v6035_v9  ;;  %v2995_v37 = vld [vmem:[%s4943_s21 + $0x58] sm:$0xff]  ;;  %v6036_v9 = vld [vmem:[#allocation46_spill] sm:$0xff] }
 0x22b   : > { %3083 = vperm.xlu2 %4007, %v2995_v37  }
 0x22c   : > { %3869 = vmatmul.msk.bf16.gmra.mxu1 %vm733_vm2, %v1844_v21  ;;  %3891 = vmatmul.msk.bf16.gmra.mxu2 %vm733_vm2, %v1846_v56  ;;  %v5111_v10 = vadd.f32 %v1772_v28, %v1503_v55  ;;  %v5118_v21 = vpop.f32.mrf.mxu3  ;;  %v2305_v28 = vor.u32 %v2304_v20, %v2303_v1 }
 0x22d   : > { %3935 = vmatmul.msk.bf16.gmra.mxu0 %vm733_vm2, %v2595_v39  ;;  %v4021_v39 = vld [vmem:[%s4145_s18 + $0x50] sm:$0xff] }
 0x22e   : > { %v1847_v50 = vrot.slane %v4021_v39, 2  ;;  %v2306_v51 = vsel %vm2263_vm5, %v2301_v26, %v2305_v28  ;;  %v2596_v18 = vrot.slane %v4021_v39, 3 }
 0x22f   : > { %v1290_v53 = vpop.f32.mrf.mxu2 }
 0x230   : > { %v1338_v23 = vadd.f32 %v1290_v53, %v1065_v22 }
 0x231   : > { %v1066_v7 = vpop.f32.mrf.mxu1 }
 0x232   : > { %v1504_v12 = vadd.f32 %v5058_v8, %v1338_v23  ;;  %v1777_v48 = vpop.f32.mrf.mxu0  ;;  %v1067_v22 = vadd.f32 %v1066_v7, %v6036_v9  ;;  %v1848_v23 = vsel %vm1829_vm6, %v1845_v47, %v1847_v50  ;;  %v6037_v47 = vld [vmem:[#allocation48_spill] sm:$0xff]  ;;  %v2308_v9 = vrot.slane %v4181_v19, 3 }
 0x233   : > { %3916 = vmatmul.msk.bf16.gmra.mxu3 %vm733_vm2, %v2306_v51 }
 0x234   : > { %v5121_v55 = vadd.f32 %v1775_v30, %v1504_v12  ;;  %v2597_v30 = vsel %vm2580_vm7, %v2594_v5, %v2596_v18  ;;  %v5130_v20 = vpop.f32.mrf.mxu3  ;;  %v2999_v12 = vld [vmem:[%s4943_s21 + $0x78] sm:$0xff]  ;;  %v2307_v5 = vrot.slane %v4229_v43, 2 }
 0x235   : > { %3103 = vperm.xlu0 %4005, %v2999_v12  }
 0x237   : > { %v1292_v53 = vpop.f32.mrf.mxu2 }
 0x238   : > { %v1339_v17 = vadd.f32 %v1292_v53, %v1067_v22 }
 0x239   : > { %v1069_v8 = vpop.f32.mrf.mxu1 }
 0x23a   : > { %v1505_v37 = vadd.f32 %v5070_v46, %v1339_v17  ;;  %v1780_v1 = vpop.f32.mrf.mxu0  ;;  %v1070_v7 = vadd.f32 %v1069_v8, %v6037_v47  ;;  %v3000_v17 = vld [vmem:[%s4943_s21 + $0x80] sm:$0xff] }
 0x23b   : > { %3108 = vperm.xlu1 %4006, %v3000_v17   ;;  %v6038_v47 = vld [vmem:[#allocation50_spill] sm:$0xff] }
 0x23c   : > { %3870 = vmatmul.msk.bf16.gmra.mxu1 %vm733_vm2, %v1846_v56  ;;  %3892 = vmatmul.msk.bf16.gmra.mxu2 %vm733_vm2, %v1848_v23  ;;  %v5135_v26 = vadd.f32 %v1777_v48, %v1505_v37  ;;  %v5142_v56 = vpop.f32.mrf.mxu3  ;;  %v2309_v48 = vor.u32 %v2308_v9, %v2307_v5 }
 0x23d   : > { %3936 = vmatmul.msk.bf16.gmra.mxu0 %vm733_vm2, %v2597_v30  ;;  %v4022_v30 = vld [vmem:[%s4145_s18 + $0x58] sm:$0xff] }
 0x23e   : > { %v1849_v8 = vrot.slane %v4022_v30, 2  ;;  %v2310_v12 = vsel %vm2263_vm5, %v2305_v28, %v2309_v48  ;;  %v2598_v43 = vrot.slane %v4022_v30, 3  ;;  %v3029_v30 = vpop.permute.xlu0 %3028 }
 0x23f   : > { %v1295_v46 = vpop.f32.mrf.mxu2 }
 0x240   : > { %v1340_v39 = vadd.f32 %v1295_v46, %v1070_v7 }
 0x241   : > { %v1071_v51 = vpop.f32.mrf.mxu1 }
 0x242   : > { %v1506_v22 = vadd.f32 %v5082_v16, %v1340_v39  ;;  %v1782_v53 = vpop.f32.mrf.mxu0  ;;  %v1072_v7 = vadd.f32 %v1071_v51, %v6038_v47  ;;  %v1850_v39 = vsel %vm1829_vm6, %v1847_v50, %v1849_v8  ;;  %v2312_v47 = vrot.slane %v5962_v44, 3 }
 0x243   : > { %3917 = vmatmul.msk.bf16.gmra.mxu3 %vm733_vm2, %v2310_v12  ;;  %v2311_v12 = vrot.slane %v5961_v57, 2 }
 0x244   : > { %v5145_v37 = vadd.f32 %v1780_v1, %v1506_v22  ;;  %v2599_v1 = vsel %vm2580_vm7, %v2596_v18, %v2598_v43  ;;  %v2998_v22 = vld [vmem:[%s4943_s21 + $0x70] sm:$0xff] }
 0x245   : > { %3098 = vperm.xlu2 %4007, %v2998_v22  }
 0x246   : > { %v5154_v9 = vpop.f32.mrf.mxu3 }
 0x247   : > { %v1297_v46 = vpop.f32.mrf.mxu2 }
 0x248   : > { %v1341_v19 = vadd.f32 %v1297_v46, %v1072_v7 }
 0x249   : > { %v1948_v16 = vpop.f32.mrf.mxu1 }
 0x24a   : > { %v1507_v17 = vadd.f32 %v5094_v35, %v1341_v19  ;;  %v2699_v5 = vpop.f32.mrf.mxu0  ;;  %v2053_v50 = vadd.f32 %v1948_v16, %v4672_v0  ;;  %v3002_v0 = vld [vmem:[%s4943_s21 + $0x90] sm:$0xff]  ;;  %v2313_v19 = vor.u32 %v2312_v47, %v2311_v12 }
 0x24b   : > { %3118 = vperm.xlu0 %4005, %v3002_v0   ;;  %v3003_v0 = vld [vmem:[%s4943_s21 + $0x98] sm:$0xff] }
 0x24c   : > { %3871 = vmatmul.msk.bf16.gmra.mxu1 %vm733_vm2, %v1848_v23  ;;  %3893 = vmatmul.msk.bf16.gmra.mxu2 %vm733_vm2, %v1850_v39  ;;  %v5159_v28 = vadd.f32 %v1782_v53, %v1507_v17  ;;  %v5169_v53 = vld [vmem:[%s5834_s3] ss:$0 sm:$0xff]  ;;  %v2314_v44 = vsel %vm2263_vm5, %v2309_v48, %v2313_v19 }
 0x24d   : > { %3937 = vmatmul.msk.bf16.gmra.mxu0 %vm733_vm2, %v2599_v1  ;;  %v5176_v17 = vld [vmem:[%s4145_s18 + $0x60] sm:$0xff]  ;;  %3123 = vperm.xlu1 %4006, %v3003_v0  }
 0x24e   : > { %v5171_v46 = vpop.f32.mrf.mxu3  ;;  %v1851_v57 = vrot.slane %v5176_v17, 2  ;;  %v5899_v22 = vrot.slane %v5176_v17, 3 }
 0x24f   : > { %v2114_v35 = vpop.f32.mrf.mxu2 }
 0x250   : > { %v2219_v51 = vadd.f32 %v2114_v35, %v2053_v50  ;;  %v2601_v47 = vsel %vm2580_vm7, %v2598_v43, %v5899_v22 }
 0x251   : > { %v1950_v18 = vpop.f32.mrf.mxu1 }
 0x252   : > { %v2536_v23 = vadd.f32 %v5106_v6, %v2219_v51  ;;  %v2701_v7 = vpop.f32.mrf.mxu0  ;;  %v2054_v1 = vadd.f32 %v1950_v18, %v4682_v38  ;;  %v5192_v38 = vsel %vm1829_vm6, %v1849_v8, %v1851_v57 }
 0x253   : > { %3918 = vmatmul.msk.bf16.gmra.mxu3 %vm733_vm2, %v2314_v44  ;;  %v3034_v44 = vpop.permute.xlu0 %3033 }
 0x254   : > { %v2804_v16 = vadd.f32 %v2699_v5, %v2536_v23 }
 0x256   : > { %v2850_v6 = vadd.f32 %v5169_v53, %v2804_v16  ;;  %v3236_v51 = vmul.f32 %v3029_v30, %v2804_v16  ;;  %v5200_v23 = vpop.f32.mrf.mxu3 }
 0x257   : > { %v2116_v5 = vpop.f32.mrf.mxu2 }
 0x258   : > { %v2892_v50 = vpack.c.bf16 %v2850_v6, %v2850_v6  ;;  %v2220_v35 = vadd.f32 %v2116_v5, %v2054_v1  ;;  %v3280_v1 = vsel %vm3279_vm9, %v3236_v51, 0.0 }
 0x259   : > { %v1953_v48 = vpop.f32.mrf.mxu1 }
 0x25a   : > { %2935 = vst.msk [vmem:[%s5186_s10] sm:$0xf] %vm2934_vm8, %v2892_v50  ;;  %v2537_v18 = vadd.f32 %v5118_v21, %v2220_v35  ;;  %v2704_v12 = vpop.f32.mrf.mxu0  ;;  %v3373_v21 = vmul.f32 %v3236_v51, %v2804_v16  ;;  %v2055_v30 = vadd.f32 %v1953_v48, %v4692_v42  ;;  %v2315_v16 = vrot.slane %v5966_v25, 2 }
 0x25b   : > { %v2316_v42 = vrot.slane %v5967_v49, 3 }
 0x25c   : > { %3872 = vmatmul.msk.bf16.gmra.mxu1 %vm733_vm2, %v1850_v39  ;;  %3894 = vmatmul.msk.bf16.gmra.mxu2 %vm733_vm2, %v5192_v38  ;;  %v2805_v8 = vadd.f32 %v2701_v7, %v2537_v18  ;;  %v3039_v18 = vpop.permute.xlu1 %3038  ;;  %v3415_v48 = vsel %vm3279_vm9, %v3373_v21, 0.0 }
 0x25d   : > { %3938 = vmatmul.msk.bf16.gmra.mxu0 %vm733_vm2, %v2601_v47 }
 0x25e   : > { %v2851_v43 = vadd.f32 %v5169_v53, %v2805_v8  ;;  %v3237_v6 = vmul.f32 %v3034_v44, %v2805_v8 }
 0x25f   : > { %v2119_v5 = vpop.f32.mrf.mxu2 }
 0x260   : > { %v2893_v50 = vpack.c.bf16 %v2851_v43, %v2851_v43  ;;  %v3281_v39 = vsel %vm3279_vm9, %v3237_v6, 0.0  ;;  %v3374_v35 = vmul.f32 %v3237_v6, %v2805_v8  ;;  %v2221_v0 = vadd.f32 %v2119_v5, %v2055_v30  ;;  %v5218_v43 = vpop.f32.mrf.mxu3  ;;  %v3001_v8 = vld [vmem:[%s4943_s21 + $0x88] sm:$0xff] }
 0x261   : > { %v3282_v22 = vadd.f32 %v3281_v39, %v3280_v1  ;;  %v1955_v7 = vpop.f32.mrf.mxu1  ;;  %3113 = vperm.xlu2 %4007, %v3001_v8   ;;  %v2317_v6 = vor.u32 %v2316_v42, %v2315_v16  ;;  %v5222_v5 = vld [vmem:[%s4145_s18 + $0x68] sm:$0xff] }
 0x262   : > { %2936 = vst.msk [vmem:[%s5186_s10 + $0x4] sm:$0xf] %vm2934_vm8, %v2893_v50  ;;  %v3416_v51 = vsel %vm3279_vm9, %v3374_v35, 0.0  ;;  %v2538_v47 = vadd.f32 %v5130_v20, %v2221_v0  ;;  %v2706_v44 = vpop.f32.mrf.mxu0  ;;  %v1853_v25 = vrot.slane %v5222_v5, 2  ;;  %v2056_v50 = vadd.f32 %v1955_v7, %v4702_v29 }
 0x263   : > { %v3417_v30 = vadd.f32 %v3416_v51, %v3415_v48  ;;  %v2318_v49 = vsel %vm2263_vm5, %v2313_v19, %v2317_v6  ;;  %v2602_v39 = vrot.slane %v5222_v5, 3 }
 0x264   : > { %v2806_v1 = vadd.f32 %v2704_v12, %v2538_v47  ;;  %3919 = vmatmul.msk.bf16.gmra.mxu3 %vm733_vm2, %v2318_v49  ;;  %v5236_v29 = vsel %vm1829_vm6, %v1851_v57, %v1853_v25  ;;  %v6039_v47 = vrot.slane %v5176_v17, 3  ;;  %v3044_v57 = vpop.permute.xlu1 %3043 }
 0x266   : > { %v2852_v21 = vadd.f32 %v5169_v53, %v2806_v1  ;;  %v3238_v20 = vmul.f32 %v3039_v18, %v2806_v1 }
 0x267   : > { %v2121_v35 = vpop.f32.mrf.mxu2 }
 0x268   : > { %v2894_v0 = vpack.c.bf16 %v2852_v21, %v2852_v21  ;;  %v3283_v12 = vsel %vm3279_vm9, %v3238_v20, 0.0  ;;  %v3375_v16 = vmul.f32 %v3238_v20, %v2806_v1  ;;  %v2222_v42 = vadd.f32 %v2121_v35, %v2056_v50  ;;  %v5247_v8 = vpop.f32.mrf.mxu3  ;;  %v3005_v1 = vld [vmem:[%s4943_s21 + $0xa8] sm:$0xff] }
 0x269   : > { %v3284_v48 = vadd.f32 %v3283_v12, %v3282_v22  ;;  %v1958_v51 = vpop.f32.mrf.mxu1  ;;  %v2603_v22 = vsel %vm2580_vm7, %v6039_v47, %v2602_v39  ;;  %3133 = vperm.xlu0 %4005, %v3005_v1  }
 0x26a   : > { %2937 = vst.msk [vmem:[%s5186_s10 + $0x8] sm:$0xf] %vm2934_vm8, %v2894_v0  ;;  %v3418_v19 = vsel %vm3279_vm9, %v3375_v16, 0.0  ;;  %v2539_v7 = vadd.f32 %v5142_v56, %v2222_v42  ;;  %v2709_v18 = vpop.f32.mrf.mxu0  ;;  %v2057_v17 = vadd.f32 %v1958_v51, %v4712_v3 }
 0x26b   : > { %v3419_v49 = vadd.f32 %v3418_v19, %v3417_v30  ;;  %v3049_v19 = vpop.permute.xlu2 %3048 }
 0x26c   : > { %3873 = vmatmul.msk.bf16.gmra.mxu1 %vm733_vm2, %v5192_v38  ;;  %3895 = vmatmul.msk.bf16.gmra.mxu2 %vm733_vm2, %v5236_v29  ;;  %v2807_v56 = vadd.f32 %v2706_v44, %v2539_v7  ;;  %v3006_v38 = vld [vmem:[%s4943_s21 + $0xb0] sm:$0xff]  ;;  %v2319_v44 = vrot.slane %v4426_v45, 2  ;;  %v2320_v7 = vrot.slane %v5970_v24, 3 }
 0x26d   : > { %3939 = vmatmul.msk.bf16.gmra.mxu0 %vm733_vm2, %v2603_v22  ;;  %3138 = vperm.xlu1 %4006, %v3006_v38  }
 0x26e   : > { %v2853_v21 = vadd.f32 %v5169_v53, %v2807_v56  ;;  %v3239_v50 = vmul.f32 %v3044_v57, %v2807_v56  ;;  %v5267_v57 = vor.u32 %v2320_v7, %v2319_v44 }
 0x26f   : > { %v2124_v20 = vpop.f32.mrf.mxu2 }
 0x270   : > { %v2895_v35 = vpack.c.bf16 %v2853_v21, %v2853_v21  ;;  %v3285_v30 = vsel %vm3279_vm9, %v3239_v50, 0.0  ;;  %v3376_v0 = vmul.f32 %v3239_v50, %v2807_v56  ;;  %v2223_v12 = vadd.f32 %v2124_v20, %v2057_v17  ;;  %v5265_v22 = vpop.f32.mrf.mxu3  ;;  %v5270_v56 = vld [vmem:[%s4145_s18 + $0x70] sm:$0xff] }
 0x271   : > { %v3286_v16 = vadd.f32 %v3285_v30, %v3284_v48  ;;  %v1960_v42 = vpop.f32.mrf.mxu1  ;;  %v1855_v45 = vrot.slane %v5270_v56, 2  ;;  %v2322_v24 = vsel %vm2263_vm5, %v2317_v6, %v5267_v57  ;;  %v2604_v50 = vrot.slane %v5270_v56, 3  ;;  %v3009_v6 = vld [vmem:[%s4943_s21 + $0xc8] sm:$0xff] }
 0x272   : > { %2938 = vst.msk [vmem:[%s5186_s10 + $0xc] sm:$0xf] %vm2934_vm8, %v2895_v35  ;;  %v3420_v3 = vsel %vm3279_vm9, %v3376_v0, 0.0  ;;  %v2540_v51 = vadd.f32 %v5154_v9, %v2223_v12  ;;  %v2711_v47 = vpop.f32.mrf.mxu0  ;;  %v2058_v21 = vadd.f32 %v1960_v42, %v4722_v62 }
 0x273   : > { %v3421_v1 = vadd.f32 %v3420_v3, %v3419_v49  ;;  %v3008_v49 = vld [vmem:[%s4943_s21 + $0xc0] sm:$0xff]  ;;  %v5287_v62 = vsel %vm1829_vm6, %v1853_v25, %v1855_v45 }
 0x274   : > { %v2808_v48 = vadd.f32 %v2709_v18, %v2540_v51  ;;  %3920 = vmatmul.msk.bf16.gmra.mxu3 %vm733_vm2, %v2322_v24  ;;  %3148 = vperm.xlu0 %4005, %v3008_v49   ;;  %v3004_v3 = vld [vmem:[%s4943_s21 + $0xa0] sm:$0xff]  ;;  %v3054_v51 = vpop.permute.xlu2 %3053 }
 0x275   : > { %3153 = vperm.xlu1 %4006, %v3009_v6   ;;  %3128 = vperm.xlu2 %4007, %v3004_v3  }
 0x276   : > { %v2854_v17 = vadd.f32 %v5169_v53, %v2808_v48  ;;  %v3240_v9 = vmul.f32 %v3049_v19, %v2808_v48 }
 0x277   : > { %v2126_v20 = vpop.f32.mrf.mxu2 }
 0x278   : > { %v2896_v18 = vpack.c.bf16 %v2854_v17, %v2854_v17  ;;  %v3287_v35 = vsel %vm3279_vm9, %v3240_v9, 0.0  ;;  %v3377_v30 = vmul.f32 %v3240_v9, %v2808_v48  ;;  %v2224_v0 = vadd.f32 %v2126_v20, %v2058_v21  ;;  %v5298_v7 = vpop.f32.mrf.mxu3  ;;  %v6040_v48 = vld [vmem:[#allocation18_spill] sm:$0xff]  ;;  %v3011_v17 = vld [vmem:[%s4943_s21 + $0xd8] sm:$0xff] }
 0x279   : > { %v3288_v12 = vadd.f32 %v3287_v35, %v3286_v16  ;;  %v1963_v38 = vpop.f32.mrf.mxu1  ;;  %v2605_v16 = vsel %vm2580_vm7, %v2602_v39, %v2604_v50  ;;  %v3012_v20 = vld [vmem:[%s4943_s21 + $0xe0] sm:$0xff]  ;;  %v2323_v35 = vrot.slane %v5973_v32, 2 }
 0x27a   : > { %2939 = vst.msk [vmem:[%s5186_s10 + $0x10] sm:$0xf] %vm2934_vm8, %v2896_v18  ;;  %v3422_v42 = vsel %vm3279_vm9, %v3377_v30, 0.0  ;;  %v2541_v19 = vadd.f32 %v5171_v46, %v2224_v0  ;;  %v2714_v44 = vpop.f32.mrf.mxu0  ;;  %v2059_v5 = vadd.f32 %v1963_v38, %v6040_v48  ;;  %v2324_v30 = vrot.slane %v5974_v11, 3 }
 0x27b   : > { %v3423_v25 = vadd.f32 %v3422_v42, %v3421_v1 }
 0x27c   : > { %3874 = vmatmul.msk.bf16.gmra.mxu1 %vm733_vm2, %v5236_v29  ;;  %3896 = vmatmul.msk.bf16.gmra.mxu2 %vm733_vm2, %v5287_v62  ;;  %v2809_v46 = vadd.f32 %v2711_v47, %v2541_v19  ;;  %v5319_v3 = vor.u32 %v2324_v30, %v2323_v35 }
 0x27d   : > { %3940 = vmatmul.msk.bf16.gmra.mxu0 %vm733_vm2, %v2605_v16  ;;  %3163 = vperm.xlu0 %4005, %v3011_v17   ;;  %v3059_v16 = vpop.permute.xlu0 %3058 }
 0x27e   : > { %v2855_v39 = vadd.f32 %v5169_v53, %v2809_v46  ;;  %v3241_v24 = vmul.f32 %v3054_v51, %v2809_v46  ;;  %3168 = vperm.xlu1 %4006, %v3012_v20   ;;  %v5322_v51 = vld [vmem:[%s4145_s18 + $0x78] sm:$0xff]  ;;  %v2326_v11 = vsel %vm2263_vm5, %v5267_v57, %v5319_v3 }
 0x27f   : > { %v2129_v1 = vpop.f32.mrf.mxu2  ;;  %v1857_v32 = vrot.slane %v5322_v51, 2  ;;  %v3015_v57 = vld [vmem:[%s4943_s21 + $0xf8] sm:$0xff] }
 0x280   : > { %v2897_v21 = vpack.c.bf16 %v2855_v39, %v2855_v39  ;;  %v3289_v9 = vsel %vm3279_vm9, %v3241_v24, 0.0  ;;  %v3378_v49 = vmul.f32 %v3241_v24, %v2809_v46  ;;  %v2225_v29 = vadd.f32 %v2129_v1, %v2059_v5  ;;  %v5317_v42 = vpop.f32.mrf.mxu3  ;;  %v3014_v39 = vld [vmem:[%s4943_s21 + $0xf0] sm:$0xff] }
 0x281   : > { %v3290_v18 = vadd.f32 %v3289_v9, %v3288_v12  ;;  %v1965_v47 = vpop.f32.mrf.mxu1 }
 0x282   : > { %2940 = vst.msk [vmem:[%s5186_s10 + $0x14] sm:$0xf] %vm2934_vm8, %v2897_v21  ;;  %v3424_v0 = vsel %vm3279_vm9, %v3378_v49, 0.0  ;;  %v2542_v6 = vadd.f32 %v5200_v23, %v2225_v29  ;;  %v2716_v38 = vpop.f32.mrf.mxu0  ;;  %v6041_v23 = vld [vmem:[#allocation10_spill] sm:$0xff]  ;;  %v5340_v29 = vsel %vm1829_vm6, %v1855_v45, %v1857_v32 }
 0x283   : > { %v3425_v19 = vadd.f32 %v3424_v0, %v3423_v25  ;;  %v2060_v48 = vadd.f32 %v1965_v47, %v6041_v23  ;;  %v2606_v25 = vrot.slane %v5322_v51, 3  ;;  %v3007_v0 = vld [vmem:[%s4943_s21 + $0xb8] sm:$0xff] }
 0x284   : > { %v2810_v12 = vadd.f32 %v2714_v44, %v2542_v6  ;;  %3921 = vmatmul.msk.bf16.gmra.mxu3 %vm733_vm2, %v2326_v11  ;;  %v3064_v6 = vpop.permute.xlu1 %3063  ;;  %3143 = vperm.xlu2 %4007, %v3007_v0  }
 0x285   : > { %3178 = vperm.xlu0 %4005, %v3014_v39   ;;  %v2328_v39 = vrot.slane %v5978_v36, 3 }
 0x286   : > { %v2856_v46 = vadd.f32 %v5169_v53, %v2810_v12  ;;  %v3242_v5 = vmul.f32 %v3059_v16, %v2810_v12  ;;  %3183 = vperm.xlu1 %4006, %v3015_v57  }
 0x287   : > { %v2131_v24 = vpop.f32.mrf.mxu2 }
 0x288   : > { %v2898_v44 = vpack.c.bf16 %v2856_v46, %v2856_v46  ;;  %v3291_v17 = vsel %vm3279_vm9, %v3242_v5, 0.0  ;;  %v3379_v1 = vmul.f32 %v3242_v5, %v2810_v12  ;;  %v2226_v21 = vadd.f32 %v2131_v24, %v2060_v48  ;;  %v5351_v30 = vpop.f32.mrf.mxu3  ;;  %v3017_v12 = vld [vmem:[%s4943_s21 + $0x108] sm:$0xff]  ;;  %v3018_v48 = vld [vmem:[%s4943_s21 + $0x110] sm:$0xff] }
 0x289   : > { %v3292_v9 = vadd.f32 %v3291_v17, %v3290_v18  ;;  %v1968_v49 = vpop.f32.mrf.mxu1  ;;  %v2607_v18 = vsel %vm2580_vm7, %v2604_v50, %v2606_v25 }
 0x28a   : > { %2941 = vst.msk [vmem:[%s5186_s10 + $0x18] sm:$0xf] %vm2934_vm8, %v2898_v44  ;;  %v3426_v20 = vsel %vm3279_vm9, %v3379_v1, 0.0  ;;  %v2543_v47 = vadd.f32 %v5218_v43, %v2226_v21  ;;  %v2719_v35 = vpop.f32.mrf.mxu0  ;;  %v2061_v56 = vadd.f32 %v1968_v49, %v4752_v15  ;;  %v2327_v15 = vrot.slane %v5977_v13, 2  ;;  %v3010_v21 = vld [vmem:[%s4943_s21 + $0xd0] sm:$0xff]  ;;  %v5376_v13 = vld [vmem:[%s4145_s18 + $0x80] sm:$0xff] }
 0x28b   : > { %v3427_v45 = vadd.f32 %v3426_v20, %v3425_v19  ;;  %v1859_v36 = vrot.slane %v5376_v13, 2 }
 0x28c   : > { %3875 = vmatmul.msk.bf16.gmra.mxu1 %vm733_vm2, %v5287_v62  ;;  %3897 = vmatmul.msk.bf16.gmra.mxu2 %vm733_vm2, %v5340_v29  ;;  %v2811_v43 = vadd.f32 %v2716_v38, %v2543_v47  ;;  %v5373_v49 = vor.u32 %v2328_v39, %v2327_v15  ;;  %v3013_v15 = vld [vmem:[%s4943_s21 + $0xe8] sm:$0xff]  ;;  %v3074_v39 = vpop.permute.xlu0 %3073 }
 0x28d   : > { %3941 = vmatmul.msk.bf16.gmra.mxu0 %vm733_vm2, %v2607_v18  ;;  %3193 = vperm.xlu0 %4005, %v3017_v12   ;;  %v6042_v18 = vld [vmem:[#allocation21_spill] sm:$0xff] }
 0x28e   : > { %v2857_v50 = vadd.f32 %v5169_v53, %v2811_v43  ;;  %v3243_v16 = vmul.f32 %v3064_v6, %v2811_v43  ;;  %3198 = vperm.xlu1 %4006, %v3018_v48   ;;  %3158 = vperm.xlu2 %4007, %v3010_v21   ;;  %v2608_v6 = vrot.slane %v5376_v13, 3 }
 0x28f   : > { %v2134_v19 = vpop.f32.mrf.mxu2 }
 0x290   : > { %v2899_v11 = vpack.c.bf16 %v2857_v50, %v2857_v50  ;;  %v3293_v46 = vsel %vm3279_vm9, %v3243_v16, 0.0  ;;  %v3380_v62 = vmul.f32 %v3243_v16, %v2811_v43  ;;  %v2227_v23 = vadd.f32 %v2134_v19, %v2061_v56  ;;  %v5370_v1 = vpop.f32.mrf.mxu3  ;;  %v3020_v43 = vld [vmem:[%s4943_s21 + $0x120] sm:$0xff] }
 0x291   : > { %v3294_v5 = vadd.f32 %v3293_v46, %v3292_v9  ;;  %v1970_v38 = vpop.f32.mrf.mxu1  ;;  %v3069_v9 = vpop.permute.xlu2 %3068  ;;  %v5394_v46 = vsel %vm1829_vm6, %v1857_v32, %v1859_v36 }
 0x292   : > { %2942 = vst.msk [vmem:[%s5186_s10 + $0x1c] sm:$0xf] %vm2934_vm8, %v2899_v11  ;;  %v3428_v24 = vsel %vm3279_vm9, %v3380_v62, 0.0  ;;  %v2544_v44 = vadd.f32 %v5247_v8, %v2227_v23  ;;  %v2721_v17 = vpop.f32.mrf.mxu0  ;;  %v2330_v8 = vsel %vm2263_vm5, %v5319_v3, %v5373_v49  ;;  %v2062_v0 = vadd.f32 %v1970_v38, %v6042_v18  ;;  %v3021_v3 = vld [vmem:[%s4943_s21 + $0x128] sm:$0xff] }
 0x293   : > { %v3429_v57 = vadd.f32 %v3428_v24, %v3427_v45  ;;  %v2332_v18 = vrot.slane %v5983_v63, 3 }
 0x294   : > { %v2812_v20 = vadd.f32 %v2719_v35, %v2544_v44  ;;  %3922 = vmatmul.msk.bf16.gmra.mxu3 %vm733_vm2, %v2330_v8  ;;  %v3023_v44 = vld [vmem:[%s4943_s21 + $0x138] sm:$0xff]  ;;  %v3024_v8 = vld [vmem:[%s4943_s21 + $0x140] sm:$0xff] }
 0x295   : > { %3208 = vperm.xlu0 %4005, %v3020_v43  }
 0x296   : > { %v2858_v47 = vadd.f32 %v5169_v53, %v2812_v20  ;;  %v3244_v45 = vmul.f32 %v3069_v9, %v2812_v20  ;;  %3213 = vperm.xlu1 %4006, %v3021_v3   ;;  %3173 = vperm.xlu2 %4007, %v3013_v15  }
 0x297   : > { %v2136_v56 = vpop.f32.mrf.mxu2 }
 0x298   : > { %v2900_v35 = vpack.c.bf16 %v2858_v47, %v2858_v47  ;;  %v3295_v50 = vsel %vm3279_vm9, %v3244_v45, 0.0  ;;  %v3381_v16 = vmul.f32 %v3244_v45, %v2812_v20  ;;  %v2228_v12 = vadd.f32 %v2136_v56, %v2062_v0  ;;  %v5405_v38 = vpop.f32.mrf.mxu3 }
 0x299   : > { %v3296_v19 = vadd.f32 %v3295_v50, %v3294_v5  ;;  %v1973_v11 = vpop.f32.mrf.mxu1  ;;  %v2609_v5 = vsel %vm2580_vm7, %v2606_v25, %v2608_v6 }
 0x29a   : > { %2943 = vst.msk [vmem:[%s5186_s10 + $0x20] sm:$0xf] %vm2934_vm8, %v2900_v35  ;;  %v3430_v62 = vsel %vm3279_vm9, %v3381_v16, 0.0  ;;  %v2545_v23 = vadd.f32 %v5265_v22, %v2228_v12  ;;  %v2724_v48 = vpop.f32.mrf.mxu0  ;;  %v2063_v51 = vadd.f32 %v1973_v11, %v4772_v59  ;;  %v2331_v59 = vrot.slane %v5982_v60, 2  ;;  %v3016_v35 = vld [vmem:[%s4943_s21 + $0x100] sm:$0xff]  ;;  %v3079_v16 = vpop.permute.xlu1 %3078 }
 0x29b   : > { %v3431_v32 = vadd.f32 %v3430_v62, %v3429_v57 }
 0x29c   : > { %3876 = vmatmul.msk.bf16.gmra.mxu1 %vm733_vm2, %v5340_v29  ;;  %3898 = vmatmul.msk.bf16.gmra.mxu2 %vm733_vm2, %v5394_v46  ;;  %v2813_v22 = vadd.f32 %v2721_v17, %v2545_v23  ;;  %v2333_v12 = vor.u32 %v2332_v18, %v2331_v59 }
 0x29d   : > { %3942 = vmatmul.msk.bf16.gmra.mxu0 %vm733_vm2, %v2609_v5  ;;  %3223 = vperm.xlu0 %4005, %v3023_v44  }
 0x29e   : > { %v2859_v25 = vadd.f32 %v5169_v53, %v2813_v22  ;;  %v3245_v24 = vmul.f32 %v3074_v39, %v2813_v22  ;;  %3228 = vperm.xlu1 %4006, %v3024_v8   ;;  %3188 = vperm.xlu2 %4007, %v3016_v35   ;;  %v2334_v63 = vsel %vm2263_vm5, %v5373_v49, %v2333_v12  ;;  %v3084_v8 = vpop.permute.xlu2 %3083  ;;  %v2335_v35 = vrot.slane %v5987_v52, 2 }
 0x29f   : > { %v2139_v21 = vpop.f32.mrf.mxu2 }
 0x2a0   : > { %v2901_v57 = vpack.c.bf16 %v2859_v25, %v2859_v25  ;;  %v3297_v9 = vsel %vm3279_vm9, %v3245_v24, 0.0  ;;  %v3382_v29 = vmul.f32 %v3245_v24, %v2813_v22  ;;  %v2229_v20 = vadd.f32 %v2139_v21, %v2063_v51  ;;  %v5424_v56 = vpop.f32.mrf.mxu3 }
 0x2a1   : > { %v3298_v47 = vadd.f32 %v3297_v9, %v3296_v19  ;;  %v1975_v17 = vpop.f32.mrf.mxu1  ;;  %v5428_v19 = vld [vmem:[%s4145_s18 + $0x88] sm:$0xff] }
 0x2a2   : > { %2944 = vst.msk [vmem:[%s5186_s10 + $0x24] sm:$0xf] %vm2934_vm8, %v2901_v57  ;;  %v3432_v0 = vsel %vm3279_vm9, %v3382_v29, 0.0  ;;  %v2546_v45 = vadd.f32 %v5298_v7, %v2229_v20  ;;  %v2726_v43 = vpop.f32.mrf.mxu0  ;;  %v1861_v60 = vrot.slane %v5428_v19, 2  ;;  %v6043_v7 = vld [vmem:[#allocation29_spill] sm:$0xff]  ;;  %v2610_v5 = vrot.slane %v5428_v19, 3 }
 0x2a3   : > { %v3433_v50 = vadd.f32 %v3432_v0, %v3431_v32  ;;  %v2064_v62 = vadd.f32 %v1975_v17, %v6043_v7  ;;  %v3019_v29 = vld [vmem:[%s4943_s21 + $0x118] sm:$0xff]  ;;  %v3089_v7 = vpop.permute.xlu0 %3088 }
 0x2a4   : > { %v2814_v3 = vadd.f32 %v2724_v48, %v2546_v45  ;;  %3923 = vmatmul.msk.bf16.gmra.mxu3 %vm733_vm2, %v2334_v63  ;;  %v5443_v49 = vsel %vm1829_vm6, %v1859_v36, %v1861_v60  ;;  %v2611_v57 = vsel %vm2580_vm7, %v2608_v6, %v2610_v5  ;;  %v3022_v63 = vld [vmem:[%s4943_s21 + $0x130] sm:$0xff] }
 0x2a6   : > { %v2860_v11 = vadd.f32 %v5169_v53, %v2814_v3  ;;  %v3246_v23 = vmul.f32 %v3079_v16, %v2814_v3  ;;  %3203 = vperm.xlu2 %4007, %v3019_v29  }
 0x2a7   : > { %v2141_v15 = vpop.f32.mrf.mxu2 }
 0x2a8   : > { %v2902_v48 = vpack.c.bf16 %v2860_v11, %v2860_v11  ;;  %v3299_v32 = vsel %vm3279_vm9, %v3246_v23, 0.0  ;;  %v3383_v39 = vmul.f32 %v3246_v23, %v2814_v3  ;;  %v2230_v22 = vadd.f32 %v2141_v15, %v2064_v62  ;;  %v5454_v9 = vpop.f32.mrf.mxu3  ;;  %v5475_v15 = vld [vmem:[%s4145_s18 + $0x90] sm:$0xff] }
 0x2a9   : > { %v3300_v51 = vadd.f32 %v3299_v32, %v3298_v47  ;;  %v1978_v25 = vpop.f32.mrf.mxu1  ;;  %v1863_v52 = vrot.slane %v5475_v15, 2  ;;  %v6044_v32 = vld [vmem:[#allocation19_spill] sm:$0xff] }
 0x2aa   : > { %2945 = vst.msk [vmem:[%s5186_s10 + $0x28] sm:$0xf] %vm2934_vm8, %v2902_v48  ;;  %v3434_v24 = vsel %vm3279_vm9, %v3383_v39, 0.0  ;;  %v2547_v44 = vadd.f32 %v5317_v42, %v2230_v22  ;;  %v2729_v21 = vpop.f32.mrf.mxu0  ;;  %v2065_v13 = vadd.f32 %v1978_v25, %v4792_v33  ;;  %v2612_v22 = vrot.slane %v5475_v15, 3 }
 0x2ab   : > { %v3435_v20 = vadd.f32 %v3434_v24, %v3433_v50 }
 0x2ac   : > { %3877 = vmatmul.msk.bf16.gmra.mxu1 %vm733_vm2, %v5394_v46  ;;  %3899 = vmatmul.msk.bf16.gmra.mxu2 %vm733_vm2, %v5443_v49  ;;  %v2815_v42 = vadd.f32 %v2726_v43, %v2547_v44  ;;  %v2336_v43 = vrot.slane %v5988_v4, 3 }
 0x2ad   : > { %3943 = vmatmul.msk.bf16.gmra.mxu0 %vm733_vm2, %v2611_v57 }
 0x2ae   : > { %v2861_v36 = vadd.f32 %v5169_v53, %v2815_v42  ;;  %v3247_v6 = vmul.f32 %v3084_v8, %v2815_v42  ;;  %3218 = vperm.xlu2 %4007, %v3022_v63   ;;  %v2337_v62 = vor.u32 %v2336_v43, %v2335_v35 }
 0x2af   : > { %v2144_v47 = vpop.f32.mrf.mxu2 }
 0x2b0   : > { %v2903_v17 = vpack.c.bf16 %v2861_v36, %v2861_v36  ;;  %v3301_v59 = vsel %vm3279_vm9, %v3247_v6, 0.0  ;;  %v3384_v18 = vmul.f32 %v3247_v6, %v2815_v42  ;;  %v2231_v0 = vadd.f32 %v2144_v47, %v2065_v13  ;;  %v5471_v3 = vpop.f32.mrf.mxu3  ;;  %v3025_v6 = vld [vmem:[%s4943_s21 + $0x148] sm:$0xff] }
 0x2b1   : > { %v3302_v46 = vadd.f32 %v3301_v59, %v3300_v51  ;;  %v1980_v45 = vpop.f32.mrf.mxu1  ;;  %v2338_v4 = vsel %vm2263_vm5, %v2333_v12, %v2337_v62  ;;  %v1864_v12 = vsel %vm1829_vm6, %v1861_v60, %v1863_v52  ;;  %v2613_v13 = vsel %vm2580_vm7, %v2610_v5, %v2612_v22  ;;  %v6045_v60 = vld [vmem:[#allocation25_spill] sm:$0xff] }
 0x2b2   : > { %2946 = vst.msk [vmem:[%s5186_s10 + $0x2c] sm:$0xf] %vm2934_vm8, %v2903_v17  ;;  %v3436_v33 = vsel %vm3279_vm9, %v3384_v18, 0.0  ;;  %v2548_v50 = vadd.f32 %v5351_v30, %v2231_v0  ;;  %v2731_v16 = vpop.f32.mrf.mxu0  ;;  %v2066_v30 = vadd.f32 %v1980_v45, %v6044_v32  ;;  %v3094_v17 = vpop.permute.xlu1 %3093 }
 0x2b3   : > { %v3437_v11 = vadd.f32 %v3436_v33, %v3435_v20  ;;  %v6046_v33 = vshrl.u32 %v5984_v34, 16 }
 0x2b4   : > { %v2816_v23 = vadd.f32 %v2729_v21, %v2548_v50  ;;  %3924 = vmatmul.msk.bf16.gmra.mxu3 %vm733_vm2, %v2338_v4 }
 0x2b5   : > { %v2339_v50 = vrot.slane %v6046_v33, 2 }
 0x2b6   : > { %v2862_v48 = vadd.f32 %v5169_v53, %v2816_v23  ;;  %v3248_v39 = vmul.f32 %v3089_v7, %v2816_v23  ;;  %3233 = vperm.xlu2 %4007, %v3025_v6  }
 0x2b7   : > { %v2146_v51 = vpop.f32.mrf.mxu2 }
 0x2b8   : > { %v2904_v25 = vpack.c.bf16 %v2862_v48, %v2862_v48  ;;  %v3303_v24 = vsel %vm3279_vm9, %v3248_v39, 0.0  ;;  %v3385_v44 = vmul.f32 %v3248_v39, %v2816_v23  ;;  %v2232_v21 = vadd.f32 %v2146_v51, %v2066_v30  ;;  %v5498_v36 = vpop.f32.mrf.mxu3  ;;  %v3099_v48 = vpop.permute.xlu2 %3098  ;;  %v5518_v39 = vld [vmem:[%s4145_s18 + $0x98] sm:$0xff] }
 0x2b9   : > { %v3304_v57 = vadd.f32 %v3303_v24, %v3302_v46  ;;  %v1983_v29 = vpop.f32.mrf.mxu1  ;;  %v1865_v34 = vrot.slane %v5518_v39, 2 }
 0x2ba   : > { %2947 = vst.msk [vmem:[%s5186_s10 + $0x30] sm:$0xf] %vm2934_vm8, %v2904_v25  ;;  %v3438_v20 = vsel %vm3279_vm9, %v3385_v44, 0.0  ;;  %v2549_v8 = vadd.f32 %v5370_v1, %v2232_v21  ;;  %v2734_v42 = vpop.f32.mrf.mxu0  ;;  %v2067_v59 = vadd.f32 %v1983_v29, %v6045_v60  ;;  %v6047_v25 = vld [vmem:[#allocation30_spill] sm:$0xff] }
 0x2bb   : > { %v3439_v47 = vadd.f32 %v3438_v20, %v3437_v11 }
 0x2bc   : > { %3878 = vmatmul.msk.bf16.gmra.mxu1 %vm733_vm2, %v5443_v49  ;;  %3900 = vmatmul.msk.bf16.gmra.mxu2 %vm733_vm2, %v1864_v12  ;;  %v2817_v1 = vadd.f32 %v2731_v16, %v2549_v8  ;;  %v2340_v16 = vrot.slane %v5989_v40, 3 }
 0x2bd   : > { %3944 = vmatmul.msk.bf16.gmra.mxu0 %vm733_vm2, %v2613_v13 }
 0x2be   : > { %v2863_v19 = vadd.f32 %v5169_v53, %v2817_v1  ;;  %v3249_v5 = vmul.f32 %v3094_v17, %v2817_v1  ;;  %v2341_v32 = vor.u32 %v2340_v16, %v2339_v50  ;;  %v6050_v50 = vshll.u32 %v4855_v61, 16 }
 0x2bf   : > { %v2149_v18 = vpop.f32.mrf.mxu2 }
 0x2c0   : > { %v2905_v0 = vpack.c.bf16 %v2863_v19, %v2863_v19  ;;  %v3305_v46 = vsel %vm3279_vm9, %v3249_v5, 0.0  ;;  %v3386_v45 = vmul.f32 %v3249_v5, %v2817_v1  ;;  %v2233_v35 = vadd.f32 %v2149_v18, %v2067_v59  ;;  %v5515_v23 = vpop.f32.mrf.mxu3  ;;  %v3104_v19 = vpop.permute.xlu0 %3103 }
 0x2c1   : > { %v3306_v43 = vadd.f32 %v3305_v46, %v3304_v57  ;;  %v1985_v49 = vpop.f32.mrf.mxu1  ;;  %v2342_v40 = vsel %vm2263_vm5, %v2337_v62, %v2341_v32  ;;  %v1866_v62 = vsel %vm1829_vm6, %v1863_v52, %v1865_v34  ;;  %v2344_v16 = vrot.slane %v6050_v50, 3 }
 0x2c2   : > { %2948 = vst.msk [vmem:[%s5186_s10 + $0x34] sm:$0xf] %vm2934_vm8, %v2905_v0  ;;  %v3440_v63 = vsel %vm3279_vm9, %v3386_v45, 0.0  ;;  %v2550_v11 = vadd.f32 %v5405_v38, %v2233_v35  ;;  %v2736_v7 = vpop.f32.mrf.mxu0  ;;  %v2068_v24 = vadd.f32 %v1985_v49, %v6047_v25  ;;  %v2614_v38 = vrot.slane %v5518_v39, 3  ;;  %v5560_v25 = vld [vmem:[%s4145_s18 + $0xa0] sm:$0xff] }
 0x2c3   : > { %v3441_v4 = vadd.f32 %v3440_v63, %v3439_v47  ;;  %v6049_v49 = vshrl.u32 %v4855_v61, 16 }
 0x2c4   : > { %v2818_v30 = vadd.f32 %v2734_v42, %v2550_v11  ;;  %3925 = vmatmul.msk.bf16.gmra.mxu3 %vm733_vm2, %v2342_v40  ;;  %v2615_v1 = vsel %vm2580_vm7, %v2612_v22, %v2614_v38 }
 0x2c5   : > { %v2343_v33 = vrot.slane %v6049_v49, 2 }
 0x2c6   : > { %v2864_v51 = vadd.f32 %v5169_v53, %v2818_v30  ;;  %v3250_v44 = vmul.f32 %v3099_v48, %v2818_v30 }
 0x2c7   : > { %v2151_v21 = vpop.f32.mrf.mxu2  ;;  %v2345_v40 = vor.u32 %v2344_v16, %v2343_v33 }
 0x2c8   : > { %v2906_v57 = vpack.c.bf16 %v2864_v51, %v2864_v51  ;;  %v3307_v29 = vsel %vm3279_vm9, %v3250_v44, 0.0  ;;  %v3387_v20 = vmul.f32 %v3250_v44, %v2818_v30  ;;  %v2234_v8 = vadd.f32 %v2151_v21, %v2068_v24  ;;  %v5541_v60 = vpop.f32.mrf.mxu3  ;;  %v3109_v30 = vpop.permute.xlu1 %3108  ;;  %v6051_v21 = vld [vmem:[#allocation34_spill] sm:$0xff] }
 0x2c9   : > { %v3308_v42 = vadd.f32 %v3307_v29, %v3306_v43  ;;  %v1988_v13 = vpop.f32.mrf.mxu1  ;;  %v1867_v24 = vrot.slane %v5560_v25, 2  ;;  %v2346_v61 = vsel %vm2263_vm5, %v2341_v32, %v2345_v40 }
 0x2ca   : > { %2949 = vst.msk [vmem:[%s5186_s10 + $0x38] sm:$0xf] %vm2934_vm8, %v2906_v57  ;;  %v3442_v6 = vsel %vm3279_vm9, %v3387_v20, 0.0  ;;  %v2551_v47 = vadd.f32 %v5424_v56, %v2234_v8  ;;  %v2739_v17 = vpop.f32.mrf.mxu0  ;;  %v6048_v56 = vld [vmem:[#allocation5_spill] sm:$0xff] }
 0x2cb   : > { %v3443_v59 = vadd.f32 %v3442_v6, %v3441_v4  ;;  %v2069_v5 = vadd.f32 %v1988_v13, %v6048_v56  ;;  %v1868_v32 = vsel %vm1829_vm6, %v1865_v34, %v1867_v24 }
 0x2cc   : > { %3879 = vmatmul.msk.bf16.gmra.mxu1 %vm733_vm2, %v1864_v12  ;;  %3901 = vmatmul.msk.bf16.gmra.mxu2 %vm733_vm2, %v1866_v62  ;;  %v2819_v52 = vadd.f32 %v2736_v7, %v2551_v47 }
 0x2cd   : > { %3945 = vmatmul.msk.bf16.gmra.mxu0 %vm733_vm2, %v2615_v1 }
 0x2ce   : > { %v2865_v18 = vadd.f32 %v5169_v53, %v2819_v52  ;;  %v3251_v0 = vmul.f32 %v3104_v19, %v2819_v52 }
 0x2cf   : > { %v2154_v15 = vpop.f32.mrf.mxu2 }
 0x2d0   : > { %v2907_v46 = vpack.c.bf16 %v2865_v18, %v2865_v18  ;;  %v3309_v22 = vsel %vm3279_vm9, %v3251_v0, 0.0  ;;  %v3388_v45 = vmul.f32 %v3251_v0, %v2819_v52  ;;  %v2235_v35 = vadd.f32 %v2154_v15, %v2069_v5  ;;  %v5557_v4 = vpop.f32.mrf.mxu3  ;;  %v3114_v5 = vpop.permute.xlu2 %3113 }
 0x2d1   : > { %v3310_v43 = vadd.f32 %v3309_v22, %v3308_v42  ;;  %v1990_v12 = vpop.f32.mrf.mxu1 }
 0x2d2   : > { %2950 = vst.msk [vmem:[%s5186_s10 + $0x3c] sm:$0xf] %vm2934_vm8, %v2907_v46  ;;  %v3444_v63 = vsel %vm3279_vm9, %v3388_v45, 0.0  ;;  %v2552_v11 = vadd.f32 %v5454_v9, %v2235_v35  ;;  %v2741_v7 = vpop.f32.mrf.mxu0  ;;  %v2070_v57 = vadd.f32 %v1990_v12, %v6051_v21  ;;  %v2616_v9 = vrot.slane %v5560_v25, 3 }
 0x2d3   : > { %v3445_v48 = vadd.f32 %v3444_v63, %v3443_v59 }
 0x2d4   : > { %v2820_v51 = vadd.f32 %v2739_v17, %v2552_v11  ;;  %3926 = vmatmul.msk.bf16.gmra.mxu3 %vm733_vm2, %v2346_v61  ;;  %v2617_v52 = vsel %vm2580_vm7, %v2614_v38, %v2616_v9 }
 0x2d6   : > { %v2866_v44 = vadd.f32 %v5169_v53, %v2820_v51  ;;  %v3252_v29 = vmul.f32 %v3109_v30, %v2820_v51 }
 0x2d7   : > { %v2156_v20 = vpop.f32.mrf.mxu2 }
 0x2d8   : > { %v2908_v8 = vpack.c.bf16 %v2866_v44, %v2866_v44  ;;  %v3311_v42 = vsel %vm3279_vm9, %v3252_v29, 0.0  ;;  %v3389_v13 = vmul.f32 %v3252_v29, %v2820_v51  ;;  %v2236_v6 = vadd.f32 %v2156_v20, %v2070_v57  ;;  %v5583_v18 = vpop.f32.mrf.mxu3  ;;  %v5601_v51 = vld [vmem:[%s4327_s8] sm:$0xff] }
 0x2d9   : > { %v3312_v47 = vadd.f32 %v3311_v42, %v3310_v43  ;;  %v1993_v17 = vpop.f32.mrf.mxu1  ;;  %v1869_v61 = vrot.slane %v5601_v51, 2 }
 0x2da   : > { %2951 = vst.msk [vmem:[%s5186_s10 + $0x40] sm:$0xf] %vm2934_vm8, %v2908_v8  ;;  %v3446_v1 = vsel %vm3279_vm9, %v3389_v13, 0.0  ;;  %v2553_v59 = vadd.f32 %v5471_v3, %v2236_v6  ;;  %v2744_v19 = vpop.f32.mrf.mxu0  ;;  %v5589_v3 = vld [vmem:[%s4327_s8 + $0x10] sm:$0xff]  ;;  %v2071_v0 = vadd.f32 %v1993_v17, %v4862_v14 }
 0x2db   : > { %v3447_v56 = vadd.f32 %v3446_v1, %v3445_v48  ;;  %v2348_v46 = vshrl.u32 %v5589_v3, 16  ;;  %v2351_v22 = vshll.u32 %v5589_v3, 16 }
 0x2dc   : > { %3880 = vmatmul.msk.bf16.gmra.mxu1 %vm733_vm2, %v1866_v62  ;;  %3902 = vmatmul.msk.bf16.gmra.mxu2 %vm733_vm2, %v1868_v32  ;;  %v2821_v34 = vadd.f32 %v2741_v7, %v2553_v59  ;;  %v3119_v7 = vpop.permute.xlu0 %3118 }
 0x2dd   : > { %3946 = vmatmul.msk.bf16.gmra.mxu0 %vm733_vm2, %v2617_v52  ;;  %v2350_v33 = vrot.slane %v2348_v46, 2  ;;  %v2353_v50 = vrot.slane %v2351_v22, 3 }
 0x2de   : > { %v2867_v39 = vadd.f32 %v5169_v53, %v2821_v34  ;;  %v3253_v15 = vmul.f32 %v3114_v5, %v2821_v34 }
 0x2df   : > { %v2159_v38 = vpop.f32.mrf.mxu2  ;;  %v2354_v48 = vor.u32 %v2353_v50, %v2350_v33 }
 0x2e0   : > { %v2909_v45 = vpack.c.bf16 %v2867_v39, %v2867_v39  ;;  %v3313_v62 = vsel %vm3279_vm9, %v3253_v15, 0.0  ;;  %v3390_v35 = vmul.f32 %v3253_v15, %v2821_v34  ;;  %v2237_v43 = vadd.f32 %v2159_v38, %v2071_v0  ;;  %v5604_v44 = vpop.f32.mrf.mxu3 }
 0x2e1   : > { %v3314_v12 = vadd.f32 %v3313_v62, %v3312_v47  ;;  %v1995_v49 = vpop.f32.mrf.mxu1  ;;  %v2355_v21 = vsel %vm2263_vm5, %v2345_v40, %v2354_v48  ;;  %v1870_v40 = vsel %vm1829_vm6, %v1867_v24, %v1869_v61  ;;  %v5628_v24 = vld [vmem:[%s5834_s3] ss:$0 sm:$0xff] }
 0x2e2   : > { %2952 = vst.msk [vmem:[%s5186_s10 + $0x44] sm:$0xf] %vm2934_vm8, %v2909_v45  ;;  %v3448_v14 = vsel %vm3279_vm9, %v3390_v35, 0.0  ;;  %v2554_v16 = vadd.f32 %v5498_v36, %v2237_v43  ;;  %v2746_v63 = vpop.f32.mrf.mxu0  ;;  %v2072_v29 = vadd.f32 %v1995_v49, %v4875_v58  ;;  %v2618_v36 = vrot.slane %v5601_v51, 3  ;;  %v3129_v43 = vpop.permute.xlu2 %3128  ;;  %v5640_v49 = vld [vmem:[%s4327_s8 + $0x8] sm:$0xff] }
 0x2e3   : > { %v3449_v11 = vadd.f32 %v3448_v14, %v3447_v56  ;;  %v3124_v56 = vpop.permute.xlu1 %3123  ;;  %v1871_v33 = vrot.slane %v5640_v49, 2 }
 0x2e4   : > { %v2822_v30 = vadd.f32 %v2744_v19, %v2554_v16  ;;  %3927 = vmatmul.msk.bf16.gmra.mxu3 %vm733_vm2, %v2355_v21  ;;  %v2619_v19 = vsel %vm2580_vm7, %v2616_v9, %v2618_v36 }
 0x2e6   : > { %v2868_v57 = vadd.f32 %v5169_v53, %v2822_v30  ;;  %v3254_v20 = vmul.f32 %v3119_v7, %v2822_v30 }
 0x2e7   : > { %v2161_v8 = vpop.f32.mrf.mxu2 }
 0x2e8   : > { %v2910_v42 = vpack.c.bf16 %v2868_v57, %v2868_v57  ;;  %v3315_v13 = vsel %vm3279_vm9, %v3254_v20, 0.0  ;;  %v3391_v6 = vmul.f32 %v3254_v20, %v2822_v30  ;;  %v2238_v47 = vadd.f32 %v2161_v8, %v2072_v29  ;;  %v5632_v0 = vpop.f32.mrf.mxu3 }
 0x2e9   : > { %v3316_v17 = vadd.f32 %v3315_v13, %v3314_v12  ;;  %v1998_v1 = vpop.f32.mrf.mxu1  ;;  %v1872_v57 = vsel %vm1829_vm6, %v1869_v61, %v1871_v33 }
 0x2ea   : > { %2953 = vst.msk [vmem:[%s5186_s10 + $0x48] sm:$0xf] %vm2934_vm8, %v2910_v42  ;;  %v3450_v58 = vsel %vm3279_vm9, %v3391_v6, 0.0  ;;  %v2555_v53 = vadd.f32 %v5515_v23, %v2238_v47  ;;  %v2749_v59 = vpop.f32.mrf.mxu0  ;;  %v2073_v25 = vadd.f32 %v1998_v1, %v4890_v54  ;;  %v3134_v6 = vpop.permute.xlu0 %3133 }
 0x2eb   : > { %v3451_v52 = vadd.f32 %v3450_v58, %v3449_v11 }
 0x2ec   : > { %v2823_v5 = vadd.f32 %v2746_v63, %v2555_v53  ;;  %3881 = vmatmul.msk.bf16.gmra.mxu1 %vm733_vm2, %v1868_v32  ;;  %3903 = vmatmul.msk.bf16.gmra.mxu2 %vm733_vm2, %v1870_v40  ;;  %v2620_v63 = vrot.slane %v5640_v49, 3 }
 0x2ed   : > { %3947 = vmatmul.msk.bf16.gmra.mxu0 %vm733_vm2, %v2619_v19 }
 0x2ee   : > { %v2869_v23 = vadd.f32 %v5628_v24, %v2823_v5  ;;  %v3255_v9 = vmul.f32 %v3124_v56, %v2823_v5  ;;  %v2621_v42 = vsel %vm2580_vm7, %v2618_v36, %v2620_v63 }
 0x2ef   : > { %v2164_v34 = vpop.f32.mrf.mxu2 }
 0x2f0   : > { %v2911_v39 = vpack.c.bf16 %v2869_v23, %v2869_v23  ;;  %v3317_v32 = vsel %vm3279_vm9, %v3255_v9, 0.0  ;;  %v3392_v15 = vmul.f32 %v3255_v9, %v2823_v5  ;;  %v2239_v38 = vadd.f32 %v2164_v34, %v2073_v25  ;;  %v5648_v29 = vpop.f32.mrf.mxu3  ;;  %v3139_v9 = vpop.permute.xlu1 %3138 }
 0x2f1   : > { %v3318_v46 = vadd.f32 %v3317_v32, %v3316_v17  ;;  %v2000_v22 = vpop.f32.mrf.mxu1  ;;  %v2097_v34 = vrot.slane %v5589_v3, 2  ;;  %v6052_v32 = vld [vmem:[#allocation32_spill] sm:$0xff] }
 0x2f2   : > { %2954 = vst.msk [vmem:[%s5186_s10 + $0x4c] sm:$0xf] %vm2934_vm8, %v2911_v39  ;;  %v3452_v45 = vsel %vm3279_vm9, %v3392_v15, 0.0  ;;  %v2556_v62 = vadd.f32 %v5541_v60, %v2239_v38  ;;  %v2751_v35 = vpop.f32.mrf.mxu0  ;;  %v2074_v14 = vadd.f32 %v2000_v22, %v4903_v41 }
 0x2f3   : > { %v3453_v54 = vadd.f32 %v3452_v45, %v3451_v52 }
 0x2f4   : > { %v2824_v12 = vadd.f32 %v2749_v59, %v2556_v62 }
 0x2f6   : > { %v2870_v50 = vadd.f32 %v5628_v24, %v2824_v12  ;;  %v3256_v16 = vmul.f32 %v3129_v43, %v2824_v12 }
 0x2f7   : > { %v2166_v11 = vpop.f32.mrf.mxu2 }
 0x2f8   : > { %v2912_v7 = vpack.c.bf16 %v2870_v50, %v2870_v50  ;;  %v3319_v60 = vsel %vm3279_vm9, %v3256_v16, 0.0  ;;  %v3393_v48 = vmul.f32 %v3256_v16, %v2824_v12  ;;  %v2240_v30 = vadd.f32 %v2166_v11, %v2074_v14  ;;  %v5665_v25 = vpop.f32.mrf.mxu3 }
 0x2f9   : > { %v3320_v51 = vadd.f32 %v3319_v60, %v3318_v46  ;;  %v2003_v21 = vpop.f32.mrf.mxu1  ;;  %v2622_v46 = vrot.slane %v5589_v3, 3  ;;  %v2098_v12 = vsel %vm1829_vm6, %v1871_v33, %v2097_v34 }
 0x2fa   : > { %2955 = vst.msk [vmem:[%s5186_s10 + $0x50] sm:$0xf] %vm2934_vm8, %v2912_v7  ;;  %v3454_v20 = vsel %vm3279_vm9, %v3393_v48, 0.0  ;;  %v2557_v41 = vadd.f32 %v5557_v4, %v2240_v30  ;;  %v2754_v8 = vpop.f32.mrf.mxu0  ;;  %v2075_v17 = vadd.f32 %v2003_v21, %v4919_v31  ;;  %v3144_v7 = vpop.permute.xlu2 %3143  ;;  %v6053_v30 = vld [vmem:[#allocation6_spill] sm:$0xff] }
 0x2fb   : > { %v3455_v13 = vadd.f32 %v3454_v20, %v3453_v54  ;;  %v2623_v16 = vsel %vm2580_vm7, %v2620_v63, %v2622_v46  ;;  %v6055_v46 = vld [vmem:[#allocation9_spill] sm:$0xff] }
 0x2fc   : > { %v2825_v47 = vadd.f32 %v2751_v35, %v2557_v41  ;;  %3882 = vmatmul.msk.bf16.gmra.mxu1 %vm733_vm2, %v1870_v40  ;;  %3904 = vmatmul.msk.bf16.gmra.mxu2 %vm733_vm2, %v1872_v57 }
 0x2fd   : > { %3948 = vmatmul.msk.bf16.gmra.mxu0 %vm733_vm2, %v2621_v42 }
 0x2fe   : > { %v2871_v61 = vadd.f32 %v5628_v24, %v2825_v47  ;;  %v3257_v1 = vmul.f32 %v3134_v6, %v2825_v47 }
 0x2ff   : > { %v2169_v58 = vpop.f32.mrf.mxu2 }
 0x300   : > { %v2913_v4 = vpack.c.bf16 %v2871_v61, %v2871_v61  ;;  %v3321_v53 = vsel %vm3279_vm9, %v3257_v1, 0.0  ;;  %v3394_v36 = vmul.f32 %v3257_v1, %v2825_v47  ;;  %v2241_v59 = vadd.f32 %v2169_v58, %v2075_v17  ;;  %v5681_v33 = vpop.f32.mrf.mxu3  ;;  %v3149_v17 = vpop.permute.xlu0 %3148 }
 0x301   : > { %v3322_v19 = vadd.f32 %v3321_v53, %v3320_v51  ;;  %v2005_v52 = vpop.f32.mrf.mxu1 }
 0x302   : > { %2956 = vst.msk [vmem:[%s5186_s10 + $0x54] sm:$0xf] %vm2934_vm8, %v2913_v4  ;;  %v3456_v40 = vsel %vm3279_vm9, %v3394_v36, 0.0  ;;  %v2558_v56 = vadd.f32 %v5583_v18, %v2241_v59  ;;  %v2756_v5 = vpop.f32.mrf.mxu0  ;;  %v2076_v15 = vadd.f32 %v2005_v52, %v6052_v32  ;;  %v6054_v4 = vld [vmem:[#allocation11_spill] sm:$0xff]  ;;  %v3154_v32 = vpop.permute.xlu1 %3153 }
 0x303   : > { %v3457_v23 = vadd.f32 %v3456_v40, %v3455_v13 }
 0x304   : > { %v2826_v31 = vadd.f32 %v2754_v8, %v2558_v56 }
 0x306   : > { %v2872_v39 = vadd.f32 %v5628_v24, %v2826_v31  ;;  %v3258_v38 = vmul.f32 %v3139_v9, %v2826_v31 }
 0x307   : > { %v2171_v22 = vpop.f32.mrf.mxu2 }
 0x308   : > { %v2914_v45 = vpack.c.bf16 %v2872_v39, %v2872_v39  ;;  %v3323_v18 = vsel %vm3279_vm9, %v3258_v38, 0.0  ;;  %v3395_v62 = vmul.f32 %v3258_v38, %v2826_v31  ;;  %v2242_v35 = vadd.f32 %v2171_v22, %v2076_v15  ;;  %v2501_v59 = vpop.f32.mrf.mxu3 }
 0x309   : > { %v3324_v54 = vadd.f32 %v3323_v18, %v3322_v19  ;;  %v2008_v43 = vpop.f32.mrf.mxu1 }
 0x30a   : > { %2957 = vst.msk [vmem:[%s5186_s10 + $0x58] sm:$0xf] %vm2934_vm8, %v2914_v45  ;;  %v3458_v49 = vsel %vm3279_vm9, %v3395_v62, 0.0  ;;  %v2559_v50 = vadd.f32 %v5604_v44, %v2242_v35  ;;  %v2759_v14 = vpop.f32.mrf.mxu0  ;;  %v2077_v44 = vadd.f32 %v2008_v43, %v6053_v30 }
 0x30b   : > { %v3459_v3 = vadd.f32 %v3458_v49, %v3457_v23 }
 0x30c   : > { %v2827_v11 = vadd.f32 %v2756_v5, %v2559_v50  ;;  %3883 = vmatmul.msk.bf16.gmra.mxu1 %vm733_vm2, %v1872_v57  ;;  %3905 = vmatmul.msk.bf16.gmra.mxu2 %vm733_vm2, %v2098_v12 }
 0x30d   : > { %3949 = vmatmul.msk.bf16.gmra.mxu0 %vm733_vm2, %v2623_v16 }
 0x30e   : > { %v2873_v60 = vadd.f32 %v5628_v24, %v2827_v11  ;;  %v3259_v48 = vmul.f32 %v3144_v7, %v2827_v11 }
 0x30f   : > { %v2174_v51 = vpop.f32.mrf.mxu2 }
 0x310   : > { %v2915_v21 = vpack.c.bf16 %v2873_v60, %v2873_v60  ;;  %v3325_v63 = vsel %vm3279_vm9, %v3259_v48, 0.0  ;;  %v3396_v20 = vmul.f32 %v3259_v48, %v2827_v11  ;;  %v2243_v41 = vadd.f32 %v2174_v51, %v2077_v44  ;;  %v2503_v49 = vpop.f32.mrf.mxu3  ;;  %v3159_v11 = vpop.permute.xlu2 %3158  ;;  %v6056_v48 = vld [vmem:[#allocation13_spill] sm:$0xff] }
 0x311   : > { %v3326_v8 = vadd.f32 %v3325_v63, %v3324_v54  ;;  %v2010_v57 = vpop.f32.mrf.mxu1 }
 0x312   : > { %2958 = vst.msk [vmem:[%s5186_s10 + $0x5c] sm:$0xf] %vm2934_vm8, %v2915_v21  ;;  %v3460_v42 = vsel %vm3279_vm9, %v3396_v20, 0.0  ;;  %v2560_v13 = vadd.f32 %v5632_v0, %v2243_v41  ;;  %v2761_v6 = vpop.f32.mrf.mxu0  ;;  %v2078_v53 = vadd.f32 %v2010_v57, %v6054_v4 }
 0x313   : > { %v3461_v47 = vadd.f32 %v3460_v42, %v3459_v3 }
 0x314   : > { %v2828_v61 = vadd.f32 %v2759_v14, %v2560_v13 }
 0x316   : > { %v2874_v1 = vadd.f32 %v5628_v24, %v2828_v61  ;;  %v3260_v58 = vmul.f32 %v3149_v17, %v2828_v61 }
 0x317   : > { %v2176_v36 = vpop.f32.mrf.mxu2 }
 0x318   : > { %v2916_v19 = vpack.c.bf16 %v2874_v1, %v2874_v1  ;;  %v3327_v52 = vsel %vm3279_vm9, %v3260_v58, 0.0  ;;  %v3397_v40 = vmul.f32 %v3260_v58, %v2828_v61  ;;  %v2244_v56 = vadd.f32 %v2176_v36, %v2078_v53  ;;  %v3164_v61 = vpop.permute.xlu0 %3163 }
 0x319   : > { %v3328_v5 = vadd.f32 %v3327_v52, %v3326_v8  ;;  %v2013_v23 = vpop.f32.mrf.mxu1 }
 0x31a   : > { %2959 = vst.msk [vmem:[%s5186_s10 + $0x60] sm:$0xf] %vm2934_vm8, %v2916_v19  ;;  %v3462_v0 = vsel %vm3279_vm9, %v3397_v40, 0.0  ;;  %v2561_v31 = vadd.f32 %v5648_v29, %v2244_v56  ;;  %v2764_v9 = vpop.f32.mrf.mxu0  ;;  %v2079_v22 = vadd.f32 %v2013_v23, %v6055_v46 }
 0x31b   : > { %v3463_v34 = vadd.f32 %v3462_v0, %v3461_v47 }
 0x31c   : > { %v2829_v39 = vadd.f32 %v2761_v6, %v2561_v31  ;;  %v2506_v6 = vpop.f32.mrf.mxu3 }
 0x31e   : > { %v2875_v15 = vadd.f32 %v5628_v24, %v2829_v39  ;;  %v3261_v38 = vmul.f32 %v3154_v32, %v2829_v39  ;;  %v6057_v32 = vld [vmem:[#allocation14_spill] sm:$0xff] }
 0x31f   : > { %v2179_v45 = vpop.f32.mrf.mxu2 }
 0x320   : > { %v2917_v18 = vpack.c.bf16 %v2875_v15, %v2875_v15  ;;  %v3329_v62 = vsel %vm3279_vm9, %v3261_v38, 0.0  ;;  %v3398_v35 = vmul.f32 %v3261_v38, %v2829_v39  ;;  %v2245_v54 = vadd.f32 %v2179_v45, %v2079_v22 }
 0x321   : > { %v3330_v43 = vadd.f32 %v3329_v62, %v3328_v5  ;;  %v2015_v12 = vpop.f32.mrf.mxu1 }
 0x322   : > { %2960 = vst.msk [vmem:[%s5186_s10 + $0x64] sm:$0xf] %vm2934_vm8, %v2917_v18  ;;  %v3464_v29 = vsel %vm3279_vm9, %v3398_v35, 0.0  ;;  %v2562_v50 = vadd.f32 %v5665_v25, %v2245_v54  ;;  %v2766_v14 = vpop.f32.mrf.mxu0  ;;  %v2080_v30 = vadd.f32 %v2015_v12, %v6056_v48 }
 0x323   : > { %v3465_v16 = vadd.f32 %v3464_v29, %v3463_v34 }
 0x324   : > { %v2830_v3 = vadd.f32 %v2764_v9, %v2562_v50  ;;  %v3169_v9 = vpop.permute.xlu1 %3168  ;;  %v2508_v34 = vpop.f32.mrf.mxu3 }
 0x325   : > { %v3174_v50 = vpop.permute.xlu2 %3173 }
 0x326   : > { %v2876_v7 = vadd.f32 %v5628_v24, %v2830_v3  ;;  %v3262_v60 = vmul.f32 %v3159_v11, %v2830_v3 }
 0x327   : > { %v2181_v44 = vpop.f32.mrf.mxu2 }
 0x328   : > { %v2918_v51 = vpack.c.bf16 %v2876_v7, %v2876_v7  ;;  %v3331_v21 = vsel %vm3279_vm9, %v3262_v60, 0.0  ;;  %v3399_v63 = vmul.f32 %v3262_v60, %v2830_v3  ;;  %v2246_v20 = vadd.f32 %v2181_v44, %v2080_v30  ;;  %v6058_v3 = vld [vmem:[#allocation12_spill] sm:$0xff] }
 0x329   : > { %v3332_v41 = vadd.f32 %v3331_v21, %v3330_v43  ;;  %v2018_v8 = vpop.f32.mrf.mxu1 }
 0x32a   : > { %2961 = vst.msk [vmem:[%s5186_s10 + $0x68] sm:$0xf] %vm2934_vm8, %v2918_v51  ;;  %v3466_v25 = vsel %vm3279_vm9, %v3399_v63, 0.0  ;;  %v2563_v57 = vadd.f32 %v5681_v33, %v2246_v20  ;;  %v2769_v42 = vpop.f32.mrf.mxu0  ;;  %v2081_v58 = vadd.f32 %v2018_v8, %v5001_v27 }
 0x32b   : > { %v3467_v13 = vadd.f32 %v3466_v25, %v3465_v16 }
 0x32c   : > { %v2831_v47 = vadd.f32 %v2766_v14, %v2563_v57  ;;  %v2511_v60 = vpop.f32.mrf.mxu3  ;;  %v3179_v57 = vpop.permute.xlu0 %3178 }
 0x32e   : > { %v2877_v17 = vadd.f32 %v5628_v24, %v2831_v47  ;;  %v3263_v1 = vmul.f32 %v3164_v61, %v2831_v47 }
 0x32f   : > { %v2184_v4 = vpop.f32.mrf.mxu2 }
 0x330   : > { %v2919_v53 = vpack.c.bf16 %v2877_v17, %v2877_v17  ;;  %v3333_v36 = vsel %vm3279_vm9, %v3263_v1, 0.0  ;;  %v3400_v19 = vmul.f32 %v3263_v1, %v2831_v47  ;;  %v2247_v52 = vadd.f32 %v2184_v4, %v2081_v58  ;;  %v6059_v47 = vld [vmem:[#allocation22_spill] sm:$0xff] }
 0x331   : > { %v3334_v40 = vadd.f32 %v3333_v36, %v3332_v41  ;;  %v2020_v56 = vpop.f32.mrf.mxu1 }
 0x332   : > { %2962 = vst.msk [vmem:[%s5186_s10 + $0x6c] sm:$0xf] %vm2934_vm8, %v2919_v53  ;;  %v3468_v33 = vsel %vm3279_vm9, %v3400_v19, 0.0  ;;  %v2564_v5 = vadd.f32 %v2501_v59, %v2247_v52  ;;  %v2771_v23 = vpop.f32.mrf.mxu0  ;;  %v2082_v15 = vadd.f32 %v2020_v56, %v6057_v32 }
 0x333   : > { %v3469_v0 = vadd.f32 %v3468_v33, %v3467_v13 }
 0x334   : > { %v2832_v31 = vadd.f32 %v2769_v42, %v2564_v5  ;;  %v2513_v52 = vpop.f32.mrf.mxu3 }
 0x336   : > { %v2878_v27 = vadd.f32 %v5628_v24, %v2832_v31  ;;  %v3264_v39 = vmul.f32 %v3169_v9, %v2832_v31  ;;  %v6060_v9 = vld [vmem:[#allocation23_spill] sm:$0xff] }
 0x337   : > { %v2186_v38 = vpop.f32.mrf.mxu2 }
 0x338   : > { %v2920_v46 = vpack.c.bf16 %v2878_v27, %v2878_v27  ;;  %v3335_v22 = vsel %vm3279_vm9, %v3264_v39, 0.0  ;;  %v3401_v45 = vmul.f32 %v3264_v39, %v2832_v31  ;;  %v2248_v18 = vadd.f32 %v2186_v38, %v2082_v15 }
 0x339   : > { %v3336_v62 = vadd.f32 %v3335_v22, %v3334_v40  ;;  %v2023_v35 = vpop.f32.mrf.mxu1 }
 0x33a   : > { %2963 = vst.msk [vmem:[%s5186_s10 + $0x70] sm:$0xf] %vm2934_vm8, %v2920_v46  ;;  %v3470_v59 = vsel %vm3279_vm9, %v3401_v45, 0.0  ;;  %v2565_v54 = vadd.f32 %v2503_v49, %v2248_v18  ;;  %v2774_v43 = vpop.f32.mrf.mxu0  ;;  %v2083_v11 = vadd.f32 %v2023_v35, %v6058_v3 }
 0x33b   : > { %v3471_v12 = vadd.f32 %v3470_v59, %v3469_v0 }
 0x33c   : > { %v2833_v29 = vadd.f32 %v2771_v23, %v2565_v54  ;;  %v3184_v23 = vpop.permute.xlu1 %3183  ;;  %v2516_v59 = vpop.f32.mrf.mxu3 }
 0x33e   : > { %v2879_v14 = vadd.f32 %v5628_v24, %v2833_v29  ;;  %v3265_v16 = vmul.f32 %v3174_v50, %v2833_v29  ;;  %v6061_v50 = vld [vmem:[#allocation15_spill] sm:$0xff] }
 0x33f   : > { %v2189_v7 = vpop.f32.mrf.mxu2 }
 0x340   : > { %v2921_v48 = vpack.c.bf16 %v2879_v14, %v2879_v14  ;;  %v3337_v30 = vsel %vm3279_vm9, %v3265_v16, 0.0  ;;  %v3402_v44 = vmul.f32 %v3265_v16, %v2833_v29  ;;  %v2249_v51 = vadd.f32 %v2189_v7, %v2083_v11 }
 0x341   : > { %v3338_v21 = vadd.f32 %v3337_v30, %v3336_v62  ;;  %v2025_v63 = vpop.f32.mrf.mxu1 }
 0x342   : > { %2964 = vst.msk [vmem:[%s5186_s10 + $0x74] sm:$0xf] %vm2934_vm8, %v2921_v48  ;;  %v3472_v49 = vsel %vm3279_vm9, %v3402_v44, 0.0  ;;  %v2566_v20 = vadd.f32 %v2506_v6, %v2249_v51  ;;  %v2776_v41 = vpop.f32.mrf.mxu0  ;;  %v2084_v61 = vadd.f32 %v2025_v63, %v6059_v47 }
 0x343   : > { %v3473_v8 = vadd.f32 %v3472_v49, %v3471_v12 }
 0x344   : > { %v2834_v25 = vadd.f32 %v2774_v43, %v2566_v20  ;;  %v3189_v43 = vpop.permute.xlu2 %3188  ;;  %v3194_v20 = vpop.permute.xlu0 %3193 }
 0x346   : > { %v2880_v42 = vadd.f32 %v5628_v24, %v2834_v25  ;;  %v3266_v13 = vmul.f32 %v3179_v57, %v2834_v25  ;;  %v6062_v57 = vld [vmem:[#allocation26_spill] sm:$0xff] }
 0x347   : > { %v2191_v17 = vpop.f32.mrf.mxu2 }
 0x348   : > { %v2922_v1 = vpack.c.bf16 %v2880_v42, %v2880_v42  ;;  %v3339_v58 = vsel %vm3279_vm9, %v3266_v13, 0.0  ;;  %v3403_v4 = vmul.f32 %v3266_v13, %v2834_v25  ;;  %v2250_v53 = vadd.f32 %v2191_v17, %v2084_v61 }
 0x349   : > { %v3340_v36 = vadd.f32 %v3339_v58, %v3338_v21  ;;  %v2028_v19 = vpop.f32.mrf.mxu1 }
 0x34a   : > { %2965 = vst.msk [vmem:[%s5186_s10 + $0x78] sm:$0xf] %vm2934_vm8, %v2922_v1  ;;  %v3474_v6 = vsel %vm3279_vm9, %v3403_v4, 0.0  ;;  %v2567_v40 = vadd.f32 %v2508_v34, %v2250_v53  ;;  %v2779_v56 = vpop.f32.mrf.mxu0  ;;  %v2085_v27 = vadd.f32 %v2028_v19, %v6060_v9 }
 0x34b   : > { %v3475_v33 = vadd.f32 %v3474_v6, %v3473_v8 }
 0x34c   : > { %v2835_v5 = vadd.f32 %v2776_v41, %v2567_v40  ;;  %v2518_v41 = vpop.f32.mrf.mxu3  ;;  %v3199_v40 = vpop.permute.xlu1 %3198 }
 0x34e   : > { %v2881_v0 = vadd.f32 %v5628_v24, %v2835_v5  ;;  %v3267_v31 = vmul.f32 %v3184_v23, %v2835_v5 }
 0x34f   : > { %v2194_v39 = vpop.f32.mrf.mxu2 }
 0x350   : > { %v2923_v32 = vpack.c.bf16 %v2881_v0, %v2881_v0  ;;  %v3341_v15 = vsel %vm3279_vm9, %v3267_v31, 0.0  ;;  %v3404_v38 = vmul.f32 %v3267_v31, %v2835_v5  ;;  %v2251_v46 = vadd.f32 %v2194_v39, %v2085_v27  ;;  %v6063_v5 = vld [vmem:[#allocation53_spill] sm:$0xff] }
 0x351   : > { %v3342_v22 = vadd.f32 %v3341_v15, %v3340_v36  ;;  %v2030_v45 = vpop.f32.mrf.mxu1 }
 0x352   : > { %2966 = vst.msk [vmem:[%s5186_s10 + $0x7c] sm:$0xf] %vm2934_vm8, %v2923_v32  ;;  %v3476_v34 = vsel %vm3279_vm9, %v3404_v38, 0.0  ;;  %v2568_v18 = vadd.f32 %v2511_v60, %v2251_v46  ;;  %v2781_v62 = vpop.f32.mrf.mxu0  ;;  %v2086_v14 = vadd.f32 %v2030_v45, %v6061_v50 }
 0x353   : > { %v3477_v35 = vadd.f32 %v3476_v34, %v3475_v33 }
 0x354   : > { %v2836_v54 = vadd.f32 %v2779_v56, %v2568_v18  ;;  %v2521_v31 = vpop.f32.mrf.mxu3 }
 0x356   : > { %v2882_v12 = vadd.f32 %v5628_v24, %v2836_v54  ;;  %v3268_v29 = vmul.f32 %v3189_v43, %v2836_v54 }
 0x357   : > { %v2196_v16 = vpop.f32.mrf.mxu2 }
 0x358   : > { %v2924_v3 = vpack.c.bf16 %v2882_v12, %v2882_v12  ;;  %v3343_v11 = vsel %vm3279_vm9, %v3268_v29, 0.0  ;;  %v3405_v7 = vmul.f32 %v3268_v29, %v2836_v54  ;;  %v2252_v48 = vadd.f32 %v2196_v16, %v2086_v14 }
 0x359   : > { %v3344_v30 = vadd.f32 %v3343_v11, %v3342_v22  ;;  %v2033_v44 = vpop.f32.mrf.mxu1 }
 0x35a   : > { %2967 = vst.msk [vmem:[%s5186_s10 + $0x80] sm:$0xf] %vm2934_vm8, %v2924_v3  ;;  %v3478_v60 = vsel %vm3279_vm9, %v3405_v7, 0.0  ;;  %v2569_v51 = vadd.f32 %v2513_v52, %v2252_v48  ;;  %v2784_v21 = vpop.f32.mrf.mxu0  ;;  %v2087_v42 = vadd.f32 %v2033_v44, %v6062_v57 }
 0x35b   : > { %v3479_v63 = vadd.f32 %v3478_v60, %v3477_v35 }
 0x35c   : > { %v2837_v49 = vadd.f32 %v2781_v62, %v2569_v51  ;;  %v3204_v62 = vpop.permute.xlu2 %3203  ;;  %v2523_v11 = vpop.f32.mrf.mxu3 }
 0x35e   : > { %v2883_v8 = vadd.f32 %v5628_v24, %v2837_v49  ;;  %v3269_v25 = vmul.f32 %v3194_v20, %v2837_v49 }
 0x35f   : > { %v2199_v13 = vpop.f32.mrf.mxu2 }
 0x360   : > { %v2925_v47 = vpack.c.bf16 %v2883_v8, %v2883_v8  ;;  %v3345_v61 = vsel %vm3279_vm9, %v3269_v25, 0.0  ;;  %v3406_v17 = vmul.f32 %v3269_v25, %v2837_v49  ;;  %v2253_v1 = vadd.f32 %v2199_v13, %v2087_v42 }
 0x361   : > { %v3346_v58 = vadd.f32 %v3345_v61, %v3344_v30  ;;  %v2035_v4 = vpop.f32.mrf.mxu1 }
 0x362   : > { %2968 = vst.msk [vmem:[%s5186_s10 + $0x84] sm:$0xf] %vm2934_vm8, %v2925_v47  ;;  %v3480_v53 = vsel %vm3279_vm9, %v3406_v17, 0.0  ;;  %v2570_v36 = vadd.f32 %v2516_v59, %v2253_v1  ;;  %v2786_v19 = vpop.f32.mrf.mxu0  ;;  %v2088_v23 = vadd.f32 %v2035_v4, %v6063_v5 }
 0x363   : > { %v3481_v52 = vadd.f32 %v3480_v53, %v3479_v63 }
 0x364   : > { %v2838_v6 = vadd.f32 %v2784_v21, %v2570_v36  ;;  %v2526_v17 = vpop.f32.mrf.mxu3 }
 0x366   : > { %v2884_v56 = vadd.f32 %v5628_v24, %v2838_v6  ;;  %v3270_v33 = vmul.f32 %v3199_v40, %v2838_v6 }
 0x367   : > { %v2201_v0 = vpop.f32.mrf.mxu2 }
 0x368   : > { %v2926_v9 = vpack.c.bf16 %v2884_v56, %v2884_v56  ;;  %v3347_v27 = vsel %vm3279_vm9, %v3270_v33, 0.0  ;;  %v3407_v39 = vmul.f32 %v3270_v33, %v2838_v6  ;;  %v2254_v32 = vadd.f32 %v2201_v0, %v2088_v23 }
 0x369   : > { %v3348_v15 = vadd.f32 %v3347_v27, %v3346_v58  ;;  %v2038_v38 = vpop.f32.mrf.mxu1  ;;  %v3219_v27 = vpop.permute.xlu2 %3218 }
 0x36a   : > { %2969 = vst.msk [vmem:[%s5186_s10 + $0x88] sm:$0xf] %vm2934_vm8, %v2926_v9  ;;  %v3482_v46 = vsel %vm3279_vm9, %v3407_v39, 0.0  ;;  %v2571_v22 = vadd.f32 %v2518_v41, %v2254_v32  ;;  %v2789_v45 = vpop.f32.mrf.mxu0  ;;  %v2089_v54 = vadd.f32 %v2038_v38, %v5097_v2  ;;  %v3209_v2 = vpop.permute.xlu0 %3208  ;;  %v4060_v9 = vmov 0.0  }
 0x36b   : > { %v3483_v34 = vadd.f32 %v3482_v46, %v3481_v52  ;;  %2982 = vst.msk [vmem:[%s5779_s12] sm:$0x1] %vm2981_vm10, %v4060_v9 }
 0x36c   : > { %v2839_v18 = vadd.f32 %v2786_v19, %v2571_v22  ;;  %v2528_v39 = vpop.f32.mrf.mxu3  ;;  %2983 = vst.msk [vmem:[%s5787_s15] sm:$0x1] %vm2981_vm10, %v4060_v9 }
 0x36e   : > { %v2885_v35 = vadd.f32 %v5628_v24, %v2839_v18  ;;  %v3271_v59 = vmul.f32 %v3204_v62, %v2839_v18 }
 0x36f   : > { %v2204_v43 = vpop.f32.mrf.mxu2 }
 0x370   : > { %v2927_v12 = vpack.c.bf16 %v2885_v35, %v2885_v35  ;;  %v3349_v29 = vsel %vm3279_vm9, %v3271_v59, 0.0  ;;  %v3408_v50 = vmul.f32 %v3271_v59, %v2839_v18  ;;  %v2255_v14 = vadd.f32 %v2204_v43, %v2089_v54 }
 0x371   : > { %v3350_v16 = vadd.f32 %v3349_v29, %v3348_v15  ;;  %v2040_v3 = vpop.f32.mrf.mxu1 }
 0x372   : > { %2970 = vst.msk [vmem:[%s5186_s10 + $0x8c] sm:$0xf] %vm2934_vm8, %v2927_v12  ;;  %v3484_v7 = vsel %vm3279_vm9, %v3408_v50, 0.0  ;;  %v2572_v48 = vadd.f32 %v2521_v31, %v2255_v14  ;;  %v2791_v44 = vpop.f32.mrf.mxu0  ;;  %v2090_v63 = vadd.f32 %v2040_v3, %v5111_v10  ;;  %v3214_v10 = vpop.permute.xlu1 %3213 }
 0x373   : > { %v3485_v30 = vadd.f32 %v3484_v7, %v3483_v34  ;;  %v3224_v50 = vpop.permute.xlu0 %3223 }
 0x374   : > { %v2840_v60 = vadd.f32 %v2789_v45, %v2572_v48  ;;  %v2531_v3 = vpop.f32.mrf.mxu3 }
 0x376   : > { %v2886_v51 = vadd.f32 %v5628_v24, %v2840_v60  ;;  %v3272_v21 = vmul.f32 %v3209_v2, %v2840_v60 }
 0x377   : > { %v2206_v49 = vpop.f32.mrf.mxu2 }
 0x378   : > { %v2928_v20 = vpack.c.bf16 %v2886_v51, %v2886_v51  ;;  %v3351_v41 = vsel %vm3279_vm9, %v3272_v21, 0.0  ;;  %v3409_v8 = vmul.f32 %v3272_v21, %v2840_v60  ;;  %v2256_v25 = vadd.f32 %v2206_v49, %v2090_v63 }
 0x379   : > { %v3352_v57 = vadd.f32 %v3351_v41, %v3350_v16  ;;  %v2043_v42 = vpop.f32.mrf.mxu1 }
 0x37a   : > { %2971 = vst.msk [vmem:[%s5186_s10 + $0x90] sm:$0xf] %vm2934_vm8, %v2928_v20  ;;  %v3486_v13 = vsel %vm3279_vm9, %v3409_v8, 0.0  ;;  %v2573_v47 = vadd.f32 %v2523_v11, %v2256_v25  ;;  %v2794_v58 = vpop.f32.mrf.mxu0  ;;  %v2091_v36 = vadd.f32 %v2043_v42, %v5121_v55  ;;  %v3229_v41 = vpop.permute.xlu1 %3228 }
 0x37b   : > { %v3487_v61 = vadd.f32 %v3486_v13, %v3485_v30 }
 0x37c   : > { %v2841_v1 = vadd.f32 %v2791_v44, %v2573_v47 }
 0x37e   : > { %v2887_v4 = vadd.f32 %v5628_v24, %v2841_v1  ;;  %v3273_v53 = vmul.f32 %v3214_v10, %v2841_v1 }
 0x37f   : > { %v2209_v19 = vpop.f32.mrf.mxu2 }
 0x380   : > { %v2929_v52 = vpack.c.bf16 %v2887_v4, %v2887_v4  ;;  %v3353_v6 = vsel %vm3279_vm9, %v3273_v53, 0.0  ;;  %v3410_v40 = vmul.f32 %v3273_v53, %v2841_v1  ;;  %v2257_v56 = vadd.f32 %v2209_v19, %v2091_v36  ;;  %v2533_v1 = vpop.f32.mrf.mxu3  ;;  %v3234_v19 = vpop.permute.xlu2 %3233 }
 0x381   : > { %v3354_v33 = vadd.f32 %v3353_v6, %v3352_v57  ;;  %v2045_v5 = vpop.f32.mrf.mxu1 }
 0x382   : > { %2972 = vst.msk [vmem:[%s5186_s10 + $0x94] sm:$0xf] %vm2934_vm8, %v2929_v52  ;;  %v3488_v23 = vsel %vm3279_vm9, %v3410_v40, 0.0  ;;  %v2574_v0 = vadd.f32 %v2526_v17, %v2257_v56  ;;  %v2092_v38 = vadd.f32 %v2045_v5, %v5135_v26  ;;  %v2796_v46 = vpop.f32.mrf.mxu0 }
 0x383   : > { %v3489_v55 = vadd.f32 %v3488_v23, %v3487_v61 }
 0x384   : > { %v2842_v31 = vadd.f32 %v2794_v58, %v2574_v0 }
 0x386   : > { %v2888_v32 = vadd.f32 %v5628_v24, %v2842_v31  ;;  %v3274_v15 = vmul.f32 %v3219_v27, %v2842_v31 }
 0x387   : > { %v2211_v22 = vpop.f32.mrf.mxu2 }
 0x388   : > { %v2930_v45 = vpack.c.bf16 %v2888_v32, %v2888_v32  ;;  %v3355_v34 = vsel %vm3279_vm9, %v3274_v15, 0.0  ;;  %v3411_v18 = vmul.f32 %v3274_v15, %v2842_v31  ;;  %v2258_v62 = vadd.f32 %v2211_v22, %v2092_v38  ;;  %v3278_v38 = vld [vmem:[%s5779_s12] sm:$0x1] }
 0x389   : > { %v3356_v35 = vadd.f32 %v3355_v34, %v3354_v33  ;;  %v2048_v59 = vpop.f32.mrf.mxu1 }
 0x38a   : > { %2973 = vst.msk [vmem:[%s5186_s10 + $0x98] sm:$0xf] %vm2934_vm8, %v2930_v45  ;;  %v3490_v54 = vsel %vm3279_vm9, %v3411_v18, 0.0  ;;  %v2575_v43 = vadd.f32 %v2528_v39, %v2258_v62  ;;  %v2093_v16 = vadd.f32 %v2048_v59, %v5145_v37  ;;  %v2799_v2 = vpop.f32.mrf.mxu0  ;;  %v3372_v45 = vld [vmem:[%s5787_s15] sm:$0x1] }
 0x38b   : > { %v3491_v12 = vadd.f32 %v3490_v54, %v3489_v55 }
 0x38c   : > { %v2843_v29 = vadd.f32 %v2796_v46, %v2575_v43 }
 0x38e   : > { %v2889_v26 = vadd.f32 %v5628_v24, %v2843_v29  ;;  %v3275_v14 = vmul.f32 %v3224_v50, %v2843_v29 }
 0x38f   : > { %v2214_v11 = vpop.f32.mrf.mxu2 }
 0x390   : > { %v2931_v7 = vpack.c.bf16 %v2889_v26, %v2889_v26  ;;  %v3357_v48 = vsel %vm3279_vm9, %v3275_v14, 0.0  ;;  %v3412_v30 = vmul.f32 %v3275_v14, %v2843_v29  ;;  %v2259_v44 = vadd.f32 %v2214_v11, %v2093_v16 }
 0x391   : > { %v3358_v60 = vadd.f32 %v3357_v48, %v3356_v35  ;;  %v2050_v49 = vpop.f32.mrf.mxu1 }
 0x392   : > { %2974 = vst.msk [vmem:[%s5186_s10 + $0x9c] sm:$0xf] %vm2934_vm8, %v2931_v7  ;;  %v3492_v51 = vsel %vm3279_vm9, %v3412_v30, 0.0  ;;  %v2576_v21 = vadd.f32 %v2531_v3, %v2259_v44  ;;  %v2094_v25 = vadd.f32 %v2050_v49, %v5159_v28  ;;  %v2801_v53 = vpop.f32.mrf.mxu0 }
 0x393   : > { %v3493_v63 = vadd.f32 %v3492_v51, %v3491_v12 }
 0x394   : > { %v2844_v20 = vadd.f32 %v2799_v2, %v2576_v21 }
 0x396   : > { %v2890_v37 = vadd.f32 %v5628_v24, %v2844_v20  ;;  %v3276_v8 = vmul.f32 %v3229_v41, %v2844_v20 }
 0x397   : > { %v2216_v57 = vpop.f32.mrf.mxu2 }
 0x398   : > { %v2932_v42 = vpack.c.bf16 %v2890_v37, %v2890_v37  ;;  %v3359_v13 = vsel %vm3279_vm9, %v3276_v8, 0.0  ;;  %v3413_v47 = vmul.f32 %v3276_v8, %v2844_v20  ;;  %v2260_v61 = vadd.f32 %v2216_v57, %v2094_v25 }
 0x399   : > { %v3360_v17 = vadd.f32 %v3359_v13, %v3358_v60 }
 0x39a   : > { %2975 = vst.msk [vmem:[%s5186_s10 + $0xa0] sm:$0xf] %vm2934_vm8, %v2932_v42  ;;  %v3494_v10 = vsel %vm3279_vm9, %v3413_v47, 0.0  ;;  %v2577_v58 = vadd.f32 %v2533_v1, %v2260_v61 }
 0x39b   : > { %v3495_v4 = vadd.f32 %v3494_v10, %v3493_v63 }
 0x39c   : > { %v2845_v36 = vadd.f32 %v2801_v53, %v2577_v58 }
 0x39e   : > { %v2891_v28 = vadd.f32 %v5628_v24, %v2845_v36  ;;  %v3277_v52 = vmul.f32 %v3234_v19, %v2845_v36 }
 0x3a0   : > { %v2933_v6 = vpack.c.bf16 %v2891_v28, %v2891_v28  ;;  %v3361_v40 = vsel %vm3279_vm9, %v3277_v52, 0.0  ;;  %v3414_v56 = vmul.f32 %v3277_v52, %v2845_v36 }
 0x3a1   : > { %v3362_v33 = vadd.f32 %v3361_v40, %v3360_v17 }
 0x3a2   : > { %2976 = vst.msk [vmem:[%s5186_s10 + $0xa4] sm:$0xf] %vm2934_vm8, %v2933_v6  ;;  %v3496_v5 = vsel %vm3279_vm9, %v3414_v56, 0.0 }
 0x3a3   : > { %v3363_v23 = vrot.slane %v3362_v33, 4  ;;  %v3497_v0 = vadd.f32 %v3496_v5, %v3495_v4 }
 0x3a5   : > { %v3364_v55 = vadd.f32 %v3363_v23, %v3362_v33  ;;  %v3498_v31 = vrot.slane %v3497_v0, 4 }
 0x3a7   : > { %v3365_v9 = vrot.slane %v3364_v55, 2  ;;  %v3499_v24 = vadd.f32 %v3498_v31, %v3497_v0 }
 0x3a9   : > { %v3366_v27 = vadd.f32 %v3365_v9, %v3364_v55  ;;  %v3500_v39 = vrot.slane %v3499_v24, 2 }
 0x3ab   : > { %v3367_v32 = vrot.slane %v3366_v27, 1  ;;  %v3501_v15 = vadd.f32 %v3500_v39, %v3499_v24 }
 0x3ad   : > { %v3368_v46 = vadd.f32 %v3367_v32, %v3366_v27  ;;  %v3502_v22 = vrot.slane %v3501_v15, 1 }
 0x3af   : > { %v3369_v34 = vadd.f32 %v3368_v46, %v3278_v38  ;;  %v3503_v18 = vadd.f32 %v3502_v22, %v3501_v15 }
 0x3b1   : > { %3371 = vst.msk [vmem:[%s5779_s12] sm:$0x1] %vm2981_vm10, %v3369_v34  ;;  %v3504_v62 = vadd.f32 %v3503_v18, %v3372_v45 }
 0x3b3   : > { %3505 = vst.msk [vmem:[%s5787_s15] sm:$0x1] %vm2981_vm10, %v3504_v62 }
 0x3b4 PF: > { %s18_s26 = sadd.s32 1, %s4057_s26   ;;  %s6064_s24 = smov %s4053_s25 }
 0x3b5   : > { %p15_p8 = scmp.ge.s32.totalorder %s18_s26, 4   ;;  %s6065_s25 = smov %s6067_s27 }
 0x3b7   :  { %17 = sbr.rel (!%p15_p8) target bundleno = 2 (0x2), region = 112 }

</bundles_post_ra>
